<compile_context>
chip_gen: v7x
topology: tpu7x:2x2x1
jax: 0.10.0
libtpu: 0.0.40
codegen_flags: <defaults>
</compile_context>

<pallas_src>
import jax
import jax.numpy as jnp
from jax import lax
from jax.experimental import pallas as pl
from jax.experimental.pallas import tpu as pltpu

HIDDEN = 64        # real LSTM hidden size (nn.LSTM(hidden_size=64))
HP = 128           # lane-padded gate block width (one full 128-lane vreg per gate)
SUBLANES = 8       # batch padded to a multiple of 8 sublanes
UNROLL_T_MAX = 64  # fully unroll the time loop up to this T; roll it past that


def _lstm_fc_kernel(x_ref, wih0_ref, b0_ref, whh0_ref, wih1_ref, whh1_ref,
                    b1_ref, wfc_ref, bfc_ref, out_ref):
    # x_ref:  (T, Bp, 1)    time-major input, f32
    # wih0:   (1, 4Hp)      layer-0 input weight (transposed, gate-block padded), f32
    # b0:     (1, 4Hp)      bias_ih_l0 + bias_hh_l0 (padded), f32
    # whh0:   (H, 4Hp)      layer-0 recurrent weight (transposed, K unpadded), bf16
    # wih1:   (H, 4Hp)      layer-1 input weight (transposed, K unpadded), bf16
    # whh1:   (H, 4Hp)      layer-1 recurrent weight (transposed, K unpadded), bf16
    # b1:     (1, 4Hp)      bias_ih_l1 + bias_hh_l1 (padded), f32
    # wfc:    (H, 1), bfc: (1, 1)   final Linear, f32
    # out:    (Bp, 1)
    T, Bp, _ = x_ref.shape
    H, Hp = HIDDEN, HP

    wih0 = wih0_ref[...]
    b0 = b0_ref[...]
    b1 = b1_ref[...]
    whh0 = whh0_ref[...]
    wih1 = wih1_ref[...]
    whh1 = whh1_ref[...]
    # TODO(synk): on v6e/v7x, if the bundle dump shows Mosaic re-pushing these
    # loop-invariant RHS weights into the MXU every step, drive the MXU explicitly with
    # pltpu.matmul_push_rhs / matmul_acc_lhs / matmul_pop to keep them staged-resident.

    def sig(v):
        # Exact identity for sigmoid: one EUP tanh + cheap VPU instead of exp + recip.
        return 0.5 * jnp.tanh(0.5 * v) + 0.5

    def gates_to_hc(g, c_prev):
        # PyTorch gate order (i, f, g, o). Each gate block is 128-lane padded, so every
        # slice starts on a vreg boundary and is H=64 lanes wide (no cross-lane shuffles).
        i = sig(g[:, 0 * Hp:0 * Hp + H])
        f = sig(g[:, 1 * Hp:1 * Hp + H])
        gg = jnp.tanh(g[:, 2 * Hp:2 * Hp + H])
        o = sig(g[:, 3 * Hp:3 * Hp + H])
        c_new = f * c_prev + i * gg
        h_new = o * jnp.tanh(c_new)
        return h_new, c_new

    def step(g0_in_t, h0, c0, h1, c1):
        # Layer-1 recurrent dot depends only on h1[t-1]; it can issue while the
        # h0-dependent chain is still in flight (off the critical path).
        g1_rec = jnp.dot(h1.astype(jnp.bfloat16), whh1,
                         preferred_element_type=jnp.float32)
        # Layer 0 (K=64 recurrent dot + hoisted input contribution).
        g0 = g0_in_t + jnp.dot(h0.astype(jnp.bfloat16), whh0,
                               preferred_element_type=jnp.float32)
        h0n, c0n = gates_to_hc(g0, c0)
        # Layer 1 (second K=64 dot on the new h0).
        g1 = g1_rec + jnp.dot(h0n.astype(jnp.bfloat16), wih1,
                              preferred_element_type=jnp.float32) + b1
        h1n, c1n = gates_to_hc(g1, c1)
        return h0n, c0n, h1n, c1n

    z = jnp.zeros((Bp, H), jnp.float32)
    h0, c0, h1, c1 = z, z, z, z

    if T <= UNROLL_T_MAX:
        # Hoist the layer-0 input contribution for all timesteps (one-time VPU work, off
        # the serial chain) and fully unroll: T is static and small here.
        g0_in = x_ref[...] * wih0 + b0                     # (T, Bp, 4Hp) f32
        for t in range(T):
            h0, c0, h1, c1 = step(g0_in[t], h0, c0, h1, c1)
    else:
        # Large-T guard: no (T, Bp, 4Hp) hoist (VMEM ceiling, esp. v7x) and a rolled
        # loop (code-size / compile-time). Per-step input contribution is cheap VPU work.
        def body(t, carry):
            h0_, c0_, h1_, c1_ = carry
            g0_in_t = x_ref[t] * wih0 + b0                 # (Bp, 4Hp)
            return step(g0_in_t, h0_, c0_, h1_, c1_)
        h0, c0, h1, c1 = lax.fori_loop(0, T, body, (h0, c0, h1, c1), unroll=8)

    # Last timestep of the top-layer output -> Linear(64, 1).
    out = jnp.dot(h1, wfc_ref[...], preferred_element_type=jnp.float32) + bfc_ref[...]
    out_ref[...] = out.astype(out_ref.dtype)


# ----------------------------------------------------------------------------- wrapper

def _pad_gate_cols(w, h=HIDDEN, hp=HP):
    """(R, 4h) -> (R, 4hp): zero-pad each h-wide gate block (i, f, g, o) to hp lanes."""
    r = w.shape[0]
    return jnp.pad(w.reshape(r, 4, h), ((0, 0), (0, 0), (0, hp - h))).reshape(r, 4 * hp)


def weight_model_forward(x, params):
    """x: (B, T, 1) batch-first, like the PyTorch module's forward. Returns (B, 1)."""
    B, T, _ = x.shape
    Bp = ((B + SUBLANES - 1) // SUBLANES) * SUBLANES

    # Time-major, batch padded to a sublane multiple (padded rows discarded at the end).
    x_tm = jnp.transpose(x, (1, 0, 2)).astype(jnp.float32)        # (T, B, 1)
    x_tm = jnp.pad(x_tm, ((0, 0), (0, Bp - B), (0, 0)))           # (T, Bp, 1)

    # Gate-column padding only (no contraction padding). Recurrent weights in bf16:
    # the MXU runs f32 dots in bf16 under default precision anyway; this just halves
    # the per-step weight streaming.
    wih0 = _pad_gate_cols(params['wih0_t']).astype(jnp.float32)   # (1, 4Hp)   elementwise
    b0 = _pad_gate_cols(params['b0']).astype(jnp.float32)         # (1, 4Hp)
    b1 = _pad_gate_cols(params['b1']).astype(jnp.float32)         # (1, 4Hp)
    whh0 = _pad_gate_cols(params['whh0_t']).astype(jnp.bfloat16)  # (H, 4Hp)
    wih1 = _pad_gate_cols(params['wih1_t']).astype(jnp.bfloat16)  # (H, 4Hp)
    whh1 = _pad_gate_cols(params['whh1_t']).astype(jnp.bfloat16)  # (H, 4Hp)
    wfc = params['wfc'].astype(jnp.float32)                       # (H, 1)
    bfc = params['bfc'].astype(jnp.float32)                       # (1, 1)

    args = (x_tm, wih0, b0, whh0, wih1, whh1, b1, wfc, bfc)

    # Advisory cost hint for XLA's scheduler around the custom call.
    flops = 2 * T * Bp * 3 * HIDDEN * 4 * HP + 2 * Bp * HIDDEN
    transcendentals = T * Bp * 2 * 5 * HIDDEN
    bytes_accessed = int(sum(a.size * a.dtype.itemsize for a in args)) + Bp * 4

    # TODO(synk): for large real batches on v7x, add a leading batch-tile grid axis with
    # dimension_semantics=("parallel",) so both TensorCores are used.
    out = pl.pallas_call(
        _lstm_fc_kernel,
        out_shape=jax.ShapeDtypeStruct((Bp, 1), jnp.float32),
        in_specs=[pl.BlockSpec(memory_space=pltpu.MemorySpace.VMEM)] * len(args),
        out_specs=pl.BlockSpec(memory_space=pltpu.MemorySpace.VMEM),
        cost_estimate=pl.CostEstimate(flops=flops,
                                      transcendentals=transcendentals,
                                      bytes_accessed=bytes_accessed),
    )(*args)
    return out[:B]


# ----------------------------------------------------------------------------- params / reference

def init_params(key, hidden=HIDDEN):
    """Deterministic synthetic init matching the PyTorch parameter shapes."""
    k = 1.0 / jnp.sqrt(jnp.float32(hidden))
    keys = jax.random.split(key, 10)
    u = lambda kk, shape: jax.random.uniform(kk, shape, jnp.float32, -k, k)

    # nn.LSTM(input_size=1, hidden_size=64, num_layers=2)
    w_ih_l0 = u(keys[0], (4 * hidden, 1))
    w_hh_l0 = u(keys[1], (4 * hidden, hidden))
    b_ih_l0 = u(keys[2], (4 * hidden,))
    b_hh_l0 = u(keys[3], (4 * hidden,))
    w_ih_l1 = u(keys[4], (4 * hidden, hidden))
    w_hh_l1 = u(keys[5], (4 * hidden, hidden))
    b_ih_l1 = u(keys[6], (4 * hidden,))
    b_hh_l1 = u(keys[7], (4 * hidden,))
    # nn.Linear(64, 1)
    w_fc = u(keys[8], (1, hidden))
    b_fc = u(keys[9], (1,))

    return dict(
        wih0_t=w_ih_l0.T,                                   # (1, 4H)
        whh0_t=w_hh_l0.T,                                   # (H, 4H)
        b0=(b_ih_l0 + b_hh_l0).reshape(1, 4 * hidden),      # (1, 4H)
        wih1_t=w_ih_l1.T,                                   # (H, 4H)
        whh1_t=w_hh_l1.T,                                   # (H, 4H)
        b1=(b_ih_l1 + b_hh_l1).reshape(1, 4 * hidden),      # (1, 4H)
        wfc=w_fc.T,                                         # (H, 1)
        bfc=b_fc.reshape(1, 1),                             # (1, 1)
    )


def weight_model_reference(x, params, hidden=HIDDEN):
    """Pure-JAX reference (same math as torch nn.LSTM + Linear), unpadded."""
    B, T, _ = x.shape
    H = hidden

    def gates_to_hc(g, c_prev):
        i = jax.nn.sigmoid(g[:, 0:H])
        f = jax.nn.sigmoid(g[:, H:2 * H])
        gg = jnp.tanh(g[:, 2 * H:3 * H])
        o = jax.nn.sigmoid(g[:, 3 * H:4 * H])
        c_new = f * c_prev + i * gg
        return o * jnp.tanh(c_new), c_new

    def step(carry, x_t):
        h0, c0, h1, c1 = carry
        g0 = x_t * params['wih0_t'] + h0 @ params['whh0_t'] + params['b0']
        h0n, c0n = gates_to_hc(g0, c0)
        g1 = h0n @ params['wih1_t'] + h1 @ params['whh1_t'] + params['b1']
        h1n, c1n = gates_to_hc(g1, c1)
        return (h0n, c0n, h1n, c1n), None

    z = jnp.zeros((B, H), jnp.float32)
    x_tm = jnp.transpose(x, (1, 0, 2)).astype(jnp.float32)    # (T, B, 1)
    (h0, c0, h1, c1), _ = lax.scan(step, (z, z, z, z), x_tm)
    return h1 @ params['wfc'] + params['bfc']


if __name__ == "__main__":
    key = jax.random.PRNGKey(0)
    k_x, k_p = jax.random.split(key)

    B, T = 2, 8
    x = jax.random.normal(k_x, (B, T, 1), jnp.float32)        # (batch, seq, features=1)
    params = init_params(k_p)

    out = weight_model_forward(x, params)
    out = jax.block_until_ready(out)

    ref = weight_model_reference(x, params)
    assert out.shape == (B, 1), out.shape
    # Tolerance note: kernel stores recurrent weights in bf16 (the MXU computes default-
    # precision f32 dots in bf16 anyway, so kernel vs. reference typically agree to ~1e-5);
    # the looser bound also covers a full-f32 reference dot path.
    if not jnp.allclose(out, ref, atol=1e-2, rtol=1e-2):
        raise AssertionError(f"mismatch: kernel={out} ref={ref}")

    print("KERNEL_OK")
</pallas_src>

<mosaic_0001>
module attributes {stable_mosaic.version = 11 : i64} {
  func.func @_lstm_fc_kernel(%arg0: memref<8x8x1xf32, #tpu.memory_space<vmem>>, %arg1: memref<1x512xf32, #tpu.memory_space<vmem>>, %arg2: memref<1x512xf32, #tpu.memory_space<vmem>>, %arg3: memref<64x512xbf16, #tpu.memory_space<vmem>>, %arg4: memref<64x512xbf16, #tpu.memory_space<vmem>>, %arg5: memref<64x512xbf16, #tpu.memory_space<vmem>>, %arg6: memref<1x512xf32, #tpu.memory_space<vmem>>, %arg7: memref<64x1xf32, #tpu.memory_space<vmem>>, %arg8: memref<1x1xf32, #tpu.memory_space<vmem>>, %arg9: memref<8x1xf32, #tpu.memory_space<vmem>>) attributes {dimension_semantics = [], scalar_prefetch = 0 : i64, scratch_operands = 0 : i64, tpu.core_type = #tpu.core_type<tc>} {
    %c0 = arith.constant 0 : index
    %c0_0 = arith.constant 0 : index
    %0 = vector.load %arg1[%c0, %c0_0] : memref<1x512xf32, #tpu.memory_space<vmem>>, vector<1x512xf32>
    %c0_1 = arith.constant 0 : index
    %c0_2 = arith.constant 0 : index
    %1 = vector.load %arg2[%c0_1, %c0_2] : memref<1x512xf32, #tpu.memory_space<vmem>>, vector<1x512xf32>
    %c0_3 = arith.constant 0 : index
    %c0_4 = arith.constant 0 : index
    %2 = vector.load %arg6[%c0_3, %c0_4] : memref<1x512xf32, #tpu.memory_space<vmem>>, vector<1x512xf32>
    %c0_5 = arith.constant 0 : index
    %c0_6 = arith.constant 0 : index
    %3 = vector.load %arg3[%c0_5, %c0_6] : memref<64x512xbf16, #tpu.memory_space<vmem>>, vector<64x512xbf16>
    %c0_7 = arith.constant 0 : index
    %c0_8 = arith.constant 0 : index
    %4 = vector.load %arg4[%c0_7, %c0_8] : memref<64x512xbf16, #tpu.memory_space<vmem>>, vector<64x512xbf16>
    %c0_9 = arith.constant 0 : index
    %c0_10 = arith.constant 0 : index
    %5 = vector.load %arg5[%c0_9, %c0_10] : memref<64x512xbf16, #tpu.memory_space<vmem>>, vector<64x512xbf16>
    %cst = arith.constant 0.000000e+00 : f32
    %6 = vector.broadcast %cst : f32 to vector<8x64xf32>
    %c0_11 = arith.constant 0 : index
    %c0_12 = arith.constant 0 : index
    %c0_13 = arith.constant 0 : index
    %7 = vector.load %arg0[%c0_11, %c0_12, %c0_13] : memref<8x8x1xf32, #tpu.memory_space<vmem>>, vector<8x8x1xf32>
    %8 = vector.shape_cast %0 : vector<1x512xf32> to vector<1x1x512xf32>
    %9 = vector.broadcast %7 : vector<8x8x1xf32> to vector<8x8x512xf32>
    %10 = vector.broadcast %8 : vector<1x1x512xf32> to vector<8x8x512xf32>
    %11 = arith.mulf %9, %10 : vector<8x8x512xf32>
    %12 = vector.shape_cast %1 : vector<1x512xf32> to vector<1x1x512xf32>
    %13 = vector.broadcast %12 : vector<1x1x512xf32> to vector<8x8x512xf32>
    %14 = arith.addf %11, %13 : vector<8x8x512xf32>
    %15 = vector.extract_strided_slice %14 {offsets = [0, 0, 0], sizes = [1, 8, 512], strides = [1, 1, 1]} : vector<8x8x512xf32> to vector<1x8x512xf32>
    %16 = vector.shape_cast %15 : vector<1x8x512xf32> to vector<8x512xf32>
    %17 = arith.truncf %6 : vector<8x64xf32> to vector<8x64xbf16>
    %cst_14 = arith.constant dense<0.000000e+00> : vector<8x512xf32>
    %18 = tpu.matmul %17, %5, %cst_14 {dimension_numbers = #tpu.dot_dimension_numbers<[1], [0], [0], [1], [0, 0, 1, 1], [], []>} : vector<8x64xbf16>, vector<64x512xbf16>, vector<8x512xf32> -> vector<8x512xf32>
    %19 = arith.truncf %6 : vector<8x64xf32> to vector<8x64xbf16>
    %cst_15 = arith.constant dense<0.000000e+00> : vector<8x512xf32>
    %20 = tpu.matmul %19, %3, %cst_15 {dimension_numbers = #tpu.dot_dimension_numbers<[1], [0], [0], [1], [0, 0, 1, 1], [], []>} : vector<8x64xbf16>, vector<64x512xbf16>, vector<8x512xf32> -> vector<8x512xf32>
    %21 = arith.addf %16, %20 : vector<8x512xf32>
    %22 = vector.extract_strided_slice %21 {offsets = [0, 0], sizes = [8, 64], strides = [1, 1]} : vector<8x512xf32> to vector<8x64xf32>
    %cst_16 = arith.constant 5.000000e-01 : f32
    %23 = vector.broadcast %cst_16 : f32 to vector<8x64xf32>
    %24 = arith.mulf %23, %22 : vector<8x64xf32>
    %25 = math.tanh %24 : vector<8x64xf32>
    %cst_17 = arith.constant 5.000000e-01 : f32
    %26 = vector.broadcast %cst_17 : f32 to vector<8x64xf32>
    %27 = arith.mulf %26, %25 : vector<8x64xf32>
    %cst_18 = arith.constant 5.000000e-01 : f32
    %28 = vector.broadcast %cst_18 : f32 to vector<8x64xf32>
    %29 = arith.addf %27, %28 : vector<8x64xf32>
    %30 = vector.extract_strided_slice %21 {offsets = [0, 128], sizes = [8, 64], strides = [1, 1]} : vector<8x512xf32> to vector<8x64xf32>
    %cst_19 = arith.constant 5.000000e-01 : f32
    %31 = vector.broadcast %cst_19 : f32 to vector<8x64xf32>
    %32 = arith.mulf %31, %30 : vector<8x64xf32>
    %33 = math.tanh %32 : vector<8x64xf32>
    %cst_20 = arith.constant 5.000000e-01 : f32
    %34 = vector.broadcast %cst_20 : f32 to vector<8x64xf32>
    %35 = arith.mulf %34, %33 : vector<8x64xf32>
    %cst_21 = arith.constant 5.000000e-01 : f32
    %36 = vector.broadcast %cst_21 : f32 to vector<8x64xf32>
    %37 = arith.addf %35, %36 : vector<8x64xf32>
    %38 = vector.extract_strided_slice %21 {offsets = [0, 256], sizes = [8, 64], strides = [1, 1]} : vector<8x512xf32> to vector<8x64xf32>
    %39 = math.tanh %38 : vector<8x64xf32>
    %40 = vector.extract_strided_slice %21 {offsets = [0, 384], sizes = [8, 64], strides = [1, 1]} : vector<8x512xf32> to vector<8x64xf32>
    %cst_22 = arith.constant 5.000000e-01 : f32
    %41 = vector.broadcast %cst_22 : f32 to vector<8x64xf32>
    %42 = arith.mulf %41, %40 : vector<8x64xf32>
    %43 = math.tanh %42 : vector<8x64xf32>
    %cst_23 = arith.constant 5.000000e-01 : f32
    %44 = vector.broadcast %cst_23 : f32 to vector<8x64xf32>
    %45 = arith.mulf %44, %43 : vector<8x64xf32>
    %cst_24 = arith.constant 5.000000e-01 : f32
    %46 = vector.broadcast %cst_24 : f32 to vector<8x64xf32>
    %47 = arith.addf %45, %46 : vector<8x64xf32>
    %48 = arith.mulf %37, %6 : vector<8x64xf32>
    %49 = arith.mulf %29, %39 : vector<8x64xf32>
    %50 = arith.addf %48, %49 : vector<8x64xf32>
    %51 = math.tanh %50 : vector<8x64xf32>
    %52 = arith.mulf %47, %51 : vector<8x64xf32>
    %53 = arith.truncf %52 : vector<8x64xf32> to vector<8x64xbf16>
    %cst_25 = arith.constant dense<0.000000e+00> : vector<8x512xf32>
    %54 = tpu.matmul %53, %4, %cst_25 {dimension_numbers = #tpu.dot_dimension_numbers<[1], [0], [0], [1], [0, 0, 1, 1], [], []>} : vector<8x64xbf16>, vector<64x512xbf16>, vector<8x512xf32> -> vector<8x512xf32>
    %55 = arith.addf %18, %54 : vector<8x512xf32>
    %56 = vector.broadcast %2 : vector<1x512xf32> to vector<8x512xf32>
    %57 = arith.addf %55, %56 : vector<8x512xf32>
    %58 = vector.extract_strided_slice %57 {offsets = [0, 0], sizes = [8, 64], strides = [1, 1]} : vector<8x512xf32> to vector<8x64xf32>
    %cst_26 = arith.constant 5.000000e-01 : f32
    %59 = vector.broadcast %cst_26 : f32 to vector<8x64xf32>
    %60 = arith.mulf %59, %58 : vector<8x64xf32>
    %61 = math.tanh %60 : vector<8x64xf32>
    %cst_27 = arith.constant 5.000000e-01 : f32
    %62 = vector.broadcast %cst_27 : f32 to vector<8x64xf32>
    %63 = arith.mulf %62, %61 : vector<8x64xf32>
    %cst_28 = arith.constant 5.000000e-01 : f32
    %64 = vector.broadcast %cst_28 : f32 to vector<8x64xf32>
    %65 = arith.addf %63, %64 : vector<8x64xf32>
    %66 = vector.extract_strided_slice %57 {offsets = [0, 128], sizes = [8, 64], strides = [1, 1]} : vector<8x512xf32> to vector<8x64xf32>
    %cst_29 = arith.constant 5.000000e-01 : f32
    %67 = vector.broadcast %cst_29 : f32 to vector<8x64xf32>
    %68 = arith.mulf %67, %66 : vector<8x64xf32>
    %69 = math.tanh %68 : vector<8x64xf32>
    %cst_30 = arith.constant 5.000000e-01 : f32
    %70 = vector.broadcast %cst_30 : f32 to vector<8x64xf32>
    %71 = arith.mulf %70, %69 : vector<8x64xf32>
    %cst_31 = arith.constant 5.000000e-01 : f32
    %72 = vector.broadcast %cst_31 : f32 to vector<8x64xf32>
    %73 = arith.addf %71, %72 : vector<8x64xf32>
    %74 = vector.extract_strided_slice %57 {offsets = [0, 256], sizes = [8, 64], strides = [1, 1]} : vector<8x512xf32> to vector<8x64xf32>
    %75 = math.tanh %74 : vector<8x64xf32>
    %76 = vector.extract_strided_slice %57 {offsets = [0, 384], sizes = [8, 64], strides = [1, 1]} : vector<8x512xf32> to vector<8x64xf32>
    %cst_32 = arith.constant 5.000000e-01 : f32
    %77 = vector.broadcast %cst_32 : f32 to vector<8x64xf32>
    %78 = arith.mulf %77, %76 : vector<8x64xf32>
    %79 = math.tanh %78 : vector<8x64xf32>
    %cst_33 = arith.constant 5.000000e-01 : f32
    %80 = vector.broadcast %cst_33 : f32 to vector<8x64xf32>
    %81 = arith.mulf %80, %79 : vector<8x64xf32>
    %cst_34 = arith.constant 5.000000e-01 : f32
    %82 = vector.broadcast %cst_34 : f32 to vector<8x64xf32>
    %83 = arith.addf %81, %82 : vector<8x64xf32>
    %84 = arith.mulf %73, %6 : vector<8x64xf32>
    %85 = arith.mulf %65, %75 : vector<8x64xf32>
    %86 = arith.addf %84, %85 : vector<8x64xf32>
    %87 = math.tanh %86 : vector<8x64xf32>
    %88 = arith.mulf %83, %87 : vector<8x64xf32>
    %89 = vector.extract_strided_slice %14 {offsets = [1, 0, 0], sizes = [1, 8, 512], strides = [1, 1, 1]} : vector<8x8x512xf32> to vector<1x8x512xf32>
    %90 = vector.shape_cast %89 : vector<1x8x512xf32> to vector<8x512xf32>
    %91 = arith.truncf %88 : vector<8x64xf32> to vector<8x64xbf16>
    %cst_35 = arith.constant dense<0.000000e+00> : vector<8x512xf32>
    %92 = tpu.matmul %91, %5, %cst_35 {dimension_numbers = #tpu.dot_dimension_numbers<[1], [0], [0], [1], [0, 0, 1, 1], [], []>} : vector<8x64xbf16>, vector<64x512xbf16>, vector<8x512xf32> -> vector<8x512xf32>
    %93 = arith.truncf %52 : vector<8x64xf32> to vector<8x64xbf16>
    %cst_36 = arith.constant dense<0.000000e+00> : vector<8x512xf32>
    %94 = tpu.matmul %93, %3, %cst_36 {dimension_numbers = #tpu.dot_dimension_numbers<[1], [0], [0], [1], [0, 0, 1, 1], [], []>} : vector<8x64xbf16>, vector<64x512xbf16>, vector<8x512xf32> -> vector<8x512xf32>
    %95 = arith.addf %90, %94 : vector<8x512xf32>
    %96 = vector.extract_strided_slice %95 {offsets = [0, 0], sizes = [8, 64], strides = [1, 1]} : vector<8x512xf32> to vector<8x64xf32>
    %cst_37 = arith.constant 5.000000e-01 : f32
    %97 = vector.broadcast %cst_37 : f32 to vector<8x64xf32>
    %98 = arith.mulf %97, %96 : vector<8x64xf32>
    %99 = math.tanh %98 : vector<8x64xf32>
    %cst_38 = arith.constant 5.000000e-01 : f32
    %100 = vector.broadcast %cst_38 : f32 to vector<8x64xf32>
    %101 = arith.mulf %100, %99 : vector<8x64xf32>
    %cst_39 = arith.constant 5.000000e-01 : f32
    %102 = vector.broadcast %cst_39 : f32 to vector<8x64xf32>
    %103 = arith.addf %101, %102 : vector<8x64xf32>
    %104 = vector.extract_strided_slice %95 {offsets = [0, 128], sizes = [8, 64], strides = [1, 1]} : vector<8x512xf32> to vector<8x64xf32>
    %cst_40 = arith.constant 5.000000e-01 : f32
    %105 = vector.broadcast %cst_40 : f32 to vector<8x64xf32>
    %106 = arith.mulf %105, %104 : vector<8x64xf32>
    %107 = math.tanh %106 : vector<8x64xf32>
    %cst_41 = arith.constant 5.000000e-01 : f32
    %108 = vector.broadcast %cst_41 : f32 to vector<8x64xf32>
    %109 = arith.mulf %108, %107 : vector<8x64xf32>
    %cst_42 = arith.constant 5.000000e-01 : f32
    %110 = vector.broadcast %cst_42 : f32 to vector<8x64xf32>
    %111 = arith.addf %109, %110 : vector<8x64xf32>
    %112 = vector.extract_strided_slice %95 {offsets = [0, 256], sizes = [8, 64], strides = [1, 1]} : vector<8x512xf32> to vector<8x64xf32>
    %113 = math.tanh %112 : vector<8x64xf32>
    %114 = vector.extract_strided_slice %95 {offsets = [0, 384], sizes = [8, 64], strides = [1, 1]} : vector<8x512xf32> to vector<8x64xf32>
    %cst_43 = arith.constant 5.000000e-01 : f32
    %115 = vector.broadcast %cst_43 : f32 to vector<8x64xf32>
    %116 = arith.mulf %115, %114 : vector<8x64xf32>
    %117 = math.tanh %116 : vector<8x64xf32>
    %cst_44 = arith.constant 5.000000e-01 : f32
    %118 = vector.broadcast %cst_44 : f32 to vector<8x64xf32>
    %119 = arith.mulf %118, %117 : vector<8x64xf32>
    %cst_45 = arith.constant 5.000000e-01 : f32
    %120 = vector.broadcast %cst_45 : f32 to vector<8x64xf32>
    %121 = arith.addf %119, %120 : vector<8x64xf32>
    %122 = arith.mulf %111, %50 : vector<8x64xf32>
    %123 = arith.mulf %103, %113 : vector<8x64xf32>
    %124 = arith.addf %122, %123 : vector<8x64xf32>
    %125 = math.tanh %124 : vector<8x64xf32>
    %126 = arith.mulf %121, %125 : vector<8x64xf32>
    %127 = arith.truncf %126 : vector<8x64xf32> to vector<8x64xbf16>
    %cst_46 = arith.constant dense<0.000000e+00> : vector<8x512xf32>
    %128 = tpu.matmul %127, %4, %cst_46 {dimension_numbers = #tpu.dot_dimension_numbers<[1], [0], [0], [1], [0, 0, 1, 1], [], []>} : vector<8x64xbf16>, vector<64x512xbf16>, vector<8x512xf32> -> vector<8x512xf32>
    %129 = arith.addf %92, %128 : vector<8x512xf32>
    %130 = vector.broadcast %2 : vector<1x512xf32> to vector<8x512xf32>
    %131 = arith.addf %129, %130 : vector<8x512xf32>
    %132 = vector.extract_strided_slice %131 {offsets = [0, 0], sizes = [8, 64], strides = [1, 1]} : vector<8x512xf32> to vector<8x64xf32>
    %cst_47 = arith.constant 5.000000e-01 : f32
    %133 = vector.broadcast %cst_47 : f32 to vector<8x64xf32>
    %134 = arith.mulf %133, %132 : vector<8x64xf32>
    %135 = math.tanh %134 : vector<8x64xf32>
    %cst_48 = arith.constant 5.000000e-01 : f32
    %136 = vector.broadcast %cst_48 : f32 to vector<8x64xf32>
    %137 = arith.mulf %136, %135 : vector<8x64xf32>
    %cst_49 = arith.constant 5.000000e-01 : f32
    %138 = vector.broadcast %cst_49 : f32 to vector<8x64xf32>
    %139 = arith.addf %137, %138 : vector<8x64xf32>
    %140 = vector.extract_strided_slice %131 {offsets = [0, 128], sizes = [8, 64], strides = [1, 1]} : vector<8x512xf32> to vector<8x64xf32>
    %cst_50 = arith.constant 5.000000e-01 : f32
    %141 = vector.broadcast %cst_50 : f32 to vector<8x64xf32>
    %142 = arith.mulf %141, %140 : vector<8x64xf32>
    %143 = math.tanh %142 : vector<8x64xf32>
    %cst_51 = arith.constant 5.000000e-01 : f32
    %144 = vector.broadcast %cst_51 : f32 to vector<8x64xf32>
    %145 = arith.mulf %144, %143 : vector<8x64xf32>
    %cst_52 = arith.constant 5.000000e-01 : f32
    %146 = vector.broadcast %cst_52 : f32 to vector<8x64xf32>
    %147 = arith.addf %145, %146 : vector<8x64xf32>
    %148 = vector.extract_strided_slice %131 {offsets = [0, 256], sizes = [8, 64], strides = [1, 1]} : vector<8x512xf32> to vector<8x64xf32>
    %149 = math.tanh %148 : vector<8x64xf32>
    %150 = vector.extract_strided_slice %131 {offsets = [0, 384], sizes = [8, 64], strides = [1, 1]} : vector<8x512xf32> to vector<8x64xf32>
    %cst_53 = arith.constant 5.000000e-01 : f32
    %151 = vector.broadcast %cst_53 : f32 to vector<8x64xf32>
    %152 = arith.mulf %151, %150 : vector<8x64xf32>
    %153 = math.tanh %152 : vector<8x64xf32>
    %cst_54 = arith.constant 5.000000e-01 : f32
    %154 = vector.broadcast %cst_54 : f32 to vector<8x64xf32>
    %155 = arith.mulf %154, %153 : vector<8x64xf32>
    %cst_55 = arith.constant 5.000000e-01 : f32
    %156 = vector.broadcast %cst_55 : f32 to vector<8x64xf32>
    %157 = arith.addf %155, %156 : vector<8x64xf32>
    %158 = arith.mulf %147, %86 : vector<8x64xf32>
    %159 = arith.mulf %139, %149 : vector<8x64xf32>
    %160 = arith.addf %158, %159 : vector<8x64xf32>
    %161 = math.tanh %160 : vector<8x64xf32>
    %162 = arith.mulf %157, %161 : vector<8x64xf32>
    %163 = vector.extract_strided_slice %14 {offsets = [2, 0, 0], sizes = [1, 8, 512], strides = [1, 1, 1]} : vector<8x8x512xf32> to vector<1x8x512xf32>
    %164 = vector.shape_cast %163 : vector<1x8x512xf32> to vector<8x512xf32>
    %165 = arith.truncf %162 : vector<8x64xf32> to vector<8x64xbf16>
    %cst_56 = arith.constant dense<0.000000e+00> : vector<8x512xf32>
    %166 = tpu.matmul %165, %5, %cst_56 {dimension_numbers = #tpu.dot_dimension_numbers<[1], [0], [0], [1], [0, 0, 1, 1], [], []>} : vector<8x64xbf16>, vector<64x512xbf16>, vector<8x512xf32> -> vector<8x512xf32>
    %167 = arith.truncf %126 : vector<8x64xf32> to vector<8x64xbf16>
    %cst_57 = arith.constant dense<0.000000e+00> : vector<8x512xf32>
    %168 = tpu.matmul %167, %3, %cst_57 {dimension_numbers = #tpu.dot_dimension_numbers<[1], [0], [0], [1], [0, 0, 1, 1], [], []>} : vector<8x64xbf16>, vector<64x512xbf16>, vector<8x512xf32> -> vector<8x512xf32>
    %169 = arith.addf %164, %168 : vector<8x512xf32>
    %170 = vector.extract_strided_slice %169 {offsets = [0, 0], sizes = [8, 64], strides = [1, 1]} : vector<8x512xf32> to vector<8x64xf32>
    %cst_58 = arith.constant 5.000000e-01 : f32
    %171 = vector.broadcast %cst_58 : f32 to vector<8x64xf32>
    %172 = arith.mulf %171, %170 : vector<8x64xf32>
    %173 = math.tanh %172 : vector<8x64xf32>
    %cst_59 = arith.constant 5.000000e-01 : f32
    %174 = vector.broadcast %cst_59 : f32 to vector<8x64xf32>
    %175 = arith.mulf %174, %173 : vector<8x64xf32>
    %cst_60 = arith.constant 5.000000e-01 : f32
    %176 = vector.broadcast %cst_60 : f32 to vector<8x64xf32>
    %177 = arith.addf %175, %176 : vector<8x64xf32>
    %178 = vector.extract_strided_slice %169 {offsets = [0, 128], sizes = [8, 64], strides = [1, 1]} : vector<8x512xf32> to vector<8x64xf32>
    %cst_61 = arith.constant 5.000000e-01 : f32
    %179 = vector.broadcast %cst_61 : f32 to vector<8x64xf32>
    %180 = arith.mulf %179, %178 : vector<8x64xf32>
    %181 = math.tanh %180 : vector<8x64xf32>
    %cst_62 = arith.constant 5.000000e-01 : f32
    %182 = vector.broadcast %cst_62 : f32 to vector<8x64xf32>
    %183 = arith.mulf %182, %181 : vector<8x64xf32>
    %cst_63 = arith.constant 5.000000e-01 : f32
    %184 = vector.broadcast %cst_63 : f32 to vector<8x64xf32>
    %185 = arith.addf %183, %184 : vector<8x64xf32>
    %186 = vector.extract_strided_slice %169 {offsets = [0, 256], sizes = [8, 64], strides = [1, 1]} : vector<8x512xf32> to vector<8x64xf32>
    %187 = math.tanh %186 : vector<8x64xf32>
    %188 = vector.extract_strided_slice %169 {offsets = [0, 384], sizes = [8, 64], strides = [1, 1]} : vector<8x512xf32> to vector<8x64xf32>
    %cst_64 = arith.constant 5.000000e-01 : f32
    %189 = vector.broadcast %cst_64 : f32 to vector<8x64xf32>
    %190 = arith.mulf %189, %188 : vector<8x64xf32>
    %191 = math.tanh %190 : vector<8x64xf32>
    %cst_65 = arith.constant 5.000000e-01 : f32
    %192 = vector.broadcast %cst_65 : f32 to vector<8x64xf32>
    %193 = arith.mulf %192, %191 : vector<8x64xf32>
    %cst_66 = arith.constant 5.000000e-01 : f32
    %194 = vector.broadcast %cst_66 : f32 to vector<8x64xf32>
    %195 = arith.addf %193, %194 : vector<8x64xf32>
    %196 = arith.mulf %185, %124 : vector<8x64xf32>
    %197 = arith.mulf %177, %187 : vector<8x64xf32>
    %198 = arith.addf %196, %197 : vector<8x64xf32>
    %199 = math.tanh %198 : vector<8x64xf32>
    %200 = arith.mulf %195, %199 : vector<8x64xf32>
    %201 = arith.truncf %200 : vector<8x64xf32> to vector<8x64xbf16>
    %cst_67 = arith.constant dense<0.000000e+00> : vector<8x512xf32>
    %202 = tpu.matmul %201, %4, %cst_67 {dimension_numbers = #tpu.dot_dimension_numbers<[1], [0], [0], [1], [0, 0, 1, 1], [], []>} : vector<8x64xbf16>, vector<64x512xbf16>, vector<8x512xf32> -> vector<8x512xf32>
    %203 = arith.addf %166, %202 : vector<8x512xf32>
    %204 = vector.broadcast %2 : vector<1x512xf32> to vector<8x512xf32>
    %205 = arith.addf %203, %204 : vector<8x512xf32>
    %206 = vector.extract_strided_slice %205 {offsets = [0, 0], sizes = [8, 64], strides = [1, 1]} : vector<8x512xf32> to vector<8x64xf32>
    %cst_68 = arith.constant 5.000000e-01 : f32
    %207 = vector.broadcast %cst_68 : f32 to vector<8x64xf32>
    %208 = arith.mulf %207, %206 : vector<8x64xf32>
    %209 = math.tanh %208 : vector<8x64xf32>
    %cst_69 = arith.constant 5.000000e-01 : f32
    %210 = vector.broadcast %cst_69 : f32 to vector<8x64xf32>
    %211 = arith.mulf %210, %209 : vector<8x64xf32>
    %cst_70 = arith.constant 5.000000e-01 : f32
    %212 = vector.broadcast %cst_70 : f32 to vector<8x64xf32>
    %213 = arith.addf %211, %212 : vector<8x64xf32>
    %214 = vector.extract_strided_slice %205 {offsets = [0, 128], sizes = [8, 64], strides = [1, 1]} : vector<8x512xf32> to vector<8x64xf32>
    %cst_71 = arith.constant 5.000000e-01 : f32
    %215 = vector.broadcast %cst_71 : f32 to vector<8x64xf32>
    %216 = arith.mulf %215, %214 : vector<8x64xf32>
    %217 = math.tanh %216 : vector<8x64xf32>
    %cst_72 = arith.constant 5.000000e-01 : f32
    %218 = vector.broadcast %cst_72 : f32 to vector<8x64xf32>
    %219 = arith.mulf %218, %217 : vector<8x64xf32>
    %cst_73 = arith.constant 5.000000e-01 : f32
    %220 = vector.broadcast %cst_73 : f32 to vector<8x64xf32>
    %221 = arith.addf %219, %220 : vector<8x64xf32>
    %222 = vector.extract_strided_slice %205 {offsets = [0, 256], sizes = [8, 64], strides = [1, 1]} : vector<8x512xf32> to vector<8x64xf32>
    %223 = math.tanh %222 : vector<8x64xf32>
    %224 = vector.extract_strided_slice %205 {offsets = [0, 384], sizes = [8, 64], strides = [1, 1]} : vector<8x512xf32> to vector<8x64xf32>
    %cst_74 = arith.constant 5.000000e-01 : f32
    %225 = vector.broadcast %cst_74 : f32 to vector<8x64xf32>
    %226 = arith.mulf %225, %224 : vector<8x64xf32>
    %227 = math.tanh %226 : vector<8x64xf32>
    %cst_75 = arith.constant 5.000000e-01 : f32
    %228 = vector.broadcast %cst_75 : f32 to vector<8x64xf32>
    %229 = arith.mulf %228, %227 : vector<8x64xf32>
    %cst_76 = arith.constant 5.000000e-01 : f32
    %230 = vector.broadcast %cst_76 : f32 to vector<8x64xf32>
    %231 = arith.addf %229, %230 : vector<8x64xf32>
    %232 = arith.mulf %221, %160 : vector<8x64xf32>
    %233 = arith.mulf %213, %223 : vector<8x64xf32>
    %234 = arith.addf %232, %233 : vector<8x64xf32>
    %235 = math.tanh %234 : vector<8x64xf32>
    %236 = arith.mulf %231, %235 : vector<8x64xf32>
    %237 = vector.extract_strided_slice %14 {offsets = [3, 0, 0], sizes = [1, 8, 512], strides = [1, 1, 1]} : vector<8x8x512xf32> to vector<1x8x512xf32>
    %238 = vector.shape_cast %237 : vector<1x8x512xf32> to vector<8x512xf32>
    %239 = arith.truncf %236 : vector<8x64xf32> to vector<8x64xbf16>
    %cst_77 = arith.constant dense<0.000000e+00> : vector<8x512xf32>
    %240 = tpu.matmul %239, %5, %cst_77 {dimension_numbers = #tpu.dot_dimension_numbers<[1], [0], [0], [1], [0, 0, 1, 1], [], []>} : vector<8x64xbf16>, vector<64x512xbf16>, vector<8x512xf32> -> vector<8x512xf32>
    %241 = arith.truncf %200 : vector<8x64xf32> to vector<8x64xbf16>
    %cst_78 = arith.constant dense<0.000000e+00> : vector<8x512xf32>
    %242 = tpu.matmul %241, %3, %cst_78 {dimension_numbers = #tpu.dot_dimension_numbers<[1], [0], [0], [1], [0, 0, 1, 1], [], []>} : vector<8x64xbf16>, vector<64x512xbf16>, vector<8x512xf32> -> vector<8x512xf32>
    %243 = arith.addf %238, %242 : vector<8x512xf32>
    %244 = vector.extract_strided_slice %243 {offsets = [0, 0], sizes = [8, 64], strides = [1, 1]} : vector<8x512xf32> to vector<8x64xf32>
    %cst_79 = arith.constant 5.000000e-01 : f32
    %245 = vector.broadcast %cst_79 : f32 to vector<8x64xf32>
    %246 = arith.mulf %245, %244 : vector<8x64xf32>
    %247 = math.tanh %246 : vector<8x64xf32>
    %cst_80 = arith.constant 5.000000e-01 : f32
    %248 = vector.broadcast %cst_80 : f32 to vector<8x64xf32>
    %249 = arith.mulf %248, %247 : vector<8x64xf32>
    %cst_81 = arith.constant 5.000000e-01 : f32
    %250 = vector.broadcast %cst_81 : f32 to vector<8x64xf32>
    %251 = arith.addf %249, %250 : vector<8x64xf32>
    %252 = vector.extract_strided_slice %243 {offsets = [0, 128], sizes = [8, 64], strides = [1, 1]} : vector<8x512xf32> to vector<8x64xf32>
    %cst_82 = arith.constant 5.000000e-01 : f32
    %253 = vector.broadcast %cst_82 : f32 to vector<8x64xf32>
    %254 = arith.mulf %253, %252 : vector<8x64xf32>
    %255 = math.tanh %254 : vector<8x64xf32>
    %cst_83 = arith.constant 5.000000e-01 : f32
    %256 = vector.broadcast %cst_83 : f32 to vector<8x64xf32>
    %257 = arith.mulf %256, %255 : vector<8x64xf32>
    %cst_84 = arith.constant 5.000000e-01 : f32
    %258 = vector.broadcast %cst_84 : f32 to vector<8x64xf32>
    %259 = arith.addf %257, %258 : vector<8x64xf32>
    %260 = vector.extract_strided_slice %243 {offsets = [0, 256], sizes = [8, 64], strides = [1, 1]} : vector<8x512xf32> to vector<8x64xf32>
    %261 = math.tanh %260 : vector<8x64xf32>
    %262 = vector.extract_strided_slice %243 {offsets = [0, 384], sizes = [8, 64], strides = [1, 1]} : vector<8x512xf32> to vector<8x64xf32>
    %cst_85 = arith.constant 5.000000e-01 : f32
    %263 = vector.broadcast %cst_85 : f32 to vector<8x64xf32>
    %264 = arith.mulf %263, %262 : vector<8x64xf32>
    %265 = math.tanh %264 : vector<8x64xf32>
    %cst_86 = arith.constant 5.000000e-01 : f32
    %266 = vector.broadcast %cst_86 : f32 to vector<8x64xf32>
    %267 = arith.mulf %266, %265 : vector<8x64xf32>
    %cst_87 = arith.constant 5.000000e-01 : f32
    %268 = vector.broadcast %cst_87 : f32 to vector<8x64xf32>
    %269 = arith.addf %267, %268 : vector<8x64xf32>
    %270 = arith.mulf %259, %198 : vector<8x64xf32>
    %271 = arith.mulf %251, %261 : vector<8x64xf32>
    %272 = arith.addf %270, %271 : vector<8x64xf32>
    %273 = math.tanh %272 : vector<8x64xf32>
    %274 = arith.mulf %269, %273 : vector<8x64xf32>
    %275 = arith.truncf %274 : vector<8x64xf32> to vector<8x64xbf16>
    %cst_88 = arith.constant dense<0.000000e+00> : vector<8x512xf32>
    %276 = tpu.matmul %275, %4, %cst_88 {dimension_numbers = #tpu.dot_dimension_numbers<[1], [0], [0], [1], [0, 0, 1, 1], [], []>} : vector<8x64xbf16>, vector<64x512xbf16>, vector<8x512xf32> -> vector<8x512xf32>
    %277 = arith.addf %240, %276 : vector<8x512xf32>
    %278 = vector.broadcast %2 : vector<1x512xf32> to vector<8x512xf32>
    %279 = arith.addf %277, %278 : vector<8x512xf32>
    %280 = vector.extract_strided_slice %279 {offsets = [0, 0], sizes = [8, 64], strides = [1, 1]} : vector<8x512xf32> to vector<8x64xf32>
    %cst_89 = arith.constant 5.000000e-01 : f32
    %281 = vector.broadcast %cst_89 : f32 to vector<8x64xf32>
    %282 = arith.mulf %281, %280 : vector<8x64xf32>
    %283 = math.tanh %282 : vector<8x64xf32>
    %cst_90 = arith.constant 5.000000e-01 : f32
    %284 = vector.broadcast %cst_90 : f32 to vector<8x64xf32>
    %285 = arith.mulf %284, %283 : vector<8x64xf32>
    %cst_91 = arith.constant 5.000000e-01 : f32
    %286 = vector.broadcast %cst_91 : f32 to vector<8x64xf32>
    %287 = arith.addf %285, %286 : vector<8x64xf32>
    %288 = vector.extract_strided_slice %279 {offsets = [0, 128], sizes = [8, 64], strides = [1, 1]} : vector<8x512xf32> to vector<8x64xf32>
    %cst_92 = arith.constant 5.000000e-01 : f32
    %289 = vector.broadcast %cst_92 : f32 to vector<8x64xf32>
    %290 = arith.mulf %289, %288 : vector<8x64xf32>
    %291 = math.tanh %290 : vector<8x64xf32>
    %cst_93 = arith.constant 5.000000e-01 : f32
    %292 = vector.broadcast %cst_93 : f32 to vector<8x64xf32>
    %293 = arith.mulf %292, %291 : vector<8x64xf32>
    %cst_94 = arith.constant 5.000000e-01 : f32
    %294 = vector.broadcast %cst_94 : f32 to vector<8x64xf32>
    %295 = arith.addf %293, %294 : vector<8x64xf32>
    %296 = vector.extract_strided_slice %279 {offsets = [0, 256], sizes = [8, 64], strides = [1, 1]} : vector<8x512xf32> to vector<8x64xf32>
    %297 = math.tanh %296 : vector<8x64xf32>
    %298 = vector.extract_strided_slice %279 {offsets = [0, 384], sizes = [8, 64], strides = [1, 1]} : vector<8x512xf32> to vector<8x64xf32>
    %cst_95 = arith.constant 5.000000e-01 : f32
    %299 = vector.broadcast %cst_95 : f32 to vector<8x64xf32>
    %300 = arith.mulf %299, %298 : vector<8x64xf32>
    %301 = math.tanh %300 : vector<8x64xf32>
    %cst_96 = arith.constant 5.000000e-01 : f32
    %302 = vector.broadcast %cst_96 : f32 to vector<8x64xf32>
    %303 = arith.mulf %302, %301 : vector<8x64xf32>
    %cst_97 = arith.constant 5.000000e-01 : f32
    %304 = vector.broadcast %cst_97 : f32 to vector<8x64xf32>
    %305 = arith.addf %303, %304 : vector<8x64xf32>
    %306 = arith.mulf %295, %234 : vector<8x64xf32>
    %307 = arith.mulf %287, %297 : vector<8x64xf32>
    %308 = arith.addf %306, %307 : vector<8x64xf32>
    %309 = math.tanh %308 : vector<8x64xf32>
    %310 = arith.mulf %305, %309 : vector<8x64xf32>
    %311 = vector.extract_strided_slice %14 {offsets = [4, 0, 0], sizes = [1, 8, 512], strides = [1, 1, 1]} : vector<8x8x512xf32> to vector<1x8x512xf32>
    %312 = vector.shape_cast %311 : vector<1x8x512xf32> to vector<8x512xf32>
    %313 = arith.truncf %310 : vector<8x64xf32> to vector<8x64xbf16>
    %cst_98 = arith.constant dense<0.000000e+00> : vector<8x512xf32>
    %314 = tpu.matmul %313, %5, %cst_98 {dimension_numbers = #tpu.dot_dimension_numbers<[1], [0], [0], [1], [0, 0, 1, 1], [], []>} : vector<8x64xbf16>, vector<64x512xbf16>, vector<8x512xf32> -> vector<8x512xf32>
    %315 = arith.truncf %274 : vector<8x64xf32> to vector<8x64xbf16>
    %cst_99 = arith.constant dense<0.000000e+00> : vector<8x512xf32>
    %316 = tpu.matmul %315, %3, %cst_99 {dimension_numbers = #tpu.dot_dimension_numbers<[1], [0], [0], [1], [0, 0, 1, 1], [], []>} : vector<8x64xbf16>, vector<64x512xbf16>, vector<8x512xf32> -> vector<8x512xf32>
    %317 = arith.addf %312, %316 : vector<8x512xf32>
    %318 = vector.extract_strided_slice %317 {offsets = [0, 0], sizes = [8, 64], strides = [1, 1]} : vector<8x512xf32> to vector<8x64xf32>
    %cst_100 = arith.constant 5.000000e-01 : f32
    %319 = vector.broadcast %cst_100 : f32 to vector<8x64xf32>
    %320 = arith.mulf %319, %318 : vector<8x64xf32>
    %321 = math.tanh %320 : vector<8x64xf32>
    %cst_101 = arith.constant 5.000000e-01 : f32
    %322 = vector.broadcast %cst_101 : f32 to vector<8x64xf32>
    %323 = arith.mulf %322, %321 : vector<8x64xf32>
    %cst_102 = arith.constant 5.000000e-01 : f32
    %324 = vector.broadcast %cst_102 : f32 to vector<8x64xf32>
    %325 = arith.addf %323, %324 : vector<8x64xf32>
    %326 = vector.extract_strided_slice %317 {offsets = [0, 128], sizes = [8, 64], strides = [1, 1]} : vector<8x512xf32> to vector<8x64xf32>
    %cst_103 = arith.constant 5.000000e-01 : f32
    %327 = vector.broadcast %cst_103 : f32 to vector<8x64xf32>
    %328 = arith.mulf %327, %326 : vector<8x64xf32>
    %329 = math.tanh %328 : vector<8x64xf32>
    %cst_104 = arith.constant 5.000000e-01 : f32
    %330 = vector.broadcast %cst_104 : f32 to vector<8x64xf32>
    %331 = arith.mulf %330, %329 : vector<8x64xf32>
    %cst_105 = arith.constant 5.000000e-01 : f32
    %332 = vector.broadcast %cst_105 : f32 to vector<8x64xf32>
    %333 = arith.addf %331, %332 : vector<8x64xf32>
    %334 = vector.extract_strided_slice %317 {offsets = [0, 256], sizes = [8, 64], strides = [1, 1]} : vector<8x512xf32> to vector<8x64xf32>
    %335 = math.tanh %334 : vector<8x64xf32>
    %336 = vector.extract_strided_slice %317 {offsets = [0, 384], sizes = [8, 64], strides = [1, 1]} : vector<8x512xf32> to vector<8x64xf32>
    %cst_106 = arith.constant 5.000000e-01 : f32
    %337 = vector.broadcast %cst_106 : f32 to vector<8x64xf32>
    %338 = arith.mulf %337, %336 : vector<8x64xf32>
    %339 = math.tanh %338 : vector<8x64xf32>
    %cst_107 = arith.constant 5.000000e-01 : f32
    %340 = vector.broadcast %cst_107 : f32 to vector<8x64xf32>
    %341 = arith.mulf %340, %339 : vector<8x64xf32>
    %cst_108 = arith.constant 5.000000e-01 : f32
    %342 = vector.broadcast %cst_108 : f32 to vector<8x64xf32>
    %343 = arith.addf %341, %342 : vector<8x64xf32>
    %344 = arith.mulf %333, %272 : vector<8x64xf32>
    %345 = arith.mulf %325, %335 : vector<8x64xf32>
    %346 = arith.addf %344, %345 : vector<8x64xf32>
    %347 = math.tanh %346 : vector<8x64xf32>
    %348 = arith.mulf %343, %347 : vector<8x64xf32>
    %349 = arith.truncf %348 : vector<8x64xf32> to vector<8x64xbf16>
    %cst_109 = arith.constant dense<0.000000e+00> : vector<8x512xf32>
    %350 = tpu.matmul %349, %4, %cst_109 {dimension_numbers = #tpu.dot_dimension_numbers<[1], [0], [0], [1], [0, 0, 1, 1], [], []>} : vector<8x64xbf16>, vector<64x512xbf16>, vector<8x512xf32> -> vector<8x512xf32>
    %351 = arith.addf %314, %350 : vector<8x512xf32>
    %352 = vector.broadcast %2 : vector<1x512xf32> to vector<8x512xf32>
    %353 = arith.addf %351, %352 : vector<8x512xf32>
    %354 = vector.extract_strided_slice %353 {offsets = [0, 0], sizes = [8, 64], strides = [1, 1]} : vector<8x512xf32> to vector<8x64xf32>
    %cst_110 = arith.constant 5.000000e-01 : f32
    %355 = vector.broadcast %cst_110 : f32 to vector<8x64xf32>
    %356 = arith.mulf %355, %354 : vector<8x64xf32>
    %357 = math.tanh %356 : vector<8x64xf32>
    %cst_111 = arith.constant 5.000000e-01 : f32
    %358 = vector.broadcast %cst_111 : f32 to vector<8x64xf32>
    %359 = arith.mulf %358, %357 : vector<8x64xf32>
    %cst_112 = arith.constant 5.000000e-01 : f32
    %360 = vector.broadcast %cst_112 : f32 to vector<8x64xf32>
    %361 = arith.addf %359, %360 : vector<8x64xf32>
    %362 = vector.extract_strided_slice %353 {offsets = [0, 128], sizes = [8, 64], strides = [1, 1]} : vector<8x512xf32> to vector<8x64xf32>
    %cst_113 = arith.constant 5.000000e-01 : f32
    %363 = vector.broadcast %cst_113 : f32 to vector<8x64xf32>
    %364 = arith.mulf %363, %362 : vector<8x64xf32>
    %365 = math.tanh %364 : vector<8x64xf32>
    %cst_114 = arith.constant 5.000000e-01 : f32
    %366 = vector.broadcast %cst_114 : f32 to vector<8x64xf32>
    %367 = arith.mulf %366, %365 : vector<8x64xf32>
    %cst_115 = arith.constant 5.000000e-01 : f32
    %368 = vector.broadcast %cst_115 : f32 to vector<8x64xf32>
    %369 = arith.addf %367, %368 : vector<8x64xf32>
    %370 = vector.extract_strided_slice %353 {offsets = [0, 256], sizes = [8, 64], strides = [1, 1]} : vector<8x512xf32> to vector<8x64xf32>
    %371 = math.tanh %370 : vector<8x64xf32>
    %372 = vector.extract_strided_slice %353 {offsets = [0, 384], sizes = [8, 64], strides = [1, 1]} : vector<8x512xf32> to vector<8x64xf32>
    %cst_116 = arith.constant 5.000000e-01 : f32
    %373 = vector.broadcast %cst_116 : f32 to vector<8x64xf32>
    %374 = arith.mulf %373, %372 : vector<8x64xf32>
    %375 = math.tanh %374 : vector<8x64xf32>
    %cst_117 = arith.constant 5.000000e-01 : f32
    %376 = vector.broadcast %cst_117 : f32 to vector<8x64xf32>
    %377 = arith.mulf %376, %375 : vector<8x64xf32>
    %cst_118 = arith.constant 5.000000e-01 : f32
    %378 = vector.broadcast %cst_118 : f32 to vector<8x64xf32>
    %379 = arith.addf %377, %378 : vector<8x64xf32>
    %380 = arith.mulf %369, %308 : vector<8x64xf32>
    %381 = arith.mulf %361, %371 : vector<8x64xf32>
    %382 = arith.addf %380, %381 : vector<8x64xf32>
    %383 = math.tanh %382 : vector<8x64xf32>
    %384 = arith.mulf %379, %383 : vector<8x64xf32>
    %385 = vector.extract_strided_slice %14 {offsets = [5, 0, 0], sizes = [1, 8, 512], strides = [1, 1, 1]} : vector<8x8x512xf32> to vector<1x8x512xf32>
    %386 = vector.shape_cast %385 : vector<1x8x512xf32> to vector<8x512xf32>
    %387 = arith.truncf %384 : vector<8x64xf32> to vector<8x64xbf16>
    %cst_119 = arith.constant dense<0.000000e+00> : vector<8x512xf32>
    %388 = tpu.matmul %387, %5, %cst_119 {dimension_numbers = #tpu.dot_dimension_numbers<[1], [0], [0], [1], [0, 0, 1, 1], [], []>} : vector<8x64xbf16>, vector<64x512xbf16>, vector<8x512xf32> -> vector<8x512xf32>
    %389 = arith.truncf %348 : vector<8x64xf32> to vector<8x64xbf16>
    %cst_120 = arith.constant dense<0.000000e+00> : vector<8x512xf32>
    %390 = tpu.matmul %389, %3, %cst_120 {dimension_numbers = #tpu.dot_dimension_numbers<[1], [0], [0], [1], [0, 0, 1, 1], [], []>} : vector<8x64xbf16>, vector<64x512xbf16>, vector<8x512xf32> -> vector<8x512xf32>
    %391 = arith.addf %386, %390 : vector<8x512xf32>
    %392 = vector.extract_strided_slice %391 {offsets = [0, 0], sizes = [8, 64], strides = [1, 1]} : vector<8x512xf32> to vector<8x64xf32>
    %cst_121 = arith.constant 5.000000e-01 : f32
    %393 = vector.broadcast %cst_121 : f32 to vector<8x64xf32>
    %394 = arith.mulf %393, %392 : vector<8x64xf32>
    %395 = math.tanh %394 : vector<8x64xf32>
    %cst_122 = arith.constant 5.000000e-01 : f32
    %396 = vector.broadcast %cst_122 : f32 to vector<8x64xf32>
    %397 = arith.mulf %396, %395 : vector<8x64xf32>
    %cst_123 = arith.constant 5.000000e-01 : f32
    %398 = vector.broadcast %cst_123 : f32 to vector<8x64xf32>
    %399 = arith.addf %397, %398 : vector<8x64xf32>
    %400 = vector.extract_strided_slice %391 {offsets = [0, 128], sizes = [8, 64], strides = [1, 1]} : vector<8x512xf32> to vector<8x64xf32>
    %cst_124 = arith.constant 5.000000e-01 : f32
    %401 = vector.broadcast %cst_124 : f32 to vector<8x64xf32>
    %402 = arith.mulf %401, %400 : vector<8x64xf32>
    %403 = math.tanh %402 : vector<8x64xf32>
    %cst_125 = arith.constant 5.000000e-01 : f32
    %404 = vector.broadcast %cst_125 : f32 to vector<8x64xf32>
    %405 = arith.mulf %404, %403 : vector<8x64xf32>
    %cst_126 = arith.constant 5.000000e-01 : f32
    %406 = vector.broadcast %cst_126 : f32 to vector<8x64xf32>
    %407 = arith.addf %405, %406 : vector<8x64xf32>
    %408 = vector.extract_strided_slice %391 {offsets = [0, 256], sizes = [8, 64], strides = [1, 1]} : vector<8x512xf32> to vector<8x64xf32>
    %409 = math.tanh %408 : vector<8x64xf32>
    %410 = vector.extract_strided_slice %391 {offsets = [0, 384], sizes = [8, 64], strides = [1, 1]} : vector<8x512xf32> to vector<8x64xf32>
    %cst_127 = arith.constant 5.000000e-01 : f32
    %411 = vector.broadcast %cst_127 : f32 to vector<8x64xf32>
    %412 = arith.mulf %411, %410 : vector<8x64xf32>
    %413 = math.tanh %412 : vector<8x64xf32>
    %cst_128 = arith.constant 5.000000e-01 : f32
    %414 = vector.broadcast %cst_128 : f32 to vector<8x64xf32>
    %415 = arith.mulf %414, %413 : vector<8x64xf32>
    %cst_129 = arith.constant 5.000000e-01 : f32
    %416 = vector.broadcast %cst_129 : f32 to vector<8x64xf32>
    %417 = arith.addf %415, %416 : vector<8x64xf32>
    %418 = arith.mulf %407, %346 : vector<8x64xf32>
    %419 = arith.mulf %399, %409 : vector<8x64xf32>
    %420 = arith.addf %418, %419 : vector<8x64xf32>
    %421 = math.tanh %420 : vector<8x64xf32>
    %422 = arith.mulf %417, %421 : vector<8x64xf32>
    %423 = arith.truncf %422 : vector<8x64xf32> to vector<8x64xbf16>
    %cst_130 = arith.constant dense<0.000000e+00> : vector<8x512xf32>
    %424 = tpu.matmul %423, %4, %cst_130 {dimension_numbers = #tpu.dot_dimension_numbers<[1], [0], [0], [1], [0, 0, 1, 1], [], []>} : vector<8x64xbf16>, vector<64x512xbf16>, vector<8x512xf32> -> vector<8x512xf32>
    %425 = arith.addf %388, %424 : vector<8x512xf32>
    %426 = vector.broadcast %2 : vector<1x512xf32> to vector<8x512xf32>
    %427 = arith.addf %425, %426 : vector<8x512xf32>
    %428 = vector.extract_strided_slice %427 {offsets = [0, 0], sizes = [8, 64], strides = [1, 1]} : vector<8x512xf32> to vector<8x64xf32>
    %cst_131 = arith.constant 5.000000e-01 : f32
    %429 = vector.broadcast %cst_131 : f32 to vector<8x64xf32>
    %430 = arith.mulf %429, %428 : vector<8x64xf32>
    %431 = math.tanh %430 : vector<8x64xf32>
    %cst_132 = arith.constant 5.000000e-01 : f32
    %432 = vector.broadcast %cst_132 : f32 to vector<8x64xf32>
    %433 = arith.mulf %432, %431 : vector<8x64xf32>
    %cst_133 = arith.constant 5.000000e-01 : f32
    %434 = vector.broadcast %cst_133 : f32 to vector<8x64xf32>
    %435 = arith.addf %433, %434 : vector<8x64xf32>
    %436 = vector.extract_strided_slice %427 {offsets = [0, 128], sizes = [8, 64], strides = [1, 1]} : vector<8x512xf32> to vector<8x64xf32>
    %cst_134 = arith.constant 5.000000e-01 : f32
    %437 = vector.broadcast %cst_134 : f32 to vector<8x64xf32>
    %438 = arith.mulf %437, %436 : vector<8x64xf32>
    %439 = math.tanh %438 : vector<8x64xf32>
    %cst_135 = arith.constant 5.000000e-01 : f32
    %440 = vector.broadcast %cst_135 : f32 to vector<8x64xf32>
    %441 = arith.mulf %440, %439 : vector<8x64xf32>
    %cst_136 = arith.constant 5.000000e-01 : f32
    %442 = vector.broadcast %cst_136 : f32 to vector<8x64xf32>
    %443 = arith.addf %441, %442 : vector<8x64xf32>
    %444 = vector.extract_strided_slice %427 {offsets = [0, 256], sizes = [8, 64], strides = [1, 1]} : vector<8x512xf32> to vector<8x64xf32>
    %445 = math.tanh %444 : vector<8x64xf32>
    %446 = vector.extract_strided_slice %427 {offsets = [0, 384], sizes = [8, 64], strides = [1, 1]} : vector<8x512xf32> to vector<8x64xf32>
    %cst_137 = arith.constant 5.000000e-01 : f32
    %447 = vector.broadcast %cst_137 : f32 to vector<8x64xf32>
    %448 = arith.mulf %447, %446 : vector<8x64xf32>
    %449 = math.tanh %448 : vector<8x64xf32>
    %cst_138 = arith.constant 5.000000e-01 : f32
    %450 = vector.broadcast %cst_138 : f32 to vector<8x64xf32>
    %451 = arith.mulf %450, %449 : vector<8x64xf32>
    %cst_139 = arith.constant 5.000000e-01 : f32
    %452 = vector.broadcast %cst_139 : f32 to vector<8x64xf32>
    %453 = arith.addf %451, %452 : vector<8x64xf32>
    %454 = arith.mulf %443, %382 : vector<8x64xf32>
    %455 = arith.mulf %435, %445 : vector<8x64xf32>
    %456 = arith.addf %454, %455 : vector<8x64xf32>
    %457 = math.tanh %456 : vector<8x64xf32>
    %458 = arith.mulf %453, %457 : vector<8x64xf32>
    %459 = vector.extract_strided_slice %14 {offsets = [6, 0, 0], sizes = [1, 8, 512], strides = [1, 1, 1]} : vector<8x8x512xf32> to vector<1x8x512xf32>
    %460 = vector.shape_cast %459 : vector<1x8x512xf32> to vector<8x512xf32>
    %461 = arith.truncf %458 : vector<8x64xf32> to vector<8x64xbf16>
    %cst_140 = arith.constant dense<0.000000e+00> : vector<8x512xf32>
    %462 = tpu.matmul %461, %5, %cst_140 {dimension_numbers = #tpu.dot_dimension_numbers<[1], [0], [0], [1], [0, 0, 1, 1], [], []>} : vector<8x64xbf16>, vector<64x512xbf16>, vector<8x512xf32> -> vector<8x512xf32>
    %463 = arith.truncf %422 : vector<8x64xf32> to vector<8x64xbf16>
    %cst_141 = arith.constant dense<0.000000e+00> : vector<8x512xf32>
    %464 = tpu.matmul %463, %3, %cst_141 {dimension_numbers = #tpu.dot_dimension_numbers<[1], [0], [0], [1], [0, 0, 1, 1], [], []>} : vector<8x64xbf16>, vector<64x512xbf16>, vector<8x512xf32> -> vector<8x512xf32>
    %465 = arith.addf %460, %464 : vector<8x512xf32>
    %466 = vector.extract_strided_slice %465 {offsets = [0, 0], sizes = [8, 64], strides = [1, 1]} : vector<8x512xf32> to vector<8x64xf32>
    %cst_142 = arith.constant 5.000000e-01 : f32
    %467 = vector.broadcast %cst_142 : f32 to vector<8x64xf32>
    %468 = arith.mulf %467, %466 : vector<8x64xf32>
    %469 = math.tanh %468 : vector<8x64xf32>
    %cst_143 = arith.constant 5.000000e-01 : f32
    %470 = vector.broadcast %cst_143 : f32 to vector<8x64xf32>
    %471 = arith.mulf %470, %469 : vector<8x64xf32>
    %cst_144 = arith.constant 5.000000e-01 : f32
    %472 = vector.broadcast %cst_144 : f32 to vector<8x64xf32>
    %473 = arith.addf %471, %472 : vector<8x64xf32>
    %474 = vector.extract_strided_slice %465 {offsets = [0, 128], sizes = [8, 64], strides = [1, 1]} : vector<8x512xf32> to vector<8x64xf32>
    %cst_145 = arith.constant 5.000000e-01 : f32
    %475 = vector.broadcast %cst_145 : f32 to vector<8x64xf32>
    %476 = arith.mulf %475, %474 : vector<8x64xf32>
    %477 = math.tanh %476 : vector<8x64xf32>
    %cst_146 = arith.constant 5.000000e-01 : f32
    %478 = vector.broadcast %cst_146 : f32 to vector<8x64xf32>
    %479 = arith.mulf %478, %477 : vector<8x64xf32>
    %cst_147 = arith.constant 5.000000e-01 : f32
    %480 = vector.broadcast %cst_147 : f32 to vector<8x64xf32>
    %481 = arith.addf %479, %480 : vector<8x64xf32>
    %482 = vector.extract_strided_slice %465 {offsets = [0, 256], sizes = [8, 64], strides = [1, 1]} : vector<8x512xf32> to vector<8x64xf32>
    %483 = math.tanh %482 : vector<8x64xf32>
    %484 = vector.extract_strided_slice %465 {offsets = [0, 384], sizes = [8, 64], strides = [1, 1]} : vector<8x512xf32> to vector<8x64xf32>
    %cst_148 = arith.constant 5.000000e-01 : f32
    %485 = vector.broadcast %cst_148 : f32 to vector<8x64xf32>
    %486 = arith.mulf %485, %484 : vector<8x64xf32>
    %487 = math.tanh %486 : vector<8x64xf32>
    %cst_149 = arith.constant 5.000000e-01 : f32
    %488 = vector.broadcast %cst_149 : f32 to vector<8x64xf32>
    %489 = arith.mulf %488, %487 : vector<8x64xf32>
    %cst_150 = arith.constant 5.000000e-01 : f32
    %490 = vector.broadcast %cst_150 : f32 to vector<8x64xf32>
    %491 = arith.addf %489, %490 : vector<8x64xf32>
    %492 = arith.mulf %481, %420 : vector<8x64xf32>
    %493 = arith.mulf %473, %483 : vector<8x64xf32>
    %494 = arith.addf %492, %493 : vector<8x64xf32>
    %495 = math.tanh %494 : vector<8x64xf32>
    %496 = arith.mulf %491, %495 : vector<8x64xf32>
    %497 = arith.truncf %496 : vector<8x64xf32> to vector<8x64xbf16>
    %cst_151 = arith.constant dense<0.000000e+00> : vector<8x512xf32>
    %498 = tpu.matmul %497, %4, %cst_151 {dimension_numbers = #tpu.dot_dimension_numbers<[1], [0], [0], [1], [0, 0, 1, 1], [], []>} : vector<8x64xbf16>, vector<64x512xbf16>, vector<8x512xf32> -> vector<8x512xf32>
    %499 = arith.addf %462, %498 : vector<8x512xf32>
    %500 = vector.broadcast %2 : vector<1x512xf32> to vector<8x512xf32>
    %501 = arith.addf %499, %500 : vector<8x512xf32>
    %502 = vector.extract_strided_slice %501 {offsets = [0, 0], sizes = [8, 64], strides = [1, 1]} : vector<8x512xf32> to vector<8x64xf32>
    %cst_152 = arith.constant 5.000000e-01 : f32
    %503 = vector.broadcast %cst_152 : f32 to vector<8x64xf32>
    %504 = arith.mulf %503, %502 : vector<8x64xf32>
    %505 = math.tanh %504 : vector<8x64xf32>
    %cst_153 = arith.constant 5.000000e-01 : f32
    %506 = vector.broadcast %cst_153 : f32 to vector<8x64xf32>
    %507 = arith.mulf %506, %505 : vector<8x64xf32>
    %cst_154 = arith.constant 5.000000e-01 : f32
    %508 = vector.broadcast %cst_154 : f32 to vector<8x64xf32>
    %509 = arith.addf %507, %508 : vector<8x64xf32>
    %510 = vector.extract_strided_slice %501 {offsets = [0, 128], sizes = [8, 64], strides = [1, 1]} : vector<8x512xf32> to vector<8x64xf32>
    %cst_155 = arith.constant 5.000000e-01 : f32
    %511 = vector.broadcast %cst_155 : f32 to vector<8x64xf32>
    %512 = arith.mulf %511, %510 : vector<8x64xf32>
    %513 = math.tanh %512 : vector<8x64xf32>
    %cst_156 = arith.constant 5.000000e-01 : f32
    %514 = vector.broadcast %cst_156 : f32 to vector<8x64xf32>
    %515 = arith.mulf %514, %513 : vector<8x64xf32>
    %cst_157 = arith.constant 5.000000e-01 : f32
    %516 = vector.broadcast %cst_157 : f32 to vector<8x64xf32>
    %517 = arith.addf %515, %516 : vector<8x64xf32>
    %518 = vector.extract_strided_slice %501 {offsets = [0, 256], sizes = [8, 64], strides = [1, 1]} : vector<8x512xf32> to vector<8x64xf32>
    %519 = math.tanh %518 : vector<8x64xf32>
    %520 = vector.extract_strided_slice %501 {offsets = [0, 384], sizes = [8, 64], strides = [1, 1]} : vector<8x512xf32> to vector<8x64xf32>
    %cst_158 = arith.constant 5.000000e-01 : f32
    %521 = vector.broadcast %cst_158 : f32 to vector<8x64xf32>
    %522 = arith.mulf %521, %520 : vector<8x64xf32>
    %523 = math.tanh %522 : vector<8x64xf32>
    %cst_159 = arith.constant 5.000000e-01 : f32
    %524 = vector.broadcast %cst_159 : f32 to vector<8x64xf32>
    %525 = arith.mulf %524, %523 : vector<8x64xf32>
    %cst_160 = arith.constant 5.000000e-01 : f32
    %526 = vector.broadcast %cst_160 : f32 to vector<8x64xf32>
    %527 = arith.addf %525, %526 : vector<8x64xf32>
    %528 = arith.mulf %517, %456 : vector<8x64xf32>
    %529 = arith.mulf %509, %519 : vector<8x64xf32>
    %530 = arith.addf %528, %529 : vector<8x64xf32>
    %531 = math.tanh %530 : vector<8x64xf32>
    %532 = arith.mulf %527, %531 : vector<8x64xf32>
    %533 = vector.extract_strided_slice %14 {offsets = [7, 0, 0], sizes = [1, 8, 512], strides = [1, 1, 1]} : vector<8x8x512xf32> to vector<1x8x512xf32>
    %534 = vector.shape_cast %533 : vector<1x8x512xf32> to vector<8x512xf32>
    %535 = arith.truncf %532 : vector<8x64xf32> to vector<8x64xbf16>
    %cst_161 = arith.constant dense<0.000000e+00> : vector<8x512xf32>
    %536 = tpu.matmul %535, %5, %cst_161 {dimension_numbers = #tpu.dot_dimension_numbers<[1], [0], [0], [1], [0, 0, 1, 1], [], []>} : vector<8x64xbf16>, vector<64x512xbf16>, vector<8x512xf32> -> vector<8x512xf32>
    %537 = arith.truncf %496 : vector<8x64xf32> to vector<8x64xbf16>
    %cst_162 = arith.constant dense<0.000000e+00> : vector<8x512xf32>
    %538 = tpu.matmul %537, %3, %cst_162 {dimension_numbers = #tpu.dot_dimension_numbers<[1], [0], [0], [1], [0, 0, 1, 1], [], []>} : vector<8x64xbf16>, vector<64x512xbf16>, vector<8x512xf32> -> vector<8x512xf32>
    %539 = arith.addf %534, %538 : vector<8x512xf32>
    %540 = vector.extract_strided_slice %539 {offsets = [0, 0], sizes = [8, 64], strides = [1, 1]} : vector<8x512xf32> to vector<8x64xf32>
    %cst_163 = arith.constant 5.000000e-01 : f32
    %541 = vector.broadcast %cst_163 : f32 to vector<8x64xf32>
    %542 = arith.mulf %541, %540 : vector<8x64xf32>
    %543 = math.tanh %542 : vector<8x64xf32>
    %cst_164 = arith.constant 5.000000e-01 : f32
    %544 = vector.broadcast %cst_164 : f32 to vector<8x64xf32>
    %545 = arith.mulf %544, %543 : vector<8x64xf32>
    %cst_165 = arith.constant 5.000000e-01 : f32
    %546 = vector.broadcast %cst_165 : f32 to vector<8x64xf32>
    %547 = arith.addf %545, %546 : vector<8x64xf32>
    %548 = vector.extract_strided_slice %539 {offsets = [0, 128], sizes = [8, 64], strides = [1, 1]} : vector<8x512xf32> to vector<8x64xf32>
    %cst_166 = arith.constant 5.000000e-01 : f32
    %549 = vector.broadcast %cst_166 : f32 to vector<8x64xf32>
    %550 = arith.mulf %549, %548 : vector<8x64xf32>
    %551 = math.tanh %550 : vector<8x64xf32>
    %cst_167 = arith.constant 5.000000e-01 : f32
    %552 = vector.broadcast %cst_167 : f32 to vector<8x64xf32>
    %553 = arith.mulf %552, %551 : vector<8x64xf32>
    %cst_168 = arith.constant 5.000000e-01 : f32
    %554 = vector.broadcast %cst_168 : f32 to vector<8x64xf32>
    %555 = arith.addf %553, %554 : vector<8x64xf32>
    %556 = vector.extract_strided_slice %539 {offsets = [0, 256], sizes = [8, 64], strides = [1, 1]} : vector<8x512xf32> to vector<8x64xf32>
    %557 = math.tanh %556 : vector<8x64xf32>
    %558 = vector.extract_strided_slice %539 {offsets = [0, 384], sizes = [8, 64], strides = [1, 1]} : vector<8x512xf32> to vector<8x64xf32>
    %cst_169 = arith.constant 5.000000e-01 : f32
    %559 = vector.broadcast %cst_169 : f32 to vector<8x64xf32>
    %560 = arith.mulf %559, %558 : vector<8x64xf32>
    %561 = math.tanh %560 : vector<8x64xf32>
    %cst_170 = arith.constant 5.000000e-01 : f32
    %562 = vector.broadcast %cst_170 : f32 to vector<8x64xf32>
    %563 = arith.mulf %562, %561 : vector<8x64xf32>
    %cst_171 = arith.constant 5.000000e-01 : f32
    %564 = vector.broadcast %cst_171 : f32 to vector<8x64xf32>
    %565 = arith.addf %563, %564 : vector<8x64xf32>
    %566 = arith.mulf %555, %494 : vector<8x64xf32>
    %567 = arith.mulf %547, %557 : vector<8x64xf32>
    %568 = arith.addf %566, %567 : vector<8x64xf32>
    %569 = math.tanh %568 : vector<8x64xf32>
    %570 = arith.mulf %565, %569 : vector<8x64xf32>
    %571 = arith.truncf %570 : vector<8x64xf32> to vector<8x64xbf16>
    %cst_172 = arith.constant dense<0.000000e+00> : vector<8x512xf32>
    %572 = tpu.matmul %571, %4, %cst_172 {dimension_numbers = #tpu.dot_dimension_numbers<[1], [0], [0], [1], [0, 0, 1, 1], [], []>} : vector<8x64xbf16>, vector<64x512xbf16>, vector<8x512xf32> -> vector<8x512xf32>
    %573 = arith.addf %536, %572 : vector<8x512xf32>
    %574 = vector.broadcast %2 : vector<1x512xf32> to vector<8x512xf32>
    %575 = arith.addf %573, %574 : vector<8x512xf32>
    %576 = vector.extract_strided_slice %575 {offsets = [0, 0], sizes = [8, 64], strides = [1, 1]} : vector<8x512xf32> to vector<8x64xf32>
    %cst_173 = arith.constant 5.000000e-01 : f32
    %577 = vector.broadcast %cst_173 : f32 to vector<8x64xf32>
    %578 = arith.mulf %577, %576 : vector<8x64xf32>
    %579 = math.tanh %578 : vector<8x64xf32>
    %cst_174 = arith.constant 5.000000e-01 : f32
    %580 = vector.broadcast %cst_174 : f32 to vector<8x64xf32>
    %581 = arith.mulf %580, %579 : vector<8x64xf32>
    %cst_175 = arith.constant 5.000000e-01 : f32
    %582 = vector.broadcast %cst_175 : f32 to vector<8x64xf32>
    %583 = arith.addf %581, %582 : vector<8x64xf32>
    %584 = vector.extract_strided_slice %575 {offsets = [0, 128], sizes = [8, 64], strides = [1, 1]} : vector<8x512xf32> to vector<8x64xf32>
    %cst_176 = arith.constant 5.000000e-01 : f32
    %585 = vector.broadcast %cst_176 : f32 to vector<8x64xf32>
    %586 = arith.mulf %585, %584 : vector<8x64xf32>
    %587 = math.tanh %586 : vector<8x64xf32>
    %cst_177 = arith.constant 5.000000e-01 : f32
    %588 = vector.broadcast %cst_177 : f32 to vector<8x64xf32>
    %589 = arith.mulf %588, %587 : vector<8x64xf32>
    %cst_178 = arith.constant 5.000000e-01 : f32
    %590 = vector.broadcast %cst_178 : f32 to vector<8x64xf32>
    %591 = arith.addf %589, %590 : vector<8x64xf32>
    %592 = vector.extract_strided_slice %575 {offsets = [0, 256], sizes = [8, 64], strides = [1, 1]} : vector<8x512xf32> to vector<8x64xf32>
    %593 = math.tanh %592 : vector<8x64xf32>
    %594 = vector.extract_strided_slice %575 {offsets = [0, 384], sizes = [8, 64], strides = [1, 1]} : vector<8x512xf32> to vector<8x64xf32>
    %cst_179 = arith.constant 5.000000e-01 : f32
    %595 = vector.broadcast %cst_179 : f32 to vector<8x64xf32>
    %596 = arith.mulf %595, %594 : vector<8x64xf32>
    %597 = math.tanh %596 : vector<8x64xf32>
    %cst_180 = arith.constant 5.000000e-01 : f32
    %598 = vector.broadcast %cst_180 : f32 to vector<8x64xf32>
    %599 = arith.mulf %598, %597 : vector<8x64xf32>
    %cst_181 = arith.constant 5.000000e-01 : f32
    %600 = vector.broadcast %cst_181 : f32 to vector<8x64xf32>
    %601 = arith.addf %599, %600 : vector<8x64xf32>
    %602 = arith.mulf %591, %530 : vector<8x64xf32>
    %603 = arith.mulf %583, %593 : vector<8x64xf32>
    %604 = arith.addf %602, %603 : vector<8x64xf32>
    %605 = math.tanh %604 : vector<8x64xf32>
    %606 = arith.mulf %601, %605 : vector<8x64xf32>
    %c0_182 = arith.constant 0 : index
    %c0_183 = arith.constant 0 : index
    %607 = vector.load %arg7[%c0_182, %c0_183] : memref<64x1xf32, #tpu.memory_space<vmem>>, vector<64x1xf32>
    %cst_184 = arith.constant dense<0.000000e+00> : vector<8x1xf32>
    %608 = tpu.matmul %606, %607, %cst_184 {dimension_numbers = #tpu.dot_dimension_numbers<[1], [0], [0], [1], [0, 0, 1, 1], [], []>} : vector<8x64xf32>, vector<64x1xf32>, vector<8x1xf32> -> vector<8x1xf32>
    %c0_185 = arith.constant 0 : index
    %c0_186 = arith.constant 0 : index
    %609 = vector.load %arg8[%c0_185, %c0_186] : memref<1x1xf32, #tpu.memory_space<vmem>>, vector<1x1xf32>
    %610 = vector.broadcast %609 : vector<1x1xf32> to vector<8x1xf32>
    %611 = arith.addf %608, %610 : vector<8x1xf32>
    %c0_187 = arith.constant 0 : index
    %c0_188 = arith.constant 0 : index
    %612 = vector.load %arg9[%c0_187, %c0_188] : memref<8x1xf32, #tpu.memory_space<vmem>>, vector<8x1xf32>
    tpu.vector_store %arg9[%c0_187, %c0_188], %611 {strides = array<i32>} : memref<8x1xf32, #tpu.memory_space<vmem>>, vector<8x1xf32>,
    return
  }
}

</mosaic_0001>

<bundles_post_ra>
// kernel: tpu_custom_call.1
= control target key start
LH: loop header
LB: loop body
LE: loop exit
PB: predicated region body
PF: predicated region fallthrough
CT: control target
= control target key end

     0   :  { %s4659_s0 = inlined_call_operand.vmem [shape: f32[8,8,1], index: 0, kind: input, shape index: {}]   ;;  %s4660_s1 = inlined_call_operand.vmem [shape: f32[1,512], index: 1, kind: input, shape index: {}]   ;;  %s4661_s2 = inlined_call_operand.vmem [shape: f32[1,512], index: 2, kind: input, shape index: {}]   ;;  %s4662_s3 = inlined_call_operand.vmem [shape: bf16[64,512], index: 3, kind: input, shape index: {}]   ;;  %s4663_s4 = inlined_call_operand.hbm [shape: bf16[64,512], index: 4, kind: input, shape index: {}]   ;;  %s4664_s5 = inlined_call_operand.hbm [shape: bf16[64,512], index: 5, kind: input, shape index: {}]   ;;  %s4665_s6 = inlined_call_operand.vmem [shape: f32[1,512], index: 6, kind: input, shape index: {}]   ;;  %s4666_s7 = inlined_call_operand.vmem [shape: f32[64,1], index: 7, kind: input, shape index: {}]   ;;  %s4667_s8 = inlined_call_operand.<no memory space> [shape: f32[1,1], index: 8, kind: input, shape index: {}]   ;;  %s4668_s9 = inlined_call_operand.vmem [shape: f32[8,1], index: 9, kind: output, shape index: {}]  }
   0x1   :  { %v14_v0 = vstv %s4667_s8 }
   0x2   :  { %15 = vst [vmem:[#allocation2] sm:$0x1] %v14_v0 }
   0x3   :  { %16 = vsyncpa [#allocation4], 0 }
   0x4   :  { %17 = vsyncpa [#allocation6], 0  ;;  %s3497_s11 = smov [#allocation3]   ;;  %s3449_s15 = scalar_lea.hbm %s4663_s4, 2048 }
   0x5   :  { %s31_s12 = sshll.u32 %s3497_s11, 4  ;;  %p3450_p0 = scmp.ne.s32.totalorder %s4663_s4, %s3449_s15  ;;  %s32_s12 = int_to_ptr.vmem [resolvable:$true] %s31_s12 }
   0x6   :  { %p3453_p1 = scmp.lt.u32.totalorder %s3449_s15, %s4663_s4 }
   0x8   :  { %p3455_p2 = pnand %p3453_p1, %p3450_p0 }
   0xa   :  { %3458 = shalt.err (!%p3455_p2)
}
   0xb   :  { %s3459_s8 = scalar_lea.vmem %s32_s12, 2048  ;;  %p3464_p4 = scmp.lt.s32.totalorder %s32_s12, %s32_s12 }
   0xc   :  { %p3460_p3 = scmp.ne.s32.totalorder %s32_s12, %s3459_s8  ;;  %p3465_p5 = scmp.lt.s32.totalorder %s3459_s8, %s3459_s8 }
   0xe   :  { %p3466_p6 = por %p3465_p5, %p3464_p4 }
  0x10   :  { %p3467_p7 = pnand %p3466_p6, %p3460_p3 }
  0x12   :  { %3470 = shalt.err (!%p3467_p7)
}
  0x13   :  { %s3498_s20 = smov 256   ;;  %s3499_s21 = smov 16  }
  0x14   :  { %37 = dma.hbm_to_vmem [thread:$0]  %s4663_s4, 2048, %s32_s12, [#allocation4], %s3498_s20, %s3498_s20, %s3499_s21  }
  0x15   :  { %s3500_s24 = smov [#allocation5]   ;;  %s3471_s28 = scalar_lea.hbm %s4664_s5, 2048 }
  0x16   :  { %s43_s25 = sshll.u32 %s3500_s24, 4  ;;  %p3472_p8 = scmp.ne.s32.totalorder %s4664_s5, %s3471_s28  ;;  %s44_s25 = int_to_ptr.vmem [resolvable:$true] %s43_s25 }
  0x17   :  { %p3475_p9 = scmp.lt.u32.totalorder %s3471_s28, %s4664_s5 }
  0x19   :  { %p3477_p10 = pnand %p3475_p9, %p3472_p8 }
  0x1b   :  { %3480 = shalt.err (!%p3477_p10)
}
  0x1c   :  { %s3481_s13 = scalar_lea.vmem %s44_s25, 2048  ;;  %p3486_p12 = scmp.lt.s32.totalorder %s44_s25, %s44_s25 }
  0x1d   :  { %p3482_p11 = scmp.ne.s32.totalorder %s44_s25, %s3481_s13  ;;  %p3487_p13 = scmp.lt.s32.totalorder %s3481_s13, %s3481_s13 }
  0x1f   :  { %p3488_p0 = por %p3487_p13, %p3486_p12 }
  0x21   :  { %p3489_p1 = pnand %p3488_p0, %p3482_p11 }
  0x23   :  { %3492 = shalt.err (!%p3489_p1)
}
  0x24   :  { %49 = dma.hbm_to_vmem [thread:$0]  %s4664_s5, 2048, %s44_s25, [#allocation6], %s3498_s20, %s3498_s20, %s3499_s21  }
  0x25   :  { %3493 = dma.done.wait [#allocation4], 2048  }
  0x26   :  { %3494 = vsyncadd [#allocation4], 4294965248 }
  0x27   :  { %3495 = dma.done.wait [#allocation6], 2048  }
  0x28   :  { %3496 = vsyncadd [#allocation6], 4294965248  ;;  %v4669_v1 = vmov 0   ;;  %v3589_v2 = vld [vmem:[%s4662_s3 + $0x4] ss:$16 sps:$4 sm:$0xff]   ;;  %v115_v19 = vld [vmem:[%s4659_s0 + $0x8] sm:$0xff]  ;;  %v163_v40 = vlaneseq }
  0x29   :  { %384 = vmatprep.mubr.bf16.mxu0 %v4669_v1  ;;  %425 = vmatprep.mubr.bf16.mxu1 %v4669_v1  ;;  %v3594_v3 = vld [vmem:[%s4662_s3 + $0xc] ss:$16 sps:$4 sm:$0xff]   ;;  %v3600_v4 = vld [vmem:[%s4662_s3] ss:$16 sps:$4 sm:$0xff]   ;;  %v3605_v5 = vld [vmem:[%s4662_s3 + $0x8] ss:$16 sps:$4 sm:$0xff]  }
  0x2a   :  { %3151 = vset.pattern.permute.xlu0 %v4669_v1  ;;  %3152 = vset.pattern.permute.xlu1 %v4669_v1  ;;  %v3611_v6 = vld [vmem:[%s4662_s3 + $0x24] ss:$16 sps:$4 sm:$0xff]   ;;  %v3618_v7 = vld [vmem:[%s4662_s3 + $0x2c] ss:$16 sps:$4 sm:$0xff]   ;;  %v3623_v8 = vld [vmem:[%s4662_s3 + $0x20] ss:$16 sps:$4 sm:$0xff]  }
  0x2b   :  { %352 = vmatprep.subr.bf16.mxu0 %v3589_v2  ;;  %393 = vmatprep.subr.bf16.mxu1 %v3594_v3  ;;  %v3629_v9 = vld [vmem:[%s4662_s3 + $0x28] ss:$16 sps:$4 sm:$0xff]   ;;  %v3635_v10 = vld [vmem:[%s4662_s3 + $0x44] ss:$16 sps:$4 sm:$0xff]   ;;  %v3640_v11 = vld [vmem:[%s4662_s3 + $0x4c] ss:$16 sps:$4 sm:$0xff]  }
  0x2c   :  { %353 = vmatpush1.bf16.msra.mxu0 %v3600_v4  ;;  %394 = vmatpush1.bf16.msra.mxu1 %v3605_v5  ;;  %v3645_v12 = vld [vmem:[%s4662_s3 + $0x40] ss:$16 sps:$4 sm:$0xff]   ;;  %v3650_v13 = vld [vmem:[%s4662_s3 + $0x48] ss:$16 sps:$4 sm:$0xff]   ;;  %v3657_v14 = vld [vmem:[%s4662_s3 + $0x64] ss:$16 sps:$4 sm:$0xff]  }
  0x2d   :  { %354 = vmatprep.subr.bf16.mxu0 %v3611_v6  ;;  %395 = vmatprep.subr.bf16.mxu1 %v3618_v7  ;;  %v3664_v15 = vld [vmem:[%s4662_s3 + $0x6c] ss:$16 sps:$4 sm:$0xff]   ;;  %v114_v16 = vld [vmem:[%s4659_s0] sm:$0xff]  ;;  %v3677_v18 = vld [vmem:[%s4662_s3 + $0x68] ss:$16 sps:$4 sm:$0xff]   ;;  %v164_v41 = vshrl.u32 %v163_v40, 7 }
  0x2e   :  { %v3672_v17 = vld [vmem:[%s4662_s3 + $0x60] ss:$16 sps:$4 sm:$0xff]   ;;  %124 = vperm.xlu0 %3151, %v114_v16   ;;  %v3698_v22 = vld [vmem:[#allocation3 + $0x4] ss:$16 sps:$4 sm:$0xff]   ;;  %v3704_v25 = vld [vmem:[#allocation3 + $0x8] ss:$16 sps:$4 sm:$0xff]  }
  0x2f   :  { %v118_v20 = vld [vmem:[%s4659_s0 + $0x20] sm:$0xff]  ;;  %v120_v21 = vld [vmem:[%s4659_s0 + $0x30] sm:$0xff]  ;;  %4758 = vst [vmem:[#allocation10_spill] sm:$0xff] %v3704_v25  ;;  %v3716_v29 = vld [vmem:[#allocation3 + $0x28] ss:$16 sps:$4 sm:$0xff]   ;;  %v3752_v42 = vsub.s32 0, %v164_v41 }
  0x30   :  { %355 = vmatpush1.bf16.msra.mxu0 %v3623_v8  ;;  %396 = vmatpush1.bf16.msra.mxu1 %v3629_v9  ;;  %v3700_v23 = vld [vmem:[#allocation3 + $0xc] ss:$16 sps:$4 sm:$0xff]   ;;  %v3702_v24 = vld [vmem:[#allocation3] ss:$16 sps:$4 sm:$0xff]   ;;  %v3710_v26 = vld [vmem:[#allocation3 + $0x24] ss:$16 sps:$4 sm:$0xff]  }
  0x31   :  { %356 = vmatprep.subr.bf16.mxu0 %v3635_v10  ;;  %397 = vmatprep.subr.bf16.mxu1 %v3640_v11  ;;  %4757 = vst [vmem:[#allocation9_spill] sm:$0xff] %v3702_v24  ;;  %4759 = vst [vmem:[#allocation11_spill] sm:$0xff] %v3710_v26  ;;  %v3712_v27 = vld [vmem:[#allocation3 + $0x2c] ss:$16 sps:$4 sm:$0xff]   ;;  %v3714_v28 = vld [vmem:[#allocation3 + $0x20] ss:$16 sps:$4 sm:$0xff]  }
  0x32   :  { %129 = vperm.xlu0 %3151, %v115_v19   ;;  %4760 = vst [vmem:[#allocation12_spill] sm:$0xff] %v3712_v27  ;;  %4761 = vst [vmem:[#allocation13_spill] sm:$0xff] %v3714_v28  ;;  %v3722_v30 = vld [vmem:[#allocation3 + $0x44] ss:$16 sps:$4 sm:$0xff]   ;;  %v3724_v31 = vld [vmem:[#allocation3 + $0x4c] ss:$16 sps:$4 sm:$0xff]  }
  0x33   :  { %4762 = vst [vmem:[#allocation14_spill] sm:$0xff] %v3716_v29  ;;  %4763 = vst [vmem:[#allocation15_spill] sm:$0xff] %v3722_v30  ;;  %v3726_v32 = vld [vmem:[#allocation3 + $0x40] ss:$16 sps:$4 sm:$0xff]   ;;  %v3728_v33 = vld [vmem:[#allocation3 + $0x48] ss:$16 sps:$4 sm:$0xff]  }
  0x34   :  { %357 = vmatpush1.bf16.msra.mxu0 %v3645_v12  ;;  %398 = vmatpush1.bf16.msra.mxu1 %v3650_v13  ;;  %4764 = vst [vmem:[#allocation16_spill] sm:$0xff] %v3724_v31  ;;  %4765 = vst [vmem:[#allocation17_spill] sm:$0xff] %v3726_v32  ;;  %v3734_v34 = vld [vmem:[#allocation3 + $0x64] ss:$16 sps:$4 sm:$0xff]   ;;  %v3736_v35 = vld [vmem:[#allocation3 + $0x6c] ss:$16 sps:$4 sm:$0xff]  }
  0x35   :  { %358 = vmatprep.subr.bf16.mxu0 %v3657_v14  ;;  %399 = vmatprep.subr.bf16.mxu1 %v3664_v15  ;;  %4766 = vst [vmem:[#allocation18_spill] sm:$0xff] %v3728_v33  ;;  %4767 = vst [vmem:[#allocation19_spill] sm:$0xff] %v3734_v34  ;;  %v3738_v36 = vld [vmem:[#allocation3 + $0x60] ss:$16 sps:$4 sm:$0xff]   ;;  %v3740_v37 = vld [vmem:[#allocation3 + $0x68] ss:$16 sps:$4 sm:$0xff]  }
  0x36   :  { %144 = vperm.xlu0 %3151, %v118_v20   ;;  %4768 = vst [vmem:[#allocation20_spill] sm:$0xff] %v3736_v35  ;;  %4769 = vst [vmem:[#allocation21_spill] sm:$0xff] %v3738_v36  ;;  %v3746_v38 = vld [vmem:[#allocation5 + $0x4] ss:$16 sps:$4 sm:$0xff]   ;;  %v3748_v39 = vld [vmem:[#allocation5 + $0xc] ss:$16 sps:$4 sm:$0xff]  }
  0x37   :  { %4770 = vst [vmem:[#allocation22_spill] sm:$0xff] %v3740_v37  ;;  %4771 = vst [vmem:[#allocation23_spill] sm:$0xff] %v3746_v38  ;;  %v3754_v43 = vsub.s32 1, %v164_v41  ;;  %v63_v44 = vld [vmem:[%s4660_s1] sm:$0xf]  ;;  %v3759_v45 = vsub.s32 2, %v164_v41 }
  0x38   :  { %359 = vmatpush1.bf16.msra.mxu0 %v3672_v17  ;;  %400 = vmatpush1.bf16.msra.mxu1 %v3677_v18  ;;  %4772 = vst [vmem:[#allocation24_spill] sm:$0xff] %v3748_v39  ;;  %v3762_v46 = vrot.slane %v63_v44, %v3752_v42  ;;  %v64_v48 = vld [vmem:[%s4661_s2] sm:$0xf]  ;;  %v3770_v50 = vsub.s32 3, %v164_v41  ;;  %vm348_vm0 = vcmask 523264   ;;  %vm3503_vm1 = vmmov 0  }
  0x39   :  { %540 = vmatprep.subr.bf16.mxu0 %v3698_v22  ;;  %581 = vmatprep.subr.bf16.mxu1 %v3700_v23  ;;  %v3765_v47 = vrot.slane %v63_v44, %v3754_v43  ;;  %v3773_v51 = vrot.slane %v63_v44, %v3759_v45  ;;  %v3777_v53 = vrot.slane %v64_v48, %v3752_v42  ;;  %vm3001_vm2 = vcmask 7168  }
  0x3a   :  { %154 = vperm.xlu0 %3151, %v120_v21   ;;  %4773 = vst [vmem:[#allocation25_spill] sm:$0xff] %v3762_v46  ;;  %4775 = vst [vmem:[#allocation27_spill] sm:$0xff] %v3770_v50  ;;  %v3781_v55 = vrot.slane %v64_v48, %v3754_v43  ;;  %v3784_v56 = vrot.slane %v63_v44, %v3770_v50  ;;  %v3789_v59 = vrot.slane %v64_v48, %v3759_v45 }
  0x3b   :  { %385 = vmatmul.mubr.bf16.vlgmr.msra.gmra.mrb[0].mxu0 %v4669_v1  ;;  %426 = vmatmul.mubr.bf16.vlgmr.msra.gmra.mrb[0].mxu1 %v4669_v1  ;;  %4774 = vst [vmem:[#allocation26_spill] sm:$0xff] %v3765_v47  ;;  %4776 = vst [vmem:[#allocation28_spill] sm:$0xff] %v3773_v51  ;;  %v3795_v20 = vrot.slane %v64_v48, %v3770_v50 }
  0x3c   :  { %572 = vmatprep.mubr.bf16.mxu0 %v4669_v1  ;;  %613 = vmatprep.mubr.bf16.mxu1 %v4669_v1  ;;  %4777 = vst [vmem:[#allocation29_spill] sm:$0xff] %v3777_v53  ;;  %4778 = vst [vmem:[#allocation30_spill] sm:$0xff] %v3781_v55 }
  0x3d   :  { %541 = vmatpush1.bf16.msra.mxu0 %v3702_v24  ;;  %582 = vmatpush1.bf16.msra.mxu1 %v3704_v25  ;;  %4779 = vst [vmem:[#allocation31_spill] sm:$0xff] %v3784_v56 }
  0x3e   :  { %542 = vmatprep.subr.bf16.mxu0 %v3710_v26  ;;  %583 = vmatprep.subr.bf16.mxu1 %v3712_v27 }
  0x41   :  { %543 = vmatpush1.bf16.msra.mxu0 %v3714_v28  ;;  %584 = vmatpush1.bf16.msra.mxu1 %v3716_v29 }
  0x42   :  { %544 = vmatprep.subr.bf16.mxu0 %v3722_v30  ;;  %585 = vmatprep.subr.bf16.mxu1 %v3724_v31 }
  0x45   :  { %545 = vmatpush1.bf16.msra.mxu0 %v3726_v32  ;;  %586 = vmatpush1.bf16.msra.mxu1 %v3728_v33 }
  0x46   :  { %546 = vmatprep.subr.bf16.mxu0 %v3734_v34  ;;  %587 = vmatprep.subr.bf16.mxu1 %v3736_v35 }
  0x49   :  { %547 = vmatpush1.bf16.msra.mxu0 %v3738_v36  ;;  %588 = vmatpush1.bf16.msra.mxu1 %v3740_v37 }
  0x4a   :  { %702 = vmatprep.subr.bf16.mxu0 %v3746_v38  ;;  %743 = vmatprep.subr.bf16.mxu1 %v3748_v39 }
  0xad   :  { %v125_v49 = vpop.permute.xlu0 %124 }
  0xae   :  { %v183_v52 = vmul.f32 %v3762_v46, %v125_v49  ;;  %v184_v54 = vmul.f32 %v3765_v47, %v125_v49  ;;  %v185_v58 = vmul.f32 %v3773_v51, %v125_v49  ;;  %v186_v19 = vmul.f32 %v3784_v56, %v125_v49 }
  0xb0   :  { %v236_v57 = vadd.f32 %v3777_v53, %v183_v52  ;;  %v237_v60 = vadd.f32 %v3781_v55, %v184_v54  ;;  %v238_v0 = vadd.f32 %v3789_v59, %v185_v58 }
 0x10e   :  { %v386_v61 = vpop.f32.mrb[0].mxu0  ;;  %v427_v62 = vpop.f32.mrb[0].mxu1 }
 0x10f   :  { %v434_v63 = vadd.f32 %v386_v61, %v236_v57  ;;  %v388_v16 = vpop.f32.mrb[1].mxu0  ;;  %v429_v21 = vpop.f32.mrb[1].mxu1  ;;  %v436_v54 = vadd.f32 %v427_v62, %v238_v0  ;;  %v239_v57 = vadd.f32 %v3795_v20, %v186_v19 }
 0x110   :  { %v435_v40 = vadd.f32 %v388_v16, %v237_v60  ;;  %v390_v41 = vpop.f32.mrb[2].mxu0  ;;  %v431_v44 = vpop.f32.mrb[2].mxu1 }
 0x111   :  { %v438_v52 = vmul.f32 0.5, %v434_v63  ;;  %v391_v1 = vpop.f32.mrb[3].mxu0  ;;  %v432_v51 = vpop.f32.mrb[3].mxu1  ;;  %v437_v58 = vadd.f32 %v429_v21, %v239_v57  ;;  %v3803_v44 = vld [vmem:[#allocation5 + $0x8] ss:$16 sps:$4 sm:$0xff]  }
 0x112   :  { %v442_v53 = vmul.f32 0.5, %v435_v40  ;;  %v3801_v40 = vld [vmem:[#allocation5] ss:$16 sps:$4 sm:$0xff]   ;;  %v3815_v57 = vld [vmem:[#allocation5 + $0x28] ss:$16 sps:$4 sm:$0xff]  }
 0x113   :  { %3225 = vtanh.f32 %v438_v52  ;;  %v447_v61 = vmul.f32 0.5, %v437_v58  ;;  %v3805_v52 = vld [vmem:[#allocation5 + $0x24] ss:$16 sps:$4 sm:$0xff]  }
 0x114   :  { %3227 = vtanh.f32 %v442_v53  ;;  %v3819_v58 = vld [vmem:[#allocation5 + $0x44] ss:$16 sps:$4 sm:$0xff]  }
 0x115   :  { %3229 = vtanh.f32 %v436_v54  ;;  %v3813_v54 = vld [vmem:[#allocation5 + $0x20] ss:$16 sps:$4 sm:$0xff]  }
 0x116   :  { %3231 = vtanh.f32 %v447_v61  ;;  %v3821_v61 = vld [vmem:[#allocation5 + $0x4c] ss:$16 sps:$4 sm:$0xff]  }
 0x11d   :  { %v3226_v49 = vpop.eup %3225 }
 0x11e   :  { %v3228_v56 = vpop.eup %3227  ;;  %v440_v48 = vmul.f32 0.5, %v3226_v49  ;;  %v4780_v49 = vmov 0  }
 0x11f   :  { %v444_v50 = vmul.f32 0.5, %v3228_v56  ;;  %v3230_v16 = vpop.eup %3229 }
 0x120   :  { %v441_v60 = vadd.f32 0.5, %v440_v48  ;;  %v3232_v62 = vpop.eup %3231  ;;  %v3827_v48 = vld [vmem:[#allocation5 + $0x40] ss:$16 sps:$4 sm:$0xff]  }
 0x121   :  { %v445_v41 = vadd.f32 0.5, %v444_v50  ;;  %v449_v0 = vmul.f32 0.5, %v3232_v62  ;;  %v3807_v50 = vld [vmem:[#allocation5 + $0x2c] ss:$16 sps:$4 sm:$0xff]  }
 0x122   :  { %v452_v63 = vmul.f32 %v3230_v16, %v441_v60  ;;  %v3829_v60 = vld [vmem:[#allocation5 + $0x48] ss:$16 sps:$4 sm:$0xff]   ;;  %v3833_v16 = vld [vmem:[#allocation5 + $0x64] ss:$16 sps:$4 sm:$0xff]  }
 0x123   :  { %v451_v1 = vmul.f32 0.0, %v445_v41  ;;  %v450_v53 = vadd.f32 0.5, %v449_v0  ;;  %v3835_v41 = vld [vmem:[#allocation5 + $0x6c] ss:$16 sps:$4 sm:$0xff]  }
 0x124   :  { %v116_v62 = vld [vmem:[%s4659_s0 + $0x10] sm:$0xff]  ;;  %v117_v0 = vld [vmem:[%s4659_s0 + $0x18] sm:$0xff] }
 0x125   :  { %v3798_v51 = vadd.f32 %v452_v63, %v451_v1  ;;  %v3839_v63 = vld [vmem:[#allocation5 + $0x60] ss:$16 sps:$4 sm:$0xff]   ;;  %v3841_v1 = vld [vmem:[#allocation5 + $0x68] ss:$16 sps:$4 sm:$0xff]   ;;  %134 = vperm.xlu1 %3152, %v116_v62  }
 0x127   :  { %3233 = vtanh.f32 %v3798_v51 }
 0x129   :  { %139 = vperm.xlu1 %3152, %v117_v0   ;;  %v3904_v0 = vld [vmem:[%s4665_s6] sm:$0xf] }
 0x131   :  { %v3234_v19 = vpop.eup %3233 }
 0x132   :  { %v455_v21 = vmul.f32 %v3234_v19, %v450_v53  ;;  %v119_v53 = vld [vmem:[%s4659_s0 + $0x28] sm:$0xff]  ;;  %v121_v19 = vld [vmem:[%s4659_s0 + $0x38] sm:$0xff] }
 0x133   :  { %149 = vperm.xlu1 %3152, %v119_v53   ;;  %v3908_v53 = vrot.slane %v3904_v0, %v3752_v42  ;;  %v3917_v42 = vrot.slane %v3904_v0, %v3759_v45 }
 0x134   :  { %v456_v56 = vpack.c.bf16 %v455_v21, %v455_v21 }
 0x135   :  { %4781 = vst [vmem:[#allocation32_spill] sm:$0xff] %v3908_v53  ;;  %4783 = vst [vmem:[#allocation34_spill] sm:$0xff] %v3917_v42 }
 0x136   :  { %3041 = vmatmul.mubr.msk.bf16.vlgmr.msra.gmra.mrb[4].mxu0 %vm348_vm0, %v456_v56  ;;  %3042 = vmatmul.mubr.msk.bf16.vlgmr.msra.gmra.mrb[4].mxu1 %vm348_vm0, %v456_v56 }
 0x137   :  { %703 = vmatpush1.bf16.msra.mxu0 %v3801_v40  ;;  %744 = vmatpush1.bf16.msra.mxu1 %v3803_v44 }
 0x138   :  { %704 = vmatprep.subr.bf16.mxu0 %v3805_v52  ;;  %745 = vmatprep.subr.bf16.mxu1 %v3807_v50 }
 0x139   :  { %734 = vmatprep.mubr.bf16.mxu0 %v4780_v49  ;;  %775 = vmatprep.mubr.bf16.mxu1 %v4780_v49 }
 0x13a   :  { %159 = vperm.xlu1 %3152, %v121_v19   ;;  %v3912_v19 = vrot.slane %v3904_v0, %v3754_v43 }
 0x13b   :  { %705 = vmatpush1.bf16.msra.mxu0 %v3813_v54  ;;  %746 = vmatpush1.bf16.msra.mxu1 %v3815_v57 }
 0x13c   :  { %706 = vmatprep.subr.bf16.mxu0 %v3819_v58  ;;  %747 = vmatprep.subr.bf16.mxu1 %v3821_v61  ;;  %4782 = vst [vmem:[#allocation33_spill] sm:$0xff] %v3912_v19 }
 0x13f   :  { %707 = vmatpush1.bf16.msra.mxu0 %v3827_v48  ;;  %748 = vmatpush1.bf16.msra.mxu1 %v3829_v60 }
 0x140   :  { %708 = vmatprep.subr.bf16.mxu0 %v3833_v16  ;;  %749 = vmatprep.subr.bf16.mxu1 %v3835_v41 }
 0x143   :  { %709 = vmatpush1.bf16.msra.mxu0 %v3839_v63  ;;  %750 = vmatpush1.bf16.msra.mxu1 %v3841_v1 }
 0x144   :  { %828 = vmatprep.subr.bf16.mxu0 %v3589_v2  ;;  %869 = vmatprep.subr.bf16.mxu1 %v3594_v3 }
 0x146   :  { %735 = vmatmul.mubr.bf16.vlgmr.msra.gmra.mrb[8].mxu0 %v4780_v49  ;;  %776 = vmatmul.mubr.bf16.vlgmr.msra.gmra.mrb[8].mxu1 %v4780_v49 }
 0x147   :  { %829 = vmatpush1.bf16.msra.mxu0 %v3600_v4  ;;  %870 = vmatpush1.bf16.msra.mxu1 %v3605_v5 }
 0x148   :  { %830 = vmatprep.subr.bf16.mxu0 %v3611_v6  ;;  %871 = vmatprep.subr.bf16.mxu1 %v3618_v7 }
 0x149   :  { %860 = vmatprep.mubr.bf16.mxu0 %v4780_v49  ;;  %901 = vmatprep.mubr.bf16.mxu1 %v4780_v49 }
 0x14b   :  { %831 = vmatpush1.bf16.msra.mxu0 %v3623_v8  ;;  %872 = vmatpush1.bf16.msra.mxu1 %v3629_v9 }
 0x14c   :  { %832 = vmatprep.subr.bf16.mxu0 %v3635_v10  ;;  %873 = vmatprep.subr.bf16.mxu1 %v3640_v11 }
 0x14f   :  { %833 = vmatpush1.bf16.msra.mxu0 %v3645_v12  ;;  %874 = vmatpush1.bf16.msra.mxu1 %v3650_v13 }
 0x150   :  { %834 = vmatprep.subr.bf16.mxu0 %v3657_v14  ;;  %875 = vmatprep.subr.bf16.mxu1 %v3664_v15 }
 0x153   :  { %835 = vmatpush1.bf16.msra.mxu0 %v3672_v17  ;;  %876 = vmatpush1.bf16.msra.mxu1 %v3677_v18 }
 0x154   :  { %936 = vmatprep.subr.bf16.mxu0 %v3698_v22  ;;  %977 = vmatprep.subr.bf16.mxu1 %v3700_v23 }
 0x156   :  { %3059 = vmatmul.mubr.msk.bf16.vlgmr.msra.gmra.mrb[12].mxu0 %vm348_vm0, %v456_v56  ;;  %3060 = vmatmul.mubr.msk.bf16.vlgmr.msra.gmra.mrb[12].mxu1 %vm348_vm0, %v456_v56 }
 0x157   :  { %937 = vmatpush1.bf16.msra.mxu0 %v3702_v24  ;;  %978 = vmatpush1.bf16.msra.mxu1 %v3704_v25 }
 0x158   :  { %938 = vmatprep.subr.bf16.mxu0 %v3710_v26  ;;  %979 = vmatprep.subr.bf16.mxu1 %v3712_v27 }
 0x159   :  { %968 = vmatprep.mubr.bf16.mxu0 %v4780_v49  ;;  %1009 = vmatprep.mubr.bf16.mxu1 %v4780_v49 }
 0x15b   :  { %939 = vmatpush1.bf16.msra.mxu0 %v3714_v28  ;;  %980 = vmatpush1.bf16.msra.mxu1 %v3716_v29 }
 0x15c   :  { %940 = vmatprep.subr.bf16.mxu0 %v3722_v30  ;;  %981 = vmatprep.subr.bf16.mxu1 %v3724_v31 }
 0x15f   :  { %941 = vmatpush1.bf16.msra.mxu0 %v3726_v32  ;;  %982 = vmatpush1.bf16.msra.mxu1 %v3728_v33 }
 0x160   :  { %942 = vmatprep.subr.bf16.mxu0 %v3734_v34  ;;  %983 = vmatprep.subr.bf16.mxu1 %v3736_v35 }
 0x163   :  { %943 = vmatpush1.bf16.msra.mxu0 %v3738_v36  ;;  %984 = vmatpush1.bf16.msra.mxu1 %v3740_v37 }
 0x164   :  { %1021 = vmatprep.subr.bf16.mxu0 %v3746_v38  ;;  %1062 = vmatprep.subr.bf16.mxu1 %v3748_v39 }
 0x209   :  { %v574_v21 = vpop.f32.mrb[4].mxu0  ;;  %v615_v56 = vpop.f32.mrb[4].mxu1 }
 0x20a   :  { %v576_v39 = vpop.f32.mrb[5].mxu0  ;;  %v617_v38 = vpop.f32.mrb[5].mxu1 }
 0x20b   :  { %v578_v62 = vpop.f32.mrb[6].mxu0  ;;  %v619_v37 = vpop.f32.mrb[6].mxu1 }
 0x20c   :  { %v579_v36 = vpop.f32.mrb[7].mxu0  ;;  %v620_v35 = vpop.f32.mrb[7].mxu1 }
 0x219   :  { %v736_v34 = vpop.f32.mrb[8].mxu0  ;;  %v777_v33 = vpop.f32.mrb[8].mxu1 }
 0x21a   :  { %v737_v32 = vadd.f32 %v736_v34, %v574_v21  ;;  %v778_v62 = vadd.f32 %v777_v33, %v615_v56  ;;  %v738_v37 = vpop.f32.mrb[9].mxu0  ;;  %v779_v36 = vpop.f32.mrb[9].mxu1 }
 0x21b   :  { %v739_v35 = vadd.f32 %v738_v37, %v576_v39  ;;  %v780_v31 = vadd.f32 %v779_v36, %v617_v38  ;;  %v740_v30 = vpop.f32.mrb[10].mxu0  ;;  %v781_v29 = vpop.f32.mrb[10].mxu1  ;;  %v4785_v39 = vld [vmem:[#allocation28_spill] sm:$0xff] }
 0x21c   :  { %v805_v28 = vadd.f32 %v3908_v53, %v737_v32  ;;  %v741_v27 = vpop.f32.mrb[11].mxu0  ;;  %v782_v26 = vpop.f32.mrb[11].mxu1  ;;  %v807_v33 = vadd.f32 %v3917_v42, %v778_v62  ;;  %v4784_v32 = vld [vmem:[#allocation29_spill] sm:$0xff] }
 0x21d   :  { %v806_v25 = vadd.f32 %v3912_v19, %v739_v35  ;;  %v130_v34 = vpop.permute.xlu0 %129 }
 0x21e   :  { %v809_v43 = vmul.f32 0.5, %v805_v28  ;;  %v187_v29 = vmul.f32 %v3762_v46, %v130_v34  ;;  %v188_v30 = vmul.f32 %v3765_v47, %v130_v34  ;;  %v189_v45 = vmul.f32 %v4785_v39, %v130_v34 }
 0x21f   :  { %v813_v24 = vmul.f32 0.5, %v806_v25 }
 0x220   :  { %3235 = vtanh.f32 %v809_v43  ;;  %v240_v38 = vadd.f32 %v4784_v32, %v187_v29  ;;  %v241_v21 = vadd.f32 %v3781_v55, %v188_v30  ;;  %v242_v47 = vadd.f32 %v3789_v59, %v189_v45  ;;  %v4786_v29 = vld [vmem:[#allocation31_spill] sm:$0xff] }
 0x221   :  { %3237 = vtanh.f32 %v813_v24  ;;  %v190_v32 = vmul.f32 %v4786_v29, %v130_v34 }
 0x222   :  { %3239 = vtanh.f32 %v807_v33 }
 0x229   :  { %v862_v27 = vpop.f32.mrb[12].mxu0  ;;  %v903_v26 = vpop.f32.mrb[12].mxu1 }
 0x22a   :  { %v3236_v28 = vpop.eup %3235  ;;  %v910_v25 = vadd.f32 %v862_v27, %v240_v38  ;;  %v864_v56 = vpop.f32.mrb[13].mxu0  ;;  %v912_v38 = vadd.f32 %v903_v26, %v242_v47 }
 0x22b   :  { %v905_v37 = vpop.f32.mrb[13].mxu1  ;;  %v3238_v62 = vpop.eup %3237  ;;  %v811_v24 = vmul.f32 0.5, %v3236_v28  ;;  %v911_v36 = vadd.f32 %v864_v56, %v241_v21  ;;  %v243_v21 = vadd.f32 %v3795_v20, %v190_v32 }
 0x22c   :  { %v866_v35 = vpop.f32.mrb[14].mxu0  ;;  %v907_v43 = vpop.f32.mrb[14].mxu1  ;;  %v815_v33 = vmul.f32 0.5, %v3238_v62  ;;  %v914_v46 = vmul.f32 0.5, %v910_v25 }
 0x22d   :  { %v867_v39 = vpop.f32.mrb[15].mxu0  ;;  %v908_v42 = vpop.f32.mrb[15].mxu1  ;;  %v812_v19 = vadd.f32 0.5, %v811_v24  ;;  %v918_v53 = vmul.f32 0.5, %v911_v36  ;;  %v913_v25 = vadd.f32 %v905_v37, %v243_v21  ;;  %v4787_v35 = vld [vmem:[#allocation27_spill] sm:$0xff] }
 0x22e   :  { %v3240_v30 = vpop.eup %3239  ;;  %v816_v55 = vadd.f32 0.5, %v815_v33  ;;  %3241 = vtanh.f32 %v914_v46  ;;  %v3933_v46 = vrot.slane %v3904_v0, %v4787_v35 }
 0x22f   :  { %v823_v27 = vmul.f32 %v3240_v30, %v812_v19  ;;  %3243 = vtanh.f32 %v918_v53  ;;  %v923_v45 = vmul.f32 0.5, %v913_v25 }
 0x230   :  { %v822_v28 = vmul.f32 0.0, %v816_v55  ;;  %3245 = vtanh.f32 %v912_v38  ;;  %v808_v19 = vadd.f32 %v3933_v46, %v780_v31 }
 0x231   :  { %3247 = vtanh.f32 %v923_v45 }
 0x232   :  { %v3929_v56 = vadd.f32 %v823_v27, %v822_v28  ;;  %v818_v37 = vmul.f32 0.5, %v808_v19 }
 0x238   :  { %v3242_v62 = vpop.eup %3241 }
 0x239   :  { %v3244_v34 = vpop.eup %3243  ;;  %v916_v39 = vmul.f32 0.5, %v3242_v62 }
 0x23a   :  { %v920_v42 = vmul.f32 0.5, %v3244_v34  ;;  %v3246_v36 = vpop.eup %3245 }
 0x23b   :  { %v917_v24 = vadd.f32 0.5, %v916_v39  ;;  %v3248_v26 = vpop.eup %3247 }
 0x23c   :  { %v921_v47 = vadd.f32 0.5, %v920_v42  ;;  %v925_v43 = vmul.f32 0.5, %v3248_v26 }
 0x23d   :  { %v928_v55 = vmul.f32 %v3246_v36, %v917_v24 }
 0x23e   :  { %v927_v53 = vmul.f32 %v921_v47, %v3798_v51  ;;  %v926_v33 = vadd.f32 0.5, %v925_v43 }
 0x240   :  { %v3937_v32 = vadd.f32 %v928_v55, %v927_v53 }
 0x242   :  { %3249 = vtanh.f32 %v3937_v32 }
 0x243   :  { %3251 = vtanh.f32 %v818_v37 }
 0x244   :  { %3253 = vtanh.f32 %v3929_v56 }
 0x24c   :  { %v3250_v30 = vpop.eup %3249 }
 0x24d   :  { %v931_v38 = vmul.f32 %v3250_v30, %v926_v33  ;;  %v3252_v51 = vpop.eup %3251 }
 0x24e   :  { %v820_v31 = vmul.f32 0.5, %v3252_v51  ;;  %v3254_v27 = vpop.eup %3253 }
 0x24f   :  { %v932_v0 = vpack.c.bf16 %v931_v38, %v931_v38 }
 0x250   :  { %v821_v28 = vadd.f32 0.5, %v820_v31 }
 0x251   :  { %3061 = vmatmul.mubr.msk.bf16.vlgmr.msra.gmra.mrb[16].mxu0 %vm348_vm0, %v932_v0  ;;  %3062 = vmatmul.mubr.msk.bf16.vlgmr.msra.gmra.mrb[16].mxu1 %vm348_vm0, %v932_v0 }
 0x252   :  { %1022 = vmatpush1.bf16.msra.mxu0 %v3801_v40  ;;  %1063 = vmatpush1.bf16.msra.mxu1 %v3803_v44  ;;  %v826_v21 = vmul.f32 %v3254_v27, %v821_v28  ;;  %v4805_v28 = vld [vmem:[#allocation33_spill] sm:$0xff] }
 0x253   :  { %1023 = vmatprep.subr.bf16.mxu0 %v3805_v52  ;;  %1064 = vmatprep.subr.bf16.mxu1 %v3807_v50 }
 0x254   :  { %1053 = vmatprep.mubr.bf16.mxu0 %v4780_v49  ;;  %1094 = vmatprep.mubr.bf16.mxu1 %v4780_v49  ;;  %v827_v25 = vpack.c.bf16 %v826_v21, %v826_v21 }
 0x256   :  { %1024 = vmatpush1.bf16.msra.mxu0 %v3813_v54  ;;  %1065 = vmatpush1.bf16.msra.mxu1 %v3815_v57 }
 0x257   :  { %1025 = vmatprep.subr.bf16.mxu0 %v3819_v58  ;;  %1066 = vmatprep.subr.bf16.mxu1 %v3821_v61 }
 0x25a   :  { %1026 = vmatpush1.bf16.msra.mxu0 %v3827_v48  ;;  %1067 = vmatpush1.bf16.msra.mxu1 %v3829_v60 }
 0x25b   :  { %1027 = vmatprep.subr.bf16.mxu0 %v3833_v16  ;;  %1068 = vmatprep.subr.bf16.mxu1 %v3835_v41 }
 0x25e   :  { %1028 = vmatpush1.bf16.msra.mxu0 %v3839_v63  ;;  %1069 = vmatpush1.bf16.msra.mxu1 %v3841_v1 }
 0x25f   :  { %1126 = vmatprep.subr.bf16.mxu0 %v3589_v2  ;;  %1167 = vmatprep.subr.bf16.mxu1 %v3594_v3  ;;  %v4788_v2 = vld [vmem:[#allocation9_spill] sm:$0xff]  ;;  %v4789_v3 = vld [vmem:[#allocation10_spill] sm:$0xff] }
 0x261   :  { %3063 = vmatmul.mubr.msk.bf16.vlgmr.msra.gmra.mrb[20].mxu0 %vm348_vm0, %v827_v25  ;;  %3064 = vmatmul.mubr.msk.bf16.vlgmr.msra.gmra.mrb[20].mxu1 %vm348_vm0, %v827_v25 }
 0x262   :  { %1127 = vmatpush1.bf16.msra.mxu0 %v3600_v4  ;;  %1168 = vmatpush1.bf16.msra.mxu1 %v3605_v5  ;;  %v4790_v4 = vld [vmem:[#allocation11_spill] sm:$0xff]  ;;  %v4791_v5 = vld [vmem:[#allocation12_spill] sm:$0xff] }
 0x263   :  { %1128 = vmatprep.subr.bf16.mxu0 %v3611_v6  ;;  %1169 = vmatprep.subr.bf16.mxu1 %v3618_v7  ;;  %v4792_v6 = vld [vmem:[#allocation13_spill] sm:$0xff]  ;;  %v4793_v7 = vld [vmem:[#allocation14_spill] sm:$0xff] }
 0x264   :  { %1158 = vmatprep.mubr.bf16.mxu0 %v4780_v49  ;;  %1199 = vmatprep.mubr.bf16.mxu1 %v4780_v49 }
 0x266   :  { %1129 = vmatpush1.bf16.msra.mxu0 %v3623_v8  ;;  %1170 = vmatpush1.bf16.msra.mxu1 %v3629_v9  ;;  %v4794_v8 = vld [vmem:[#allocation15_spill] sm:$0xff]  ;;  %v4795_v9 = vld [vmem:[#allocation16_spill] sm:$0xff] }
 0x267   :  { %1130 = vmatprep.subr.bf16.mxu0 %v3635_v10  ;;  %1171 = vmatprep.subr.bf16.mxu1 %v3640_v11  ;;  %v4796_v10 = vld [vmem:[#allocation17_spill] sm:$0xff]  ;;  %v4797_v11 = vld [vmem:[#allocation18_spill] sm:$0xff] }
 0x26a   :  { %1131 = vmatpush1.bf16.msra.mxu0 %v3645_v12  ;;  %1172 = vmatpush1.bf16.msra.mxu1 %v3650_v13  ;;  %v4798_v12 = vld [vmem:[#allocation19_spill] sm:$0xff]  ;;  %v4799_v13 = vld [vmem:[#allocation20_spill] sm:$0xff] }
 0x26b   :  { %1132 = vmatprep.subr.bf16.mxu0 %v3657_v14  ;;  %1173 = vmatprep.subr.bf16.mxu1 %v3664_v15  ;;  %v4800_v14 = vld [vmem:[#allocation21_spill] sm:$0xff]  ;;  %v4801_v15 = vld [vmem:[#allocation22_spill] sm:$0xff] }
 0x26e   :  { %1133 = vmatpush1.bf16.msra.mxu0 %v3672_v17  ;;  %1174 = vmatpush1.bf16.msra.mxu1 %v3677_v18  ;;  %v4802_v17 = vld [vmem:[#allocation23_spill] sm:$0xff]  ;;  %v4803_v18 = vld [vmem:[#allocation24_spill] sm:$0xff] }
 0x26f   :  { %1234 = vmatprep.subr.bf16.mxu0 %v3698_v22  ;;  %1275 = vmatprep.subr.bf16.mxu1 %v3700_v23 }
 0x271   :  { %3065 = vmatmul.mubr.msk.bf16.vlgmr.msra.gmra.mrb[24].mxu0 %vm348_vm0, %v932_v0  ;;  %3066 = vmatmul.mubr.msk.bf16.vlgmr.msra.gmra.mrb[24].mxu1 %vm348_vm0, %v932_v0  ;;  %v4804_v0 = vld [vmem:[#allocation32_spill] sm:$0xff] }
 0x272   :  { %1235 = vmatpush1.bf16.msra.mxu0 %v4788_v2  ;;  %1276 = vmatpush1.bf16.msra.mxu1 %v4789_v3 }
 0x273   :  { %1236 = vmatprep.subr.bf16.mxu0 %v4790_v4  ;;  %1277 = vmatprep.subr.bf16.mxu1 %v4791_v5 }
 0x274   :  { %1266 = vmatprep.mubr.bf16.mxu0 %v4780_v49  ;;  %1307 = vmatprep.mubr.bf16.mxu1 %v4780_v49 }
 0x276   :  { %1237 = vmatpush1.bf16.msra.mxu0 %v4792_v6  ;;  %1278 = vmatpush1.bf16.msra.mxu1 %v4793_v7 }
 0x277   :  { %1238 = vmatprep.subr.bf16.mxu0 %v4794_v8  ;;  %1279 = vmatprep.subr.bf16.mxu1 %v4795_v9 }
 0x27a   :  { %1239 = vmatpush1.bf16.msra.mxu0 %v4796_v10  ;;  %1280 = vmatpush1.bf16.msra.mxu1 %v4797_v11 }
 0x27b   :  { %1240 = vmatprep.subr.bf16.mxu0 %v4798_v12  ;;  %1281 = vmatprep.subr.bf16.mxu1 %v4799_v13 }
 0x27e   :  { %1241 = vmatpush1.bf16.msra.mxu0 %v4800_v14  ;;  %1282 = vmatpush1.bf16.msra.mxu1 %v4801_v15 }
 0x27f   :  { %1319 = vmatprep.subr.bf16.mxu0 %v4802_v17  ;;  %1360 = vmatprep.subr.bf16.mxu1 %v4803_v18 }
 0x324   :  { %v970_v45 = vpop.f32.mrb[16].mxu0  ;;  %v1011_v62 = vpop.f32.mrb[16].mxu1 }
 0x325   :  { %v972_v34 = vpop.f32.mrb[17].mxu0  ;;  %v1013_v39 = vpop.f32.mrb[17].mxu1 }
 0x326   :  { %v974_v42 = vpop.f32.mrb[18].mxu0  ;;  %v1015_v24 = vpop.f32.mrb[18].mxu1 }
 0x327   :  { %v975_v36 = vpop.f32.mrb[19].mxu0  ;;  %v1016_v35 = vpop.f32.mrb[19].mxu1  ;;  %v4806_v24 = vld [vmem:[#allocation34_spill] sm:$0xff] }
 0x328   :  { %v135_v35 = vpop.permute.xlu1 %134 }
 0x334   :  { %v1055_v47 = vpop.f32.mrb[20].mxu0  ;;  %v1096_v55 = vpop.f32.mrb[20].mxu1 }
 0x335   :  { %v1056_v53 = vadd.f32 %v1055_v47, %v970_v45  ;;  %v1097_v19 = vadd.f32 %v1096_v55, %v1011_v62  ;;  %v1057_v26 = vpop.f32.mrb[21].mxu0  ;;  %v1098_v37 = vpop.f32.mrb[21].mxu1  ;;  %v4807_v45 = vld [vmem:[#allocation25_spill] sm:$0xff]  ;;  %v4808_v47 = vld [vmem:[#allocation26_spill] sm:$0xff] }
 0x336   :  { %v1058_v43 = vadd.f32 %v1057_v26, %v972_v34  ;;  %v1099_v33 = vadd.f32 %v1098_v37, %v1013_v39  ;;  %v1059_v30 = vpop.f32.mrb[22].mxu0  ;;  %v1100_v38 = vpop.f32.mrb[22].mxu1  ;;  %v191_v62 = vmul.f32 %v4807_v45, %v135_v35  ;;  %v192_v34 = vmul.f32 %v4808_v47, %v135_v35  ;;  %v4809_v39 = vld [vmem:[#allocation29_spill] sm:$0xff]  ;;  %v4810_v26 = vld [vmem:[#allocation28_spill] sm:$0xff]  ;;  %v4811_v37 = vld [vmem:[#allocation30_spill] sm:$0xff] }
 0x337   :  { %v1103_v51 = vadd.f32 %v1056_v53, %v4804_v0  ;;  %v1060_v31 = vpop.f32.mrb[23].mxu0  ;;  %v1101_v27 = vpop.f32.mrb[23].mxu1  ;;  %v1105_v36 = vadd.f32 %v1097_v19, %v4806_v24  ;;  %v193_v53 = vmul.f32 %v4810_v26, %v135_v35 }
 0x338   :  { %v1104_v21 = vadd.f32 %v1058_v43, %v4805_v28  ;;  %v244_v55 = vadd.f32 %v4809_v39, %v191_v62  ;;  %v245_v30 = vadd.f32 %v4811_v37, %v192_v34 }
 0x339   :  { %v1107_v25 = vmul.f32 0.5, %v1103_v51  ;;  %v246_v27 = vadd.f32 %v3789_v59, %v193_v53 }
 0x33a   :  { %v1111_v42 = vmul.f32 0.5, %v1104_v21  ;;  %v194_v21 = vmul.f32 %v4786_v29, %v135_v35 }
 0x33b   :  { %3255 = vtanh.f32 %v1107_v25 }
 0x33c   :  { %3257 = vtanh.f32 %v1111_v42  ;;  %v247_v53 = vadd.f32 %v3795_v20, %v194_v21 }
 0x33d   :  { %3259 = vtanh.f32 %v1105_v36 }
 0x344   :  { %v1160_v38 = vpop.f32.mrb[24].mxu0  ;;  %v1201_v43 = vpop.f32.mrb[24].mxu1 }
 0x345   :  { %v3256_v51 = vpop.eup %3255  ;;  %v1208_v31 = vadd.f32 %v1160_v38, %v244_v55  ;;  %v1162_v19 = vpop.f32.mrb[25].mxu0  ;;  %v1210_v55 = vadd.f32 %v1201_v43, %v246_v27 }
 0x346   :  { %v1203_v25 = vpop.f32.mrb[25].mxu1  ;;  %v3258_v42 = vpop.eup %3257  ;;  %v1109_v45 = vmul.f32 0.5, %v3256_v51  ;;  %v1209_v47 = vadd.f32 %v1162_v19, %v245_v30 }
 0x347   :  { %v1164_v36 = vpop.f32.mrb[26].mxu0  ;;  %v1205_v24 = vpop.f32.mrb[26].mxu1  ;;  %v1113_v62 = vmul.f32 0.5, %v3258_v42  ;;  %v1212_v39 = vmul.f32 0.5, %v1208_v31 }
 0x348   :  { %v1165_v26 = vpop.f32.mrb[27].mxu0  ;;  %v1206_v28 = vpop.f32.mrb[27].mxu1  ;;  %v1110_v34 = vadd.f32 0.5, %v1109_v45  ;;  %v1216_v37 = vmul.f32 0.5, %v1209_v47  ;;  %v1211_v24 = vadd.f32 %v1203_v25, %v247_v53 }
 0x349   :  { %v3260_v0 = vpop.eup %3259  ;;  %v1114_v18 = vadd.f32 0.5, %v1113_v62  ;;  %3261 = vtanh.f32 %v1212_v39 }
 0x34a   :  { %v1121_v38 = vmul.f32 %v3260_v0, %v1110_v34  ;;  %3263 = vtanh.f32 %v1216_v37  ;;  %v1221_v30 = vmul.f32 0.5, %v1211_v24  ;;  %v1106_v0 = vadd.f32 %v1099_v33, %v3933_v46  ;;  %v4052_v24 = vld [vmem:[%s4662_s3 + $0xc] ss:$16 sps:$4 sm:$0xff]  }
 0x34b   :  { %v1120_v35 = vmul.f32 %v1114_v18, %v3929_v56  ;;  %3265 = vtanh.f32 %v1210_v55 }
 0x34c   :  { %3267 = vtanh.f32 %v1221_v30  ;;  %v1116_v18 = vmul.f32 0.5, %v1106_v0  ;;  %v4060_v30 = vld [vmem:[%s4662_s3] ss:$16 sps:$4 sm:$0xff]   ;;  %v4122_v0 = vld [vmem:[%s4662_s3 + $0x64] ss:$16 sps:$4 sm:$0xff]  }
 0x34d   :  { %v4013_v51 = vadd.f32 %v1121_v38, %v1120_v35  ;;  %v4046_v35 = vld [vmem:[%s4662_s3 + $0x4] ss:$16 sps:$4 sm:$0xff]  }
 0x353   :  { %v3262_v31 = vpop.eup %3261 }
 0x354   :  { %v3264_v26 = vpop.eup %3263  ;;  %v1214_v28 = vmul.f32 0.5, %v3262_v31  ;;  %v4066_v31 = vld [vmem:[%s4662_s3 + $0x8] ss:$16 sps:$4 sm:$0xff]  }
 0x355   :  { %v1218_v45 = vmul.f32 0.5, %v3264_v26  ;;  %v3266_v19 = vpop.eup %3265  ;;  %v4072_v26 = vld [vmem:[%s4662_s3 + $0x24] ss:$16 sps:$4 sm:$0xff]  }
 0x356   :  { %v1215_v47 = vadd.f32 0.5, %v1214_v28  ;;  %v3268_v56 = vpop.eup %3267  ;;  %v4078_v28 = vld [vmem:[%s4662_s3 + $0x2c] ss:$16 sps:$4 sm:$0xff]  }
 0x357   :  { %v1219_v39 = vadd.f32 0.5, %v1218_v45  ;;  %v1223_v21 = vmul.f32 0.5, %v3268_v56  ;;  %v4086_v45 = vld [vmem:[%s4662_s3 + $0x20] ss:$16 sps:$4 sm:$0xff]   ;;  %v4128_v56 = vld [vmem:[%s4662_s3 + $0x6c] ss:$16 sps:$4 sm:$0xff]  }
 0x358   :  { %v1226_v43 = vmul.f32 %v3266_v19, %v1215_v47  ;;  %v4092_v47 = vld [vmem:[%s4662_s3 + $0x28] ss:$16 sps:$4 sm:$0xff]   ;;  %v4098_v19 = vld [vmem:[%s4662_s3 + $0x44] ss:$16 sps:$4 sm:$0xff]  }
 0x359   :  { %v1225_v27 = vmul.f32 %v1219_v39, %v3937_v32  ;;  %v1224_v25 = vadd.f32 0.5, %v1223_v21  ;;  %v4104_v39 = vld [vmem:[%s4662_s3 + $0x4c] ss:$16 sps:$4 sm:$0xff]   ;;  %v4140_v21 = vld [vmem:[%s4662_s3 + $0x68] ss:$16 sps:$4 sm:$0xff]  }
 0x35b   :  { %v4017_v37 = vadd.f32 %v1226_v43, %v1225_v27  ;;  %v4110_v43 = vld [vmem:[%s4662_s3 + $0x40] ss:$16 sps:$4 sm:$0xff]   ;;  %v4116_v27 = vld [vmem:[%s4662_s3 + $0x48] ss:$16 sps:$4 sm:$0xff]  }
 0x35d   :  { %3269 = vtanh.f32 %v4017_v37 }
 0x35e   :  { %3271 = vtanh.f32 %v1116_v18  ;;  %v4134_v18 = vld [vmem:[%s4662_s3 + $0x60] ss:$16 sps:$4 sm:$0xff]  }
 0x35f   :  { %3273 = vtanh.f32 %v4013_v51 }
 0x367   :  { %v3270_v42 = vpop.eup %3269 }
 0x368   :  { %v1229_v36 = vmul.f32 %v3270_v42, %v1224_v25  ;;  %v3272_v32 = vpop.eup %3271 }
 0x369   :  { %v1118_v33 = vmul.f32 0.5, %v3272_v32  ;;  %v3274_v34 = vpop.eup %3273 }
 0x36a   :  { %v4021_v62 = vpack.c.bf16 %v1229_v36, %v1229_v36  ;;  %v4813_v36 = vld [vmem:[#allocation32_spill] sm:$0xff] }
 0x36b   :  { %v1119_v55 = vadd.f32 0.5, %v1118_v33 }
 0x36c   :  { %3067 = vmatmul.mubr.msk.bf16.vlgmr.msra.gmra.mrb[28].mxu0 %vm348_vm0, %v4021_v62  ;;  %3068 = vmatmul.mubr.msk.bf16.vlgmr.msra.gmra.mrb[28].mxu1 %vm348_vm0, %v4021_v62 }
 0x36d   :  { %1320 = vmatpush1.bf16.msra.mxu0 %v3801_v40  ;;  %1361 = vmatpush1.bf16.msra.mxu1 %v3803_v44  ;;  %v1124_v53 = vmul.f32 %v3274_v34, %v1119_v55  ;;  %v4814_v34 = vld [vmem:[#allocation33_spill] sm:$0xff] }
 0x36e   :  { %1321 = vmatprep.subr.bf16.mxu0 %v3805_v52  ;;  %1362 = vmatprep.subr.bf16.mxu1 %v3807_v50 }
 0x36f   :  { %1351 = vmatprep.mubr.bf16.mxu0 %v4780_v49  ;;  %1392 = vmatprep.mubr.bf16.mxu1 %v4780_v49  ;;  %v1125_v38 = vpack.c.bf16 %v1124_v53, %v1124_v53 }
 0x371   :  { %1322 = vmatpush1.bf16.msra.mxu0 %v3813_v54  ;;  %1363 = vmatpush1.bf16.msra.mxu1 %v3815_v57 }
 0x372   :  { %1323 = vmatprep.subr.bf16.mxu0 %v3819_v58  ;;  %1364 = vmatprep.subr.bf16.mxu1 %v3821_v61 }
 0x375   :  { %1324 = vmatpush1.bf16.msra.mxu0 %v3827_v48  ;;  %1365 = vmatpush1.bf16.msra.mxu1 %v3829_v60 }
 0x376   :  { %1325 = vmatprep.subr.bf16.mxu0 %v3833_v16  ;;  %1366 = vmatprep.subr.bf16.mxu1 %v3835_v41 }
 0x379   :  { %1326 = vmatpush1.bf16.msra.mxu0 %v3839_v63  ;;  %1367 = vmatpush1.bf16.msra.mxu1 %v3841_v1 }
 0x37a   :  { %1424 = vmatprep.subr.bf16.mxu0 %v4046_v35  ;;  %1465 = vmatprep.subr.bf16.mxu1 %v4052_v24 }
 0x37c   :  { %3069 = vmatmul.mubr.msk.bf16.vlgmr.msra.gmra.mrb[32].mxu0 %vm348_vm0, %v1125_v38  ;;  %3070 = vmatmul.mubr.msk.bf16.vlgmr.msra.gmra.mrb[32].mxu1 %vm348_vm0, %v1125_v38 }
 0x37d   :  { %1425 = vmatpush1.bf16.msra.mxu0 %v4060_v30  ;;  %1466 = vmatpush1.bf16.msra.mxu1 %v4066_v31 }
 0x37e   :  { %1426 = vmatprep.subr.bf16.mxu0 %v4072_v26  ;;  %1467 = vmatprep.subr.bf16.mxu1 %v4078_v28 }
 0x37f   :  { %1456 = vmatprep.mubr.bf16.mxu0 %v4780_v49  ;;  %1497 = vmatprep.mubr.bf16.mxu1 %v4780_v49 }
 0x381   :  { %1427 = vmatpush1.bf16.msra.mxu0 %v4086_v45  ;;  %1468 = vmatpush1.bf16.msra.mxu1 %v4092_v47 }
 0x382   :  { %1428 = vmatprep.subr.bf16.mxu0 %v4098_v19  ;;  %1469 = vmatprep.subr.bf16.mxu1 %v4104_v39 }
 0x385   :  { %1429 = vmatpush1.bf16.msra.mxu0 %v4110_v43  ;;  %1470 = vmatpush1.bf16.msra.mxu1 %v4116_v27 }
 0x386   :  { %1430 = vmatprep.subr.bf16.mxu0 %v4122_v0  ;;  %1471 = vmatprep.subr.bf16.mxu1 %v4128_v56 }
 0x389   :  { %1431 = vmatpush1.bf16.msra.mxu0 %v4134_v18  ;;  %1472 = vmatpush1.bf16.msra.mxu1 %v4140_v21 }
 0x38a   :  { %1532 = vmatprep.subr.bf16.mxu0 %v3698_v22  ;;  %1573 = vmatprep.subr.bf16.mxu1 %v3700_v23  ;;  %v4812_v22 = vld [vmem:[#allocation24_spill] sm:$0xff] }
 0x38c   :  { %3071 = vmatmul.mubr.msk.bf16.vlgmr.msra.gmra.mrb[36].mxu0 %vm348_vm0, %v4021_v62  ;;  %3072 = vmatmul.mubr.msk.bf16.vlgmr.msra.gmra.mrb[36].mxu1 %vm348_vm0, %v4021_v62 }
 0x38d   :  { %1533 = vmatpush1.bf16.msra.mxu0 %v4788_v2  ;;  %1574 = vmatpush1.bf16.msra.mxu1 %v4789_v3 }
 0x38e   :  { %1534 = vmatprep.subr.bf16.mxu0 %v4790_v4  ;;  %1575 = vmatprep.subr.bf16.mxu1 %v4791_v5 }
 0x38f   :  { %1564 = vmatprep.mubr.bf16.mxu0 %v4780_v49  ;;  %1605 = vmatprep.mubr.bf16.mxu1 %v4780_v49 }
 0x391   :  { %1535 = vmatpush1.bf16.msra.mxu0 %v4792_v6  ;;  %1576 = vmatpush1.bf16.msra.mxu1 %v4793_v7 }
 0x392   :  { %1536 = vmatprep.subr.bf16.mxu0 %v4794_v8  ;;  %1577 = vmatprep.subr.bf16.mxu1 %v4795_v9 }
 0x395   :  { %1537 = vmatpush1.bf16.msra.mxu0 %v4796_v10  ;;  %1578 = vmatpush1.bf16.msra.mxu1 %v4797_v11 }
 0x396   :  { %1538 = vmatprep.subr.bf16.mxu0 %v4798_v12  ;;  %1579 = vmatprep.subr.bf16.mxu1 %v4799_v13 }
 0x399   :  { %1539 = vmatpush1.bf16.msra.mxu0 %v4800_v14  ;;  %1580 = vmatpush1.bf16.msra.mxu1 %v4801_v15 }
 0x39a   :  { %1617 = vmatprep.subr.bf16.mxu0 %v4802_v17  ;;  %1658 = vmatprep.subr.bf16.mxu1 %v4812_v22  ;;  %v4815_v22 = vld [vmem:[#allocation34_spill] sm:$0xff] }
 0x43f   :  { %v1268_v23 = vpop.f32.mrb[28].mxu0  ;;  %v1309_v2 = vpop.f32.mrb[28].mxu1 }
 0x440   :  { %v1270_v3 = vpop.f32.mrb[29].mxu0  ;;  %v1311_v4 = vpop.f32.mrb[29].mxu1 }
 0x441   :  { %v1272_v5 = vpop.f32.mrb[30].mxu0  ;;  %v1313_v6 = vpop.f32.mrb[30].mxu1 }
 0x442   :  { %v1273_v7 = vpop.f32.mrb[31].mxu0  ;;  %v1314_v8 = vpop.f32.mrb[31].mxu1 }
 0x443   :  { %v4818_v7 = vld [vmem:[#allocation29_spill] sm:$0xff] }
 0x44f   :  { %v1353_v9 = vpop.f32.mrb[32].mxu0  ;;  %v1394_v10 = vpop.f32.mrb[32].mxu1 }
 0x450   :  { %v1354_v11 = vadd.f32 %v1353_v9, %v1268_v23  ;;  %v1395_v12 = vadd.f32 %v1394_v10, %v1309_v2  ;;  %v1355_v13 = vpop.f32.mrb[33].mxu0  ;;  %v1396_v14 = vpop.f32.mrb[33].mxu1  ;;  %v4816_v2 = vld [vmem:[#allocation25_spill] sm:$0xff]  ;;  %v4819_v9 = vld [vmem:[#allocation28_spill] sm:$0xff] }
 0x451   :  { %v1356_v25 = vadd.f32 %v1355_v13, %v1270_v3  ;;  %v1397_v15 = vadd.f32 %v1396_v14, %v1311_v4  ;;  %v1357_v42 = vpop.f32.mrb[34].mxu0  ;;  %v1398_v17 = vpop.f32.mrb[34].mxu1  ;;  %v4817_v3 = vld [vmem:[#allocation26_spill] sm:$0xff] }
 0x452   :  { %v1401_v62 = vadd.f32 %v1354_v11, %v4813_v36  ;;  %v1358_v32 = vpop.f32.mrb[35].mxu0  ;;  %v1399_v33 = vpop.f32.mrb[35].mxu1  ;;  %v1403_v5 = vadd.f32 %v1395_v12, %v4815_v22  ;;  %v4820_v14 = vld [vmem:[#allocation30_spill] sm:$0xff] }
 0x453   :  { %v1402_v55 = vadd.f32 %v1356_v25, %v4814_v34  ;;  %v140_v23 = vpop.permute.xlu1 %139 }
 0x454   :  { %v1405_v53 = vmul.f32 0.5, %v1401_v62  ;;  %v195_v6 = vmul.f32 %v4816_v2, %v140_v23  ;;  %v196_v4 = vmul.f32 %v4817_v3, %v140_v23  ;;  %v197_v10 = vmul.f32 %v4819_v9, %v140_v23 }
 0x455   :  { %v1409_v38 = vmul.f32 0.5, %v1402_v55 }
 0x456   :  { %3275 = vtanh.f32 %v1405_v53  ;;  %v248_v8 = vadd.f32 %v4818_v7, %v195_v6  ;;  %v249_v25 = vadd.f32 %v4820_v14, %v196_v4  ;;  %v250_v3 = vadd.f32 %v3789_v59, %v197_v10 }
 0x457   :  { %3277 = vtanh.f32 %v1409_v38  ;;  %v198_v6 = vmul.f32 %v4786_v29, %v140_v23 }
 0x458   :  { %3279 = vtanh.f32 %v1403_v5 }
 0x45f   :  { %v1458_v11 = vpop.f32.mrb[36].mxu0  ;;  %v1499_v13 = vpop.f32.mrb[36].mxu1 }
 0x460   :  { %v3276_v42 = vpop.eup %3275  ;;  %v1506_v17 = vadd.f32 %v1458_v11, %v248_v8  ;;  %v1460_v62 = vpop.f32.mrb[37].mxu0  ;;  %v1508_v8 = vadd.f32 %v1499_v13, %v250_v3 }
 0x461   :  { %v1501_v32 = vpop.f32.mrb[37].mxu1  ;;  %v3278_v12 = vpop.eup %3277  ;;  %v1407_v33 = vmul.f32 0.5, %v3276_v42  ;;  %v1507_v55 = vadd.f32 %v1460_v62, %v249_v25  ;;  %v251_v42 = vadd.f32 %v3795_v20, %v198_v6 }
 0x462   :  { %v1462_v53 = vpop.f32.mrb[38].mxu0  ;;  %v1503_v38 = vpop.f32.mrb[38].mxu1  ;;  %v1411_v5 = vmul.f32 0.5, %v3278_v12  ;;  %v1510_v2 = vmul.f32 0.5, %v1506_v17 }
 0x463   :  { %v1463_v9 = vpop.f32.mrb[39].mxu0  ;;  %v1504_v7 = vpop.f32.mrb[39].mxu1  ;;  %v1408_v22 = vadd.f32 0.5, %v1407_v33  ;;  %v1514_v34 = vmul.f32 0.5, %v1507_v55  ;;  %v1509_v10 = vadd.f32 %v1501_v32, %v251_v42  ;;  %v4271_v42 = vld [vmem:[#allocation3 + $0x60] ss:$16 sps:$4 sm:$0xff]  }
 0x464   :  { %v3280_v4 = vpop.eup %3279  ;;  %v1412_v14 = vadd.f32 0.5, %v1411_v5  ;;  %3281 = vtanh.f32 %v1510_v2  ;;  %4834 = vst [vmem:[#allocation20_spill] sm:$0xff] %v4271_v42 }
 0x465   :  { %v1419_v11 = vmul.f32 %v3280_v4, %v1408_v22  ;;  %3283 = vtanh.f32 %v1514_v34  ;;  %v1519_v17 = vmul.f32 0.5, %v1509_v10  ;;  %v4274_v10 = vld [vmem:[#allocation3 + $0x68] ss:$16 sps:$4 sm:$0xff]  }
 0x466   :  { %v1418_v25 = vmul.f32 %v1412_v14, %v4013_v51  ;;  %3285 = vtanh.f32 %v1508_v8  ;;  %v1404_v51 = vadd.f32 %v1397_v15, %v3933_v46  ;;  %v4262_v8 = vld [vmem:[#allocation3 + $0x48] ss:$16 sps:$4 sm:$0xff]   ;;  %4835 = vst [vmem:[#allocation21_spill] sm:$0xff] %v4274_v10 }
 0x467   :  { %3287 = vtanh.f32 %v1519_v17  ;;  %4831 = vst [vmem:[#allocation17_spill] sm:$0xff] %v4262_v8  ;;  %v4277_v17 = vld [vmem:[#allocation5 + $0x4] ss:$16 sps:$4 sm:$0xff]  }
 0x468   :  { %v4179_v62 = vadd.f32 %v1419_v11, %v1418_v25  ;;  %v1414_v14 = vmul.f32 0.5, %v1404_v51  ;;  %v4265_v11 = vld [vmem:[#allocation3 + $0x64] ss:$16 sps:$4 sm:$0xff]   ;;  %v4268_v25 = vld [vmem:[#allocation3 + $0x6c] ss:$16 sps:$4 sm:$0xff]   ;;  %4836 = vst [vmem:[#allocation22_spill] sm:$0xff] %v4277_v17 }
 0x469   :  { %4832 = vst [vmem:[#allocation18_spill] sm:$0xff] %v4265_v11  ;;  %4833 = vst [vmem:[#allocation19_spill] sm:$0xff] %v4268_v25 }
 0x46e   :  { %v3282_v23 = vpop.eup %3281 }
 0x46f   :  { %v3284_v9 = vpop.eup %3283  ;;  %v1512_v7 = vmul.f32 0.5, %v3282_v23  ;;  %v4280_v23 = vld [vmem:[#allocation5 + $0xc] ss:$16 sps:$4 sm:$0xff]  }
 0x470   :  { %v1516_v12 = vmul.f32 0.5, %v3284_v9  ;;  %v3286_v55 = vpop.eup %3285  ;;  %4837 = vst [vmem:[#allocation23_spill] sm:$0xff] %v4280_v23 }
 0x471   :  { %v1513_v33 = vadd.f32 0.5, %v1512_v7  ;;  %v3288_v13 = vpop.eup %3287 }
 0x472   :  { %v1517_v2 = vadd.f32 0.5, %v1516_v12  ;;  %v1521_v32 = vmul.f32 0.5, %v3288_v13 }
 0x473   :  { %v1524_v3 = vmul.f32 %v3286_v55, %v1513_v33 }
 0x474   :  { %v1523_v34 = vmul.f32 %v1517_v2, %v4017_v37  ;;  %v1522_v53 = vadd.f32 0.5, %v1521_v32 }
 0x476   :  { %v4183_v22 = vadd.f32 %v1524_v3, %v1523_v34 }
 0x478   :  { %3289 = vtanh.f32 %v4183_v22 }
 0x479   :  { %3291 = vtanh.f32 %v1414_v14 }
 0x47a   :  { %3293 = vtanh.f32 %v4179_v62 }
 0x482   :  { %v3290_v38 = vpop.eup %3289 }
 0x483   :  { %v1527_v5 = vmul.f32 %v3290_v38, %v1522_v53  ;;  %v3292_v37 = vpop.eup %3291 }
 0x484   :  { %v1416_v15 = vmul.f32 0.5, %v3292_v37 }
 0x485   :  { %v1528_v6 = vpack.c.bf16 %v1527_v5, %v1527_v5 }
 0x486   :  { %v1417_v4 = vadd.f32 0.5, %v1416_v15 }
 0x487   :  { %3073 = vmatmul.mubr.msk.bf16.vlgmr.msra.gmra.mrb[40].mxu0 %vm348_vm0, %v1528_v6  ;;  %3074 = vmatmul.mubr.msk.bf16.vlgmr.msra.gmra.mrb[40].mxu1 %vm348_vm0, %v1528_v6 }
 0x488   :  { %1618 = vmatpush1.bf16.msra.mxu0 %v3801_v40  ;;  %1659 = vmatpush1.bf16.msra.mxu1 %v3803_v44  ;;  %v3294_v40 = vpop.eup %3293 }
 0x489   :  { %1619 = vmatprep.subr.bf16.mxu0 %v3805_v52  ;;  %1660 = vmatprep.subr.bf16.mxu1 %v3807_v50  ;;  %v1422_v44 = vmul.f32 %v3294_v40, %v1417_v4  ;;  %v4225_v50 = vld [vmem:[#allocation3 + $0x4] ss:$16 sps:$4 sm:$0xff]  }
 0x48a   :  { %1649 = vmatprep.mubr.bf16.mxu0 %v4780_v49  ;;  %1690 = vmatprep.mubr.bf16.mxu1 %v4780_v49 }
 0x48b   :  { %v1423_v52 = vpack.c.bf16 %v1422_v44, %v1422_v44 }
 0x48c   :  { %1620 = vmatpush1.bf16.msra.mxu0 %v3813_v54  ;;  %1661 = vmatpush1.bf16.msra.mxu1 %v3815_v57  ;;  %v4228_v54 = vld [vmem:[#allocation3 + $0xc] ss:$16 sps:$4 sm:$0xff]   ;;  %v4233_v57 = vld [vmem:[#allocation3] ss:$16 sps:$4 sm:$0xff]  }
 0x48d   :  { %1621 = vmatprep.subr.bf16.mxu0 %v3819_v58  ;;  %1662 = vmatprep.subr.bf16.mxu1 %v3821_v61  ;;  %4821 = vst [vmem:[#allocation31_spill] sm:$0xff] %v4228_v54  ;;  %4822 = vst [vmem:[#allocation27_spill] sm:$0xff] %v4233_v57  ;;  %v4236_v58 = vld [vmem:[#allocation3 + $0x8] ss:$16 sps:$4 sm:$0xff]   ;;  %v4239_v61 = vld [vmem:[#allocation3 + $0x24] ss:$16 sps:$4 sm:$0xff]  }
 0x48e   :  { %4823 = vst [vmem:[#allocation9_spill] sm:$0xff] %v4236_v58  ;;  %4824 = vst [vmem:[#allocation10_spill] sm:$0xff] %v4239_v61 }
 0x490   :  { %1622 = vmatpush1.bf16.msra.mxu0 %v3827_v48  ;;  %1663 = vmatpush1.bf16.msra.mxu1 %v3829_v60  ;;  %v4242_v48 = vld [vmem:[#allocation3 + $0x2c] ss:$16 sps:$4 sm:$0xff]   ;;  %v4247_v60 = vld [vmem:[#allocation3 + $0x20] ss:$16 sps:$4 sm:$0xff]  }
 0x491   :  { %1623 = vmatprep.subr.bf16.mxu0 %v3833_v16  ;;  %1664 = vmatprep.subr.bf16.mxu1 %v3835_v41  ;;  %4825 = vst [vmem:[#allocation11_spill] sm:$0xff] %v4242_v48  ;;  %4826 = vst [vmem:[#allocation12_spill] sm:$0xff] %v4247_v60  ;;  %v4250_v16 = vld [vmem:[#allocation3 + $0x28] ss:$16 sps:$4 sm:$0xff]   ;;  %v4253_v41 = vld [vmem:[#allocation3 + $0x44] ss:$16 sps:$4 sm:$0xff]  }
 0x492   :  { %4827 = vst [vmem:[#allocation13_spill] sm:$0xff] %v4250_v16  ;;  %4828 = vst [vmem:[#allocation14_spill] sm:$0xff] %v4253_v41 }
 0x494   :  { %1624 = vmatpush1.bf16.msra.mxu0 %v3839_v63  ;;  %1665 = vmatpush1.bf16.msra.mxu1 %v3841_v1  ;;  %v4256_v63 = vld [vmem:[#allocation3 + $0x4c] ss:$16 sps:$4 sm:$0xff]   ;;  %v4259_v1 = vld [vmem:[#allocation3 + $0x40] ss:$16 sps:$4 sm:$0xff]  }
 0x495   :  { %1722 = vmatprep.subr.bf16.mxu0 %v4046_v35  ;;  %1763 = vmatprep.subr.bf16.mxu1 %v4052_v24  ;;  %4829 = vst [vmem:[#allocation15_spill] sm:$0xff] %v4256_v63  ;;  %4830 = vst [vmem:[#allocation16_spill] sm:$0xff] %v4259_v1 }
 0x497   :  { %3075 = vmatmul.mubr.msk.bf16.vlgmr.msra.gmra.mrb[44].mxu0 %vm348_vm0, %v1423_v52  ;;  %3076 = vmatmul.mubr.msk.bf16.vlgmr.msra.gmra.mrb[44].mxu1 %vm348_vm0, %v1423_v52  ;;  %v4838_v52 = vld [vmem:[#allocation33_spill] sm:$0xff] }
 0x498   :  { %1723 = vmatpush1.bf16.msra.mxu0 %v4060_v30  ;;  %1764 = vmatpush1.bf16.msra.mxu1 %v4066_v31 }
 0x499   :  { %1724 = vmatprep.subr.bf16.mxu0 %v4072_v26  ;;  %1765 = vmatprep.subr.bf16.mxu1 %v4078_v28 }
 0x49a   :  { %1754 = vmatprep.mubr.bf16.mxu0 %v4780_v49  ;;  %1795 = vmatprep.mubr.bf16.mxu1 %v4780_v49 }
 0x49c   :  { %1725 = vmatpush1.bf16.msra.mxu0 %v4086_v45  ;;  %1766 = vmatpush1.bf16.msra.mxu1 %v4092_v47 }
 0x49d   :  { %1726 = vmatprep.subr.bf16.mxu0 %v4098_v19  ;;  %1767 = vmatprep.subr.bf16.mxu1 %v4104_v39 }
 0x4a0   :  { %1727 = vmatpush1.bf16.msra.mxu0 %v4110_v43  ;;  %1768 = vmatpush1.bf16.msra.mxu1 %v4116_v27 }
 0x4a1   :  { %1728 = vmatprep.subr.bf16.mxu0 %v4122_v0  ;;  %1769 = vmatprep.subr.bf16.mxu1 %v4128_v56 }
 0x4a4   :  { %1729 = vmatpush1.bf16.msra.mxu0 %v4134_v18  ;;  %1770 = vmatpush1.bf16.msra.mxu1 %v4140_v21 }
 0x4a5   :  { %1830 = vmatprep.subr.bf16.mxu0 %v4225_v50  ;;  %1871 = vmatprep.subr.bf16.mxu1 %v4228_v54 }
 0x4a7   :  { %3077 = vmatmul.mubr.msk.bf16.vlgmr.msra.gmra.mrb[48].mxu0 %vm348_vm0, %v1528_v6  ;;  %3078 = vmatmul.mubr.msk.bf16.vlgmr.msra.gmra.mrb[48].mxu1 %vm348_vm0, %v1528_v6 }
 0x4a8   :  { %1831 = vmatpush1.bf16.msra.mxu0 %v4233_v57  ;;  %1872 = vmatpush1.bf16.msra.mxu1 %v4236_v58 }
 0x4a9   :  { %1832 = vmatprep.subr.bf16.mxu0 %v4239_v61  ;;  %1873 = vmatprep.subr.bf16.mxu1 %v4242_v48 }
 0x4aa   :  { %1862 = vmatprep.mubr.bf16.mxu0 %v4780_v49  ;;  %1903 = vmatprep.mubr.bf16.mxu1 %v4780_v49 }
 0x4ac   :  { %1833 = vmatpush1.bf16.msra.mxu0 %v4247_v60  ;;  %1874 = vmatpush1.bf16.msra.mxu1 %v4250_v16 }
 0x4ad   :  { %1834 = vmatprep.subr.bf16.mxu0 %v4253_v41  ;;  %1875 = vmatprep.subr.bf16.mxu1 %v4256_v63 }
 0x4b0   :  { %1835 = vmatpush1.bf16.msra.mxu0 %v4259_v1  ;;  %1876 = vmatpush1.bf16.msra.mxu1 %v4262_v8 }
 0x4b1   :  { %1836 = vmatprep.subr.bf16.mxu0 %v4265_v11  ;;  %1877 = vmatprep.subr.bf16.mxu1 %v4268_v25 }
 0x4b4   :  { %1837 = vmatpush1.bf16.msra.mxu0 %v4271_v42  ;;  %1878 = vmatpush1.bf16.msra.mxu1 %v4274_v10 }
 0x4b5   :  { %1915 = vmatprep.subr.bf16.mxu0 %v4277_v17  ;;  %1956 = vmatprep.subr.bf16.mxu1 %v4280_v23 }
 0x55a   :  { %v1566_v9 = vpop.f32.mrb[40].mxu0  ;;  %v1607_v7 = vpop.f32.mrb[40].mxu1 }
 0x55b   :  { %v1568_v12 = vpop.f32.mrb[41].mxu0  ;;  %v1609_v33 = vpop.f32.mrb[41].mxu1 }
 0x55c   :  { %v1570_v55 = vpop.f32.mrb[42].mxu0  ;;  %v1611_v2 = vpop.f32.mrb[42].mxu1 }
 0x55d   :  { %v1571_v3 = vpop.f32.mrb[43].mxu0  ;;  %v1612_v34 = vpop.f32.mrb[43].mxu1 }
 0x55e   :  { %v4839_v3 = vld [vmem:[#allocation34_spill] sm:$0xff] }
 0x56a   :  { %v1651_v51 = vpop.f32.mrb[44].mxu0  ;;  %v1692_v13 = vpop.f32.mrb[44].mxu1 }
 0x56b   :  { %v1652_v14 = vadd.f32 %v1651_v51, %v1566_v9  ;;  %v1693_v32 = vadd.f32 %v1692_v13, %v1607_v7  ;;  %v1653_v53 = vpop.f32.mrb[45].mxu0  ;;  %v1694_v38 = vpop.f32.mrb[45].mxu1  ;;  %v4840_v7 = vld [vmem:[#allocation25_spill] sm:$0xff] }
 0x56c   :  { %v1654_v5 = vadd.f32 %v1653_v53, %v1568_v12  ;;  %v1695_v6 = vadd.f32 %v1694_v38, %v1609_v33  ;;  %v1655_v37 = vpop.f32.mrb[46].mxu0  ;;  %v1696_v15 = vpop.f32.mrb[46].mxu1  ;;  %v4841_v12 = vld [vmem:[#allocation26_spill] sm:$0xff]  ;;  %v4842_v13 = vld [vmem:[#allocation29_spill] sm:$0xff]  ;;  %v4843_v38 = vld [vmem:[#allocation28_spill] sm:$0xff] }
 0x56d   :  { %v1699_v40 = vadd.f32 %v1652_v14, %v4813_v36  ;;  %v1656_v4 = vpop.f32.mrb[47].mxu0  ;;  %v1697_v44 = vpop.f32.mrb[47].mxu1  ;;  %v1701_v34 = vadd.f32 %v1693_v32, %v4839_v3 }
 0x56e   :  { %v1700_v23 = vadd.f32 %v1654_v5, %v4838_v52  ;;  %v145_v9 = vpop.permute.xlu0 %144  ;;  %v4844_v4 = vld [vmem:[#allocation30_spill] sm:$0xff] }
 0x56f   :  { %v1703_v55 = vmul.f32 0.5, %v1699_v40  ;;  %v199_v51 = vmul.f32 %v4840_v7, %v145_v9  ;;  %v200_v33 = vmul.f32 %v4841_v12, %v145_v9  ;;  %v201_v14 = vmul.f32 %v4843_v38, %v145_v9 }
 0x570   :  { %v1707_v2 = vmul.f32 0.5, %v1700_v23 }
 0x571   :  { %3295 = vtanh.f32 %v1703_v55  ;;  %v252_v53 = vadd.f32 %v4842_v13, %v199_v51  ;;  %v253_v5 = vadd.f32 %v4844_v4, %v200_v33  ;;  %v254_v12 = vadd.f32 %v3789_v59, %v201_v14 }
 0x572   :  { %3297 = vtanh.f32 %v1707_v2  ;;  %v202_v51 = vmul.f32 %v4786_v29, %v145_v9 }
 0x573   :  { %3299 = vtanh.f32 %v1701_v34 }
 0x57a   :  { %v1756_v37 = vpop.f32.mrb[48].mxu0  ;;  %v1797_v15 = vpop.f32.mrb[48].mxu1 }
 0x57b   :  { %v3296_v40 = vpop.eup %3295  ;;  %v1804_v23 = vadd.f32 %v1756_v37, %v252_v53  ;;  %v1758_v44 = vpop.f32.mrb[49].mxu0  ;;  %v1806_v53 = vadd.f32 %v1797_v15, %v254_v12 }
 0x57c   :  { %v1799_v55 = vpop.f32.mrb[49].mxu1  ;;  %v3298_v32 = vpop.eup %3297  ;;  %v1705_v2 = vmul.f32 0.5, %v3296_v40  ;;  %v1805_v3 = vadd.f32 %v1758_v44, %v253_v5 }
 0x57d   :  { %v1760_v34 = vpop.f32.mrb[50].mxu0  ;;  %v1801_v52 = vpop.f32.mrb[50].mxu1  ;;  %v1709_v7 = vmul.f32 0.5, %v3298_v32  ;;  %v1808_v36 = vmul.f32 0.5, %v1804_v23 }
 0x57e   :  { %v1761_v38 = vpop.f32.mrb[51].mxu0  ;;  %v1802_v13 = vpop.f32.mrb[51].mxu1  ;;  %v1706_v17 = vadd.f32 0.5, %v1705_v2  ;;  %v1812_v10 = vmul.f32 0.5, %v1805_v3  ;;  %v255_v52 = vadd.f32 %v3795_v20, %v202_v51 }
 0x57f   :  { %v3300_v33 = vpop.eup %3299  ;;  %v1710_v4 = vadd.f32 0.5, %v1709_v7  ;;  %3301 = vtanh.f32 %v1808_v36 }
 0x580   :  { %v1717_v37 = vmul.f32 %v3300_v33, %v1706_v17  ;;  %3303 = vtanh.f32 %v1812_v10  ;;  %v1807_v14 = vadd.f32 %v1799_v55, %v255_v52  ;;  %v4308_v33 = vld [vmem:[#allocation5 + $0x8] ss:$16 sps:$4 sm:$0xff]   ;;  %v4319_v52 = vld [vmem:[#allocation5 + $0x20] ss:$16 sps:$4 sm:$0xff]  }
 0x581   :  { %v1716_v5 = vmul.f32 %v1710_v4, %v4179_v62  ;;  %3305 = vtanh.f32 %v1806_v53  ;;  %v1702_v62 = vadd.f32 %v1695_v6, %v3933_v46  ;;  %v4305_v6 = vld [vmem:[#allocation5] ss:$16 sps:$4 sm:$0xff]   ;;  %v4311_v53 = vld [vmem:[#allocation5 + $0x24] ss:$16 sps:$4 sm:$0xff]  }
 0x582   :  { %v1817_v23 = vmul.f32 0.5, %v1807_v14  ;;  %v4322_v14 = vld [vmem:[#allocation5 + $0x28] ss:$16 sps:$4 sm:$0xff]  }
 0x583   :  { %v4295_v40 = vadd.f32 %v1717_v37, %v1716_v5  ;;  %v1712_v4 = vmul.f32 0.5, %v1702_v62  ;;  %v4314_v37 = vld [vmem:[#allocation5 + $0x2c] ss:$16 sps:$4 sm:$0xff]   ;;  %v4346_v62 = vld [vmem:[#allocation5 + $0x68] ss:$16 sps:$4 sm:$0xff]  }
 0x584   :  { %3307 = vtanh.f32 %v1817_v23  ;;  %v4325_v23 = vld [vmem:[#allocation5 + $0x44] ss:$16 sps:$4 sm:$0xff]  }
 0x589   :  { %v3302_v9 = vpop.eup %3301 }
 0x58a   :  { %v3304_v38 = vpop.eup %3303  ;;  %v1810_v13 = vmul.f32 0.5, %v3302_v9  ;;  %v4328_v9 = vld [vmem:[#allocation5 + $0x4c] ss:$16 sps:$4 sm:$0xff]  }
 0x58b   :  { %v1814_v44 = vmul.f32 0.5, %v3304_v38  ;;  %v3306_v7 = vpop.eup %3305 }
 0x58c   :  { %v1811_v3 = vadd.f32 0.5, %v1810_v13 }
 0x58d   :  { %v1815_v36 = vadd.f32 0.5, %v1814_v44  ;;  %v4331_v44 = vld [vmem:[#allocation5 + $0x40] ss:$16 sps:$4 sm:$0xff]  }
 0x58e   :  { %v1822_v12 = vmul.f32 %v3306_v7, %v1811_v3  ;;  %v3308_v15 = vpop.eup %3307  ;;  %v4334_v3 = vld [vmem:[#allocation5 + $0x48] ss:$16 sps:$4 sm:$0xff]  }
 0x58f   :  { %v1821_v10 = vmul.f32 %v1815_v36, %v4183_v22  ;;  %v1819_v55 = vmul.f32 0.5, %v3308_v15  ;;  %v4337_v36 = vld [vmem:[#allocation5 + $0x64] ss:$16 sps:$4 sm:$0xff]  }
 0x591   :  { %v4299_v17 = vadd.f32 %v1822_v12, %v1821_v10  ;;  %v1820_v32 = vadd.f32 0.5, %v1819_v55  ;;  %v4340_v12 = vld [vmem:[#allocation5 + $0x6c] ss:$16 sps:$4 sm:$0xff]   ;;  %v4343_v10 = vld [vmem:[#allocation5 + $0x60] ss:$16 sps:$4 sm:$0xff]  }
 0x592   :  { %v4846_v55 = vld [vmem:[#allocation22_spill] sm:$0xff] }
 0x593   :  { %3309 = vtanh.f32 %v4299_v17 }
 0x594   :  { %3311 = vtanh.f32 %v1712_v4  ;;  %v4845_v4 = vld [vmem:[#allocation21_spill] sm:$0xff] }
 0x595   :  { %3313 = vtanh.f32 %v4295_v40 }
 0x59d   :  { %v3310_v2 = vpop.eup %3309 }
 0x59e   :  { %v1825_v34 = vmul.f32 %v3310_v2, %v1820_v32  ;;  %v3312_v22 = vpop.eup %3311  ;;  %v4847_v32 = vld [vmem:[#allocation23_spill] sm:$0xff] }
 0x59f   :  { %v1714_v5 = vmul.f32 0.5, %v3312_v22  ;;  %v3314_v38 = vpop.eup %3313 }
 0x5a0   :  { %v1826_v51 = vpack.c.bf16 %v1825_v34, %v1825_v34 }
 0x5a1   :  { %v1715_v13 = vadd.f32 0.5, %v1714_v5 }
 0x5a2   :  { %3079 = vmatmul.mubr.msk.bf16.vlgmr.msra.gmra.mrb[52].mxu0 %vm348_vm0, %v1826_v51  ;;  %3080 = vmatmul.mubr.msk.bf16.vlgmr.msra.gmra.mrb[52].mxu1 %vm348_vm0, %v1826_v51 }
 0x5a3   :  { %1916 = vmatpush1.bf16.msra.mxu0 %v4305_v6  ;;  %1957 = vmatpush1.bf16.msra.mxu1 %v4308_v33  ;;  %v1720_v7 = vmul.f32 %v3314_v38, %v1715_v13 }
 0x5a4   :  { %1917 = vmatprep.subr.bf16.mxu0 %v4311_v53  ;;  %1958 = vmatprep.subr.bf16.mxu1 %v4314_v37 }
 0x5a5   :  { %1947 = vmatprep.mubr.bf16.mxu0 %v4780_v49  ;;  %1988 = vmatprep.mubr.bf16.mxu1 %v4780_v49  ;;  %v1721_v15 = vpack.c.bf16 %v1720_v7, %v1720_v7 }
 0x5a7   :  { %1918 = vmatpush1.bf16.msra.mxu0 %v4319_v52  ;;  %1959 = vmatpush1.bf16.msra.mxu1 %v4322_v14 }
 0x5a8   :  { %1919 = vmatprep.subr.bf16.mxu0 %v4325_v23  ;;  %1960 = vmatprep.subr.bf16.mxu1 %v4328_v9 }
 0x5ab   :  { %1920 = vmatpush1.bf16.msra.mxu0 %v4331_v44  ;;  %1961 = vmatpush1.bf16.msra.mxu1 %v4334_v3 }
 0x5ac   :  { %1921 = vmatprep.subr.bf16.mxu0 %v4337_v36  ;;  %1962 = vmatprep.subr.bf16.mxu1 %v4340_v12 }
 0x5af   :  { %1922 = vmatpush1.bf16.msra.mxu0 %v4343_v10  ;;  %1963 = vmatpush1.bf16.msra.mxu1 %v4346_v62 }
 0x5b0   :  { %2020 = vmatprep.subr.bf16.mxu0 %v4046_v35  ;;  %2061 = vmatprep.subr.bf16.mxu1 %v4052_v24 }
 0x5b2   :  { %3081 = vmatmul.mubr.msk.bf16.vlgmr.msra.gmra.mrb[56].mxu0 %vm348_vm0, %v1721_v15  ;;  %3082 = vmatmul.mubr.msk.bf16.vlgmr.msra.gmra.mrb[56].mxu1 %vm348_vm0, %v1721_v15 }
 0x5b3   :  { %2021 = vmatpush1.bf16.msra.mxu0 %v4060_v30  ;;  %2062 = vmatpush1.bf16.msra.mxu1 %v4066_v31 }
 0x5b4   :  { %2022 = vmatprep.subr.bf16.mxu0 %v4072_v26  ;;  %2063 = vmatprep.subr.bf16.mxu1 %v4078_v28 }
 0x5b5   :  { %2052 = vmatprep.mubr.bf16.mxu0 %v4780_v49  ;;  %2093 = vmatprep.mubr.bf16.mxu1 %v4780_v49 }
 0x5b7   :  { %2023 = vmatpush1.bf16.msra.mxu0 %v4086_v45  ;;  %2064 = vmatpush1.bf16.msra.mxu1 %v4092_v47 }
 0x5b8   :  { %2024 = vmatprep.subr.bf16.mxu0 %v4098_v19  ;;  %2065 = vmatprep.subr.bf16.mxu1 %v4104_v39 }
 0x5bb   :  { %2025 = vmatpush1.bf16.msra.mxu0 %v4110_v43  ;;  %2066 = vmatpush1.bf16.msra.mxu1 %v4116_v27 }
 0x5bc   :  { %2026 = vmatprep.subr.bf16.mxu0 %v4122_v0  ;;  %2067 = vmatprep.subr.bf16.mxu1 %v4128_v56 }
 0x5bf   :  { %2027 = vmatpush1.bf16.msra.mxu0 %v4134_v18  ;;  %2068 = vmatpush1.bf16.msra.mxu1 %v4140_v21 }
 0x5c0   :  { %2128 = vmatprep.subr.bf16.mxu0 %v4225_v50  ;;  %2169 = vmatprep.subr.bf16.mxu1 %v4228_v54 }
 0x5c2   :  { %3083 = vmatmul.mubr.msk.bf16.vlgmr.msra.gmra.mrb[60].mxu0 %vm348_vm0, %v1826_v51  ;;  %3084 = vmatmul.mubr.msk.bf16.vlgmr.msra.gmra.mrb[60].mxu1 %vm348_vm0, %v1826_v51 }
 0x5c3   :  { %2129 = vmatpush1.bf16.msra.mxu0 %v4233_v57  ;;  %2170 = vmatpush1.bf16.msra.mxu1 %v4236_v58 }
 0x5c4   :  { %2130 = vmatprep.subr.bf16.mxu0 %v4239_v61  ;;  %2171 = vmatprep.subr.bf16.mxu1 %v4242_v48  ;;  %v4849_v61 = vld [vmem:[#allocation33_spill] sm:$0xff] }
 0x5c5   :  { %2160 = vmatprep.mubr.bf16.mxu0 %v4780_v49  ;;  %2201 = vmatprep.mubr.bf16.mxu1 %v4780_v49 }
 0x5c7   :  { %2131 = vmatpush1.bf16.msra.mxu0 %v4247_v60  ;;  %2172 = vmatpush1.bf16.msra.mxu1 %v4250_v16  ;;  %v4848_v16 = vld [vmem:[#allocation32_spill] sm:$0xff] }
 0x5c8   :  { %2132 = vmatprep.subr.bf16.mxu0 %v4253_v41  ;;  %2173 = vmatprep.subr.bf16.mxu1 %v4256_v63 }
 0x5cb   :  { %2133 = vmatpush1.bf16.msra.mxu0 %v4259_v1  ;;  %2174 = vmatpush1.bf16.msra.mxu1 %v4262_v8 }
 0x5cc   :  { %2134 = vmatprep.subr.bf16.mxu0 %v4265_v11  ;;  %2175 = vmatprep.subr.bf16.mxu1 %v4268_v25 }
 0x5cf   :  { %2135 = vmatpush1.bf16.msra.mxu0 %v4271_v42  ;;  %2176 = vmatpush1.bf16.msra.mxu1 %v4845_v4 }
 0x5d0   :  { %2213 = vmatprep.subr.bf16.mxu0 %v4846_v55  ;;  %2254 = vmatprep.subr.bf16.mxu1 %v4847_v32 }
 0x675   :  { %v1864_v2 = vpop.f32.mrb[52].mxu0  ;;  %v1905_v34 = vpop.f32.mrb[52].mxu1 }
 0x676   :  { %v1866_v51 = vpop.f32.mrb[53].mxu0  ;;  %v1907_v22 = vpop.f32.mrb[53].mxu1 }
 0x677   :  { %v1868_v5 = vpop.f32.mrb[54].mxu0  ;;  %v1909_v38 = vpop.f32.mrb[54].mxu1 }
 0x678   :  { %v1869_v13 = vpop.f32.mrb[55].mxu0  ;;  %v1910_v7 = vpop.f32.mrb[55].mxu1 }
 0x679   :  { %v4850_v13 = vld [vmem:[#allocation34_spill] sm:$0xff] }
 0x685   :  { %v1949_v15 = vpop.f32.mrb[56].mxu0  ;;  %v1990_v11 = vpop.f32.mrb[56].mxu1 }
 0x686   :  { %v1950_v8 = vadd.f32 %v1949_v15, %v1864_v2  ;;  %v1991_v25 = vadd.f32 %v1990_v11, %v1905_v34  ;;  %v1951_v1 = vpop.f32.mrb[57].mxu0  ;;  %v1992_v42 = vpop.f32.mrb[57].mxu1  ;;  %v4851_v11 = vld [vmem:[#allocation25_spill] sm:$0xff] }
 0x687   :  { %v1952_v63 = vadd.f32 %v1951_v1, %v1866_v51  ;;  %v1993_v4 = vadd.f32 %v1992_v42, %v1907_v22  ;;  %v1953_v41 = vpop.f32.mrb[58].mxu0  ;;  %v1994_v55 = vpop.f32.mrb[58].mxu1  ;;  %v4852_v1 = vld [vmem:[#allocation26_spill] sm:$0xff]  ;;  %v4854_v51 = vld [vmem:[#allocation28_spill] sm:$0xff] }
 0x688   :  { %v1997_v32 = vadd.f32 %v1950_v8, %v4848_v16  ;;  %v1954_v60 = vpop.f32.mrb[59].mxu0  ;;  %v1995_v48 = vpop.f32.mrb[59].mxu1  ;;  %v1999_v7 = vadd.f32 %v1991_v25, %v4850_v13  ;;  %v4853_v41 = vld [vmem:[#allocation29_spill] sm:$0xff]  ;;  %v4855_v22 = vld [vmem:[#allocation30_spill] sm:$0xff] }
 0x689   :  { %v1998_v58 = vadd.f32 %v1952_v63, %v4849_v61  ;;  %v150_v2 = vpop.permute.xlu1 %149 }
 0x68a   :  { %v2001_v5 = vmul.f32 0.5, %v1997_v32  ;;  %v203_v34 = vmul.f32 %v4851_v11, %v150_v2  ;;  %v204_v42 = vmul.f32 %v4852_v1, %v150_v2  ;;  %v205_v8 = vmul.f32 %v4854_v51, %v150_v2 }
 0x68b   :  { %v2005_v38 = vmul.f32 0.5, %v1998_v58 }
 0x68c   :  { %3315 = vtanh.f32 %v2001_v5  ;;  %v256_v55 = vadd.f32 %v4853_v41, %v203_v34  ;;  %v257_v63 = vadd.f32 %v4855_v22, %v204_v42  ;;  %v258_v1 = vadd.f32 %v3789_v59, %v205_v8 }
 0x68d   :  { %3317 = vtanh.f32 %v2005_v38  ;;  %v206_v34 = vmul.f32 %v4786_v29, %v150_v2 }
 0x68e   :  { %3319 = vtanh.f32 %v1999_v7 }
 0x695   :  { %v2054_v60 = vpop.f32.mrb[60].mxu0  ;;  %v2095_v48 = vpop.f32.mrb[60].mxu1 }
 0x696   :  { %v3316_v32 = vpop.eup %3315  ;;  %v2102_v58 = vadd.f32 %v2054_v60, %v256_v55  ;;  %v2056_v15 = vpop.f32.mrb[61].mxu0  ;;  %v2104_v55 = vadd.f32 %v2095_v48, %v258_v1 }
 0x697   :  { %v2097_v5 = vpop.f32.mrb[61].mxu1  ;;  %v3318_v25 = vpop.eup %3317  ;;  %v2003_v38 = vmul.f32 0.5, %v3316_v32  ;;  %v2103_v13 = vadd.f32 %v2056_v15, %v257_v63 }
 0x698   :  { %v2058_v7 = vpop.f32.mrb[62].mxu0  ;;  %v2099_v61 = vpop.f32.mrb[62].mxu1  ;;  %v2007_v11 = vmul.f32 0.5, %v3318_v25  ;;  %v2106_v16 = vmul.f32 0.5, %v2102_v58 }
 0x699   :  { %v2059_v41 = vpop.f32.mrb[63].mxu0  ;;  %v2100_v51 = vpop.f32.mrb[63].mxu1  ;;  %v2004_v57 = vadd.f32 0.5, %v2003_v38  ;;  %v2110_v54 = vmul.f32 0.5, %v2103_v13  ;;  %v259_v61 = vadd.f32 %v3795_v20, %v206_v34 }
 0x69a   :  { %v3320_v42 = vpop.eup %3319  ;;  %v2008_v22 = vadd.f32 0.5, %v2007_v11  ;;  %3321 = vtanh.f32 %v2106_v16 }
 0x69b   :  { %v2015_v60 = vmul.f32 %v3320_v42, %v2004_v57  ;;  %3323 = vtanh.f32 %v2110_v54  ;;  %v2105_v8 = vadd.f32 %v2097_v5, %v259_v61  ;;  %v2000_v57 = vadd.f32 %v1993_v4, %v3933_v46  ;;  %v4872_v61 = vld [vmem:[#allocation23_spill] sm:$0xff] }
 0x69c   :  { %v2014_v63 = vmul.f32 %v2008_v22, %v4295_v40  ;;  %3325 = vtanh.f32 %v2104_v55 }
 0x69d   :  { %v2115_v58 = vmul.f32 0.5, %v2105_v8  ;;  %v2010_v22 = vmul.f32 0.5, %v2000_v57 }
 0x69e   :  { %v4403_v32 = vadd.f32 %v2015_v60, %v2014_v63 }
 0x69f   :  { %3327 = vtanh.f32 %v2115_v58 }
 0x6a4   :  { %v3322_v2 = vpop.eup %3321 }
 0x6a5   :  { %v3324_v41 = vpop.eup %3323  ;;  %v2108_v51 = vmul.f32 0.5, %v3322_v2 }
 0x6a6   :  { %v2112_v15 = vmul.f32 0.5, %v3324_v41  ;;  %v3326_v11 = vpop.eup %3325 }
 0x6a7   :  { %v2109_v13 = vadd.f32 0.5, %v2108_v51 }
 0x6a8   :  { %v2113_v16 = vadd.f32 0.5, %v2112_v15 }
 0x6a9   :  { %v2120_v1 = vmul.f32 %v3326_v11, %v2109_v13  ;;  %v3328_v48 = vpop.eup %3327 }
 0x6aa   :  { %v2119_v54 = vmul.f32 %v2113_v16, %v4299_v17  ;;  %v2117_v5 = vmul.f32 0.5, %v3328_v48 }
 0x6ac   :  { %v4407_v40 = vadd.f32 %v2120_v1, %v2119_v54  ;;  %v2118_v25 = vadd.f32 0.5, %v2117_v5 }
 0x6ae   :  { %3329 = vtanh.f32 %v4407_v40 }
 0x6af   :  { %3331 = vtanh.f32 %v2010_v22 }
 0x6b0   :  { %3333 = vtanh.f32 %v4403_v32 }
 0x6b8   :  { %v3330_v38 = vpop.eup %3329 }
 0x6b9   :  { %v2123_v7 = vmul.f32 %v3330_v38, %v2118_v25  ;;  %v3332_v17 = vpop.eup %3331 }
 0x6ba   :  { %v2012_v4 = vmul.f32 0.5, %v3332_v17  ;;  %v3334_v42 = vpop.eup %3333 }
 0x6bb   :  { %v2124_v34 = vpack.c.bf16 %v2123_v7, %v2123_v7 }
 0x6bc   :  { %v2013_v55 = vadd.f32 0.5, %v2012_v4 }
 0x6bd   :  { %3085 = vmatmul.mubr.msk.bf16.vlgmr.msra.gmra.mrb[64].mxu0 %vm348_vm0, %v2124_v34  ;;  %3086 = vmatmul.mubr.msk.bf16.vlgmr.msra.gmra.mrb[64].mxu1 %vm348_vm0, %v2124_v34 }
 0x6be   :  { %2214 = vmatpush1.bf16.msra.mxu0 %v4305_v6  ;;  %2255 = vmatpush1.bf16.msra.mxu1 %v4308_v33  ;;  %v2018_v60 = vmul.f32 %v3334_v42, %v2013_v55  ;;  %v4874_v55 = vld [vmem:[#allocation33_spill] sm:$0xff] }
 0x6bf   :  { %2215 = vmatprep.subr.bf16.mxu0 %v4311_v53  ;;  %2256 = vmatprep.subr.bf16.mxu1 %v4314_v37 }
 0x6c0   :  { %2245 = vmatprep.mubr.bf16.mxu0 %v4780_v49  ;;  %2286 = vmatprep.mubr.bf16.mxu1 %v4780_v49  ;;  %v2019_v63 = vpack.c.bf16 %v2018_v60, %v2018_v60 }
 0x6c2   :  { %2216 = vmatpush1.bf16.msra.mxu0 %v4319_v52  ;;  %2257 = vmatpush1.bf16.msra.mxu1 %v4322_v14 }
 0x6c3   :  { %2217 = vmatprep.subr.bf16.mxu0 %v4325_v23  ;;  %2258 = vmatprep.subr.bf16.mxu1 %v4328_v9 }
 0x6c6   :  { %2218 = vmatpush1.bf16.msra.mxu0 %v4331_v44  ;;  %2259 = vmatpush1.bf16.msra.mxu1 %v4334_v3 }
 0x6c7   :  { %2219 = vmatprep.subr.bf16.mxu0 %v4337_v36  ;;  %2260 = vmatprep.subr.bf16.mxu1 %v4340_v12 }
 0x6ca   :  { %2220 = vmatpush1.bf16.msra.mxu0 %v4343_v10  ;;  %2261 = vmatpush1.bf16.msra.mxu1 %v4346_v62 }
 0x6cb   :  { %2318 = vmatprep.subr.bf16.mxu0 %v4046_v35  ;;  %2359 = vmatprep.subr.bf16.mxu1 %v4052_v24  ;;  %v4856_v35 = vld [vmem:[#allocation31_spill] sm:$0xff] }
 0x6cc   :  { %v4857_v24 = vld [vmem:[#allocation27_spill] sm:$0xff] }
 0x6cd   :  { %3087 = vmatmul.mubr.msk.bf16.vlgmr.msra.gmra.mrb[68].mxu0 %vm348_vm0, %v2019_v63  ;;  %3088 = vmatmul.mubr.msk.bf16.vlgmr.msra.gmra.mrb[68].mxu1 %vm348_vm0, %v2019_v63 }
 0x6ce   :  { %2319 = vmatpush1.bf16.msra.mxu0 %v4060_v30  ;;  %2360 = vmatpush1.bf16.msra.mxu1 %v4066_v31  ;;  %v4858_v30 = vld [vmem:[#allocation9_spill] sm:$0xff]  ;;  %v4859_v31 = vld [vmem:[#allocation10_spill] sm:$0xff] }
 0x6cf   :  { %2320 = vmatprep.subr.bf16.mxu0 %v4072_v26  ;;  %2361 = vmatprep.subr.bf16.mxu1 %v4078_v28  ;;  %v4860_v26 = vld [vmem:[#allocation11_spill] sm:$0xff]  ;;  %v4861_v28 = vld [vmem:[#allocation12_spill] sm:$0xff] }
 0x6d0   :  { %2350 = vmatprep.mubr.bf16.mxu0 %v4780_v49  ;;  %2391 = vmatprep.mubr.bf16.mxu1 %v4780_v49 }
 0x6d2   :  { %2321 = vmatpush1.bf16.msra.mxu0 %v4086_v45  ;;  %2362 = vmatpush1.bf16.msra.mxu1 %v4092_v47  ;;  %v4862_v45 = vld [vmem:[#allocation13_spill] sm:$0xff]  ;;  %v4863_v47 = vld [vmem:[#allocation14_spill] sm:$0xff] }
 0x6d3   :  { %2322 = vmatprep.subr.bf16.mxu0 %v4098_v19  ;;  %2363 = vmatprep.subr.bf16.mxu1 %v4104_v39  ;;  %v4864_v19 = vld [vmem:[#allocation15_spill] sm:$0xff]  ;;  %v4865_v39 = vld [vmem:[#allocation16_spill] sm:$0xff] }
 0x6d6   :  { %2323 = vmatpush1.bf16.msra.mxu0 %v4110_v43  ;;  %2364 = vmatpush1.bf16.msra.mxu1 %v4116_v27  ;;  %v4866_v43 = vld [vmem:[#allocation17_spill] sm:$0xff]  ;;  %v4867_v27 = vld [vmem:[#allocation18_spill] sm:$0xff] }
 0x6d7   :  { %2324 = vmatprep.subr.bf16.mxu0 %v4122_v0  ;;  %2365 = vmatprep.subr.bf16.mxu1 %v4128_v56  ;;  %v4868_v0 = vld [vmem:[#allocation19_spill] sm:$0xff]  ;;  %v4869_v56 = vld [vmem:[#allocation20_spill] sm:$0xff] }
 0x6da   :  { %2325 = vmatpush1.bf16.msra.mxu0 %v4134_v18  ;;  %2366 = vmatpush1.bf16.msra.mxu1 %v4140_v21  ;;  %v4870_v18 = vld [vmem:[#allocation21_spill] sm:$0xff]  ;;  %v4871_v21 = vld [vmem:[#allocation22_spill] sm:$0xff] }
 0x6db   :  { %2426 = vmatprep.subr.bf16.mxu0 %v4225_v50  ;;  %2467 = vmatprep.subr.bf16.mxu1 %v4856_v35 }
 0x6dd   :  { %3089 = vmatmul.mubr.msk.bf16.vlgmr.msra.gmra.mrb[72].mxu0 %vm348_vm0, %v2124_v34  ;;  %3090 = vmatmul.mubr.msk.bf16.vlgmr.msra.gmra.mrb[72].mxu1 %vm348_vm0, %v2124_v34  ;;  %v4873_v34 = vld [vmem:[#allocation32_spill] sm:$0xff] }
 0x6de   :  { %2427 = vmatpush1.bf16.msra.mxu0 %v4857_v24  ;;  %2468 = vmatpush1.bf16.msra.mxu1 %v4858_v30 }
 0x6df   :  { %2428 = vmatprep.subr.bf16.mxu0 %v4859_v31  ;;  %2469 = vmatprep.subr.bf16.mxu1 %v4860_v26 }
 0x6e0   :  { %2458 = vmatprep.mubr.bf16.mxu0 %v4780_v49  ;;  %2499 = vmatprep.mubr.bf16.mxu1 %v4780_v49 }
 0x6e2   :  { %2429 = vmatpush1.bf16.msra.mxu0 %v4861_v28  ;;  %2470 = vmatpush1.bf16.msra.mxu1 %v4862_v45 }
 0x6e3   :  { %2430 = vmatprep.subr.bf16.mxu0 %v4863_v47  ;;  %2471 = vmatprep.subr.bf16.mxu1 %v4864_v19 }
 0x6e6   :  { %2431 = vmatpush1.bf16.msra.mxu0 %v4865_v39  ;;  %2472 = vmatpush1.bf16.msra.mxu1 %v4866_v43 }
 0x6e7   :  { %2432 = vmatprep.subr.bf16.mxu0 %v4867_v27  ;;  %2473 = vmatprep.subr.bf16.mxu1 %v4868_v0 }
 0x6ea   :  { %2433 = vmatpush1.bf16.msra.mxu0 %v4869_v56  ;;  %2474 = vmatpush1.bf16.msra.mxu1 %v4870_v18 }
 0x6eb   :  { %2511 = vmatprep.subr.bf16.mxu0 %v4871_v21  ;;  %2552 = vmatprep.subr.bf16.mxu1 %v4872_v61 }
 0x790   :  { %v2162_v8 = vpop.f32.mrb[64].mxu0  ;;  %v2203_v58 = vpop.f32.mrb[64].mxu1 }
 0x791   :  { %v2164_v2 = vpop.f32.mrb[65].mxu0  ;;  %v2205_v41 = vpop.f32.mrb[65].mxu1 }
 0x792   :  { %v2166_v51 = vpop.f32.mrb[66].mxu0  ;;  %v2207_v15 = vpop.f32.mrb[66].mxu1 }
 0x793   :  { %v2167_v13 = vpop.f32.mrb[67].mxu0  ;;  %v2208_v11 = vpop.f32.mrb[67].mxu1  ;;  %v4875_v15 = vld [vmem:[#allocation34_spill] sm:$0xff] }
 0x794   :  { %v155_v11 = vpop.permute.xlu0 %154 }
 0x7a0   :  { %v2247_v16 = vpop.f32.mrb[68].mxu0  ;;  %v2288_v1 = vpop.f32.mrb[68].mxu1 }
 0x7a1   :  { %v2248_v54 = vadd.f32 %v2247_v16, %v2162_v8  ;;  %v2289_v57 = vadd.f32 %v2288_v1, %v2203_v58  ;;  %v2249_v48 = vpop.f32.mrb[69].mxu0  ;;  %v2290_v22 = vpop.f32.mrb[69].mxu1  ;;  %v4876_v8 = vld [vmem:[#allocation25_spill] sm:$0xff]  ;;  %v4878_v16 = vld [vmem:[#allocation28_spill] sm:$0xff] }
 0x7a2   :  { %v2250_v5 = vadd.f32 %v2249_v48, %v2164_v2  ;;  %v2291_v25 = vadd.f32 %v2290_v22, %v2205_v41  ;;  %v2251_v38 = vpop.f32.mrb[70].mxu0  ;;  %v2292_v7 = vpop.f32.mrb[70].mxu1  ;;  %v207_v58 = vmul.f32 %v4876_v8, %v155_v11  ;;  %v4877_v2 = vld [vmem:[#allocation26_spill] sm:$0xff]  ;;  %v209_v1 = vmul.f32 %v4878_v16, %v155_v11  ;;  %v4879_v48 = vld [vmem:[#allocation29_spill] sm:$0xff] }
 0x7a3   :  { %v2295_v17 = vadd.f32 %v2248_v54, %v4873_v34  ;;  %v2252_v4 = vpop.f32.mrb[71].mxu0  ;;  %v2293_v42 = vpop.f32.mrb[71].mxu1  ;;  %v2297_v13 = vadd.f32 %v2289_v57, %v4875_v15  ;;  %v208_v41 = vmul.f32 %v4877_v2, %v155_v11  ;;  %v4880_v7 = vld [vmem:[#allocation30_spill] sm:$0xff] }
 0x7a4   :  { %v2296_v60 = vadd.f32 %v2250_v5, %v4874_v55  ;;  %v260_v54 = vadd.f32 %v4879_v48, %v207_v58  ;;  %v262_v16 = vadd.f32 %v3789_v59, %v209_v1 }
 0x7a5   :  { %v2299_v63 = vmul.f32 0.5, %v2295_v17  ;;  %v261_v5 = vadd.f32 %v4880_v7, %v208_v41 }
 0x7a6   :  { %v2303_v51 = vmul.f32 0.5, %v2296_v60 }
 0x7a7   :  { %3335 = vtanh.f32 %v2299_v63 }
 0x7a8   :  { %3337 = vtanh.f32 %v2303_v51 }
 0x7a9   :  { %3339 = vtanh.f32 %v2297_v13  ;;  %v210_v13 = vmul.f32 %v4786_v29, %v155_v11 }
 0x7b0   :  { %v2352_v22 = vpop.f32.mrb[72].mxu0  ;;  %v2393_v38 = vpop.f32.mrb[72].mxu1 }
 0x7b1   :  { %v3336_v17 = vpop.eup %3335  ;;  %v2400_v4 = vadd.f32 %v2352_v22, %v260_v54  ;;  %v2354_v42 = vpop.f32.mrb[73].mxu0  ;;  %v2402_v54 = vadd.f32 %v2393_v38, %v262_v16 }
 0x7b2   :  { %v2395_v60 = vpop.f32.mrb[73].mxu1  ;;  %v3338_v57 = vpop.eup %3337  ;;  %v2301_v63 = vmul.f32 0.5, %v3336_v17  ;;  %v2401_v51 = vadd.f32 %v2354_v42, %v261_v5 }
 0x7b3   :  { %v2356_v15 = vpop.f32.mrb[74].mxu0  ;;  %v2397_v8 = vpop.f32.mrb[74].mxu1  ;;  %v2305_v2 = vmul.f32 0.5, %v3338_v57  ;;  %v2404_v55 = vmul.f32 0.5, %v2400_v4 }
 0x7b4   :  { %v2357_v58 = vpop.f32.mrb[75].mxu0  ;;  %v2398_v48 = vpop.f32.mrb[75].mxu1  ;;  %v2302_v34 = vadd.f32 0.5, %v2301_v63  ;;  %v2408_v61 = vmul.f32 0.5, %v2401_v51  ;;  %v263_v15 = vadd.f32 %v3795_v20, %v210_v13 }
 0x7b5   :  { %v3340_v41 = vpop.eup %3339  ;;  %v2306_v7 = vadd.f32 0.5, %v2305_v2  ;;  %3341 = vtanh.f32 %v2404_v55 }
 0x7b6   :  { %v2313_v22 = vmul.f32 %v3340_v41, %v2302_v34  ;;  %3343 = vtanh.f32 %v2408_v61  ;;  %v2403_v11 = vadd.f32 %v2395_v60, %v263_v15  ;;  %v3433_v15 = vld [vmem:[%s4662_s3 + $0x4] ss:$16 sps:$4 sm:$0xff]  }
 0x7b7   :  { %v2312_v5 = vmul.f32 %v2306_v7, %v4403_v32  ;;  %3345 = vtanh.f32 %v2402_v54  ;;  %v2298_v32 = vadd.f32 %v2291_v25, %v3933_v46 }
 0x7b8   :  { %v2413_v17 = vmul.f32 0.5, %v2403_v11  ;;  %v3434_v11 = vld [vmem:[%s4662_s3 + $0xc] ss:$16 sps:$4 sm:$0xff]  }
 0x7b9   :  { %v4483_v8 = vadd.f32 %v2313_v22, %v2312_v5  ;;  %v2308_v7 = vmul.f32 0.5, %v2298_v32  ;;  %v3445_v32 = vld [vmem:[%s4662_s3 + $0x64] ss:$16 sps:$4 sm:$0xff]  }
 0x7ba   :  { %3347 = vtanh.f32 %v2413_v17  ;;  %v3435_v17 = vld [vmem:[%s4662_s3] ss:$16 sps:$4 sm:$0xff]  }
 0x7bf   :  { %v3342_v1 = vpop.eup %3341 }
 0x7c0   :  { %v3344_v4 = vpop.eup %3343  ;;  %v2406_v48 = vmul.f32 0.5, %v3342_v1  ;;  %v3436_v1 = vld [vmem:[%s4662_s3 + $0x8] ss:$16 sps:$4 sm:$0xff]  }
 0x7c1   :  { %v2410_v42 = vmul.f32 0.5, %v3344_v4  ;;  %v3346_v2 = vpop.eup %3345  ;;  %v3437_v4 = vld [vmem:[%s4662_s3 + $0x24] ss:$16 sps:$4 sm:$0xff]  }
 0x7c2   :  { %v2407_v57 = vadd.f32 0.5, %v2406_v48  ;;  %v3438_v48 = vld [vmem:[%s4662_s3 + $0x2c] ss:$16 sps:$4 sm:$0xff]  }
 0x7c3   :  { %v2411_v55 = vadd.f32 0.5, %v2410_v42  ;;  %v3439_v42 = vld [vmem:[%s4662_s3 + $0x20] ss:$16 sps:$4 sm:$0xff]  }
 0x7c4   :  { %v2418_v16 = vmul.f32 %v3346_v2, %v2407_v57  ;;  %v3348_v38 = vpop.eup %3347  ;;  %v3440_v57 = vld [vmem:[%s4662_s3 + $0x28] ss:$16 sps:$4 sm:$0xff]   ;;  %v3441_v2 = vld [vmem:[%s4662_s3 + $0x44] ss:$16 sps:$4 sm:$0xff]  }
 0x7c5   :  { %v2417_v61 = vmul.f32 %v2411_v55, %v4407_v40  ;;  %v2415_v60 = vmul.f32 0.5, %v3348_v38  ;;  %v3442_v55 = vld [vmem:[%s4662_s3 + $0x4c] ss:$16 sps:$4 sm:$0xff]  }
 0x7c6   :  { %v3446_v38 = vld [vmem:[%s4662_s3 + $0x6c] ss:$16 sps:$4 sm:$0xff]  }
 0x7c7   :  { %v4487_v34 = vadd.f32 %v2418_v16, %v2417_v61  ;;  %v2416_v63 = vadd.f32 0.5, %v2415_v60  ;;  %v3443_v16 = vld [vmem:[%s4662_s3 + $0x40] ss:$16 sps:$4 sm:$0xff]   ;;  %v3444_v61 = vld [vmem:[%s4662_s3 + $0x48] ss:$16 sps:$4 sm:$0xff]  }
 0x7c8   :  { %v3448_v60 = vld [vmem:[%s4662_s3 + $0x68] ss:$16 sps:$4 sm:$0xff]  }
 0x7c9   :  { %3349 = vtanh.f32 %v4487_v34 }
 0x7ca   :  { %3351 = vtanh.f32 %v2308_v7  ;;  %v3447_v7 = vld [vmem:[%s4662_s3 + $0x60] ss:$16 sps:$4 sm:$0xff]  }
 0x7cb   :  { %3353 = vtanh.f32 %v4483_v8 }
 0x7d3   :  { %v3350_v51 = vpop.eup %3349 }
 0x7d4   :  { %v2421_v13 = vmul.f32 %v3350_v51, %v2416_v63  ;;  %v3352_v40 = vpop.eup %3351 }
 0x7d5   :  { %v2310_v25 = vmul.f32 0.5, %v3352_v40  ;;  %v3354_v41 = vpop.eup %3353 }
 0x7d6   :  { %v4491_v58 = vpack.c.bf16 %v2421_v13, %v2421_v13  ;;  %v4882_v13 = vld [vmem:[#allocation32_spill] sm:$0xff] }
 0x7d7   :  { %v2311_v54 = vadd.f32 0.5, %v2310_v25 }
 0x7d8   :  { %3091 = vmatmul.mubr.msk.bf16.vlgmr.msra.gmra.mrb[76].mxu0 %vm348_vm0, %v4491_v58  ;;  %3092 = vmatmul.mubr.msk.bf16.vlgmr.msra.gmra.mrb[76].mxu1 %vm348_vm0, %v4491_v58 }
 0x7d9   :  { %2512 = vmatpush1.bf16.msra.mxu0 %v4305_v6  ;;  %2553 = vmatpush1.bf16.msra.mxu1 %v4308_v33  ;;  %v2316_v22 = vmul.f32 %v3354_v41, %v2311_v54  ;;  %v4883_v41 = vld [vmem:[#allocation33_spill] sm:$0xff] }
 0x7da   :  { %2513 = vmatprep.subr.bf16.mxu0 %v4311_v53  ;;  %2554 = vmatprep.subr.bf16.mxu1 %v4314_v37 }
 0x7db   :  { %2543 = vmatprep.mubr.bf16.mxu0 %v4780_v49  ;;  %2584 = vmatprep.mubr.bf16.mxu1 %v4780_v49  ;;  %v2317_v5 = vpack.c.bf16 %v2316_v22, %v2316_v22 }
 0x7dd   :  { %2514 = vmatpush1.bf16.msra.mxu0 %v4319_v52  ;;  %2555 = vmatpush1.bf16.msra.mxu1 %v4322_v14 }
 0x7de   :  { %2515 = vmatprep.subr.bf16.mxu0 %v4325_v23  ;;  %2556 = vmatprep.subr.bf16.mxu1 %v4328_v9 }
 0x7e1   :  { %2516 = vmatpush1.bf16.msra.mxu0 %v4331_v44  ;;  %2557 = vmatpush1.bf16.msra.mxu1 %v4334_v3 }
 0x7e2   :  { %2517 = vmatprep.subr.bf16.mxu0 %v4337_v36  ;;  %2558 = vmatprep.subr.bf16.mxu1 %v4340_v12 }
 0x7e5   :  { %2518 = vmatpush1.bf16.msra.mxu0 %v4343_v10  ;;  %2559 = vmatpush1.bf16.msra.mxu1 %v4346_v62 }
 0x7e6   :  { %2616 = vmatprep.subr.bf16.mxu0 %v3433_v15  ;;  %2657 = vmatprep.subr.bf16.mxu1 %v3434_v11  ;;  %v4884_v15 = vld [vmem:[#allocation34_spill] sm:$0xff] }
 0x7e8   :  { %3093 = vmatmul.mubr.msk.bf16.vlgmr.msra.gmra.mrb[80].mxu0 %vm348_vm0, %v2317_v5  ;;  %3094 = vmatmul.mubr.msk.bf16.vlgmr.msra.gmra.mrb[80].mxu1 %vm348_vm0, %v2317_v5 }
 0x7e9   :  { %2617 = vmatpush1.bf16.msra.mxu0 %v3435_v17  ;;  %2658 = vmatpush1.bf16.msra.mxu1 %v3436_v1  ;;  %v160_v17 = vpop.permute.xlu1 %159  ;;  %v4885_v1 = vld [vmem:[#allocation25_spill] sm:$0xff] }
 0x7ea   :  { %2618 = vmatprep.subr.bf16.mxu0 %v3437_v4  ;;  %2659 = vmatprep.subr.bf16.mxu1 %v3438_v48  ;;  %v211_v4 = vmul.f32 %v4885_v1, %v160_v17  ;;  %v4886_v48 = vld [vmem:[#allocation26_spill] sm:$0xff] }
 0x7eb   :  { %2648 = vmatprep.mubr.bf16.mxu0 %v4780_v49  ;;  %2689 = vmatprep.mubr.bf16.mxu1 %v4780_v49 }
 0x7ed   :  { %2619 = vmatpush1.bf16.msra.mxu0 %v3439_v42  ;;  %2660 = vmatpush1.bf16.msra.mxu1 %v3440_v57  ;;  %v212_v42 = vmul.f32 %v4886_v48, %v160_v17  ;;  %v4887_v57 = vld [vmem:[#allocation28_spill] sm:$0xff] }
 0x7ee   :  { %2620 = vmatprep.subr.bf16.mxu0 %v3441_v2  ;;  %2661 = vmatprep.subr.bf16.mxu1 %v3442_v55  ;;  %v213_v2 = vmul.f32 %v4887_v57, %v160_v17  ;;  %v4888_v55 = vld [vmem:[#allocation29_spill] sm:$0xff] }
 0x7f1   :  { %2621 = vmatpush1.bf16.msra.mxu0 %v3443_v16  ;;  %2662 = vmatpush1.bf16.msra.mxu1 %v3444_v61  ;;  %v264_v16 = vadd.f32 %v4888_v55, %v211_v4 }
 0x7f2   :  { %2622 = vmatprep.subr.bf16.mxu0 %v3445_v32  ;;  %2663 = vmatprep.subr.bf16.mxu1 %v3446_v38  ;;  %v4889_v38 = vld [vmem:[#allocation30_spill] sm:$0xff] }
 0x7f5   :  { %2623 = vmatpush1.bf16.msra.mxu0 %v3447_v7  ;;  %2664 = vmatpush1.bf16.msra.mxu1 %v3448_v60  ;;  %v265_v7 = vadd.f32 %v4889_v38, %v212_v42 }
 0x7f6   :  { %2724 = vmatprep.subr.bf16.mxu0 %v4225_v50  ;;  %2765 = vmatprep.subr.bf16.mxu1 %v4856_v35  ;;  %v4881_v50 = vld [vmem:[#allocation23_spill] sm:$0xff] }
 0x7f8   :  { %3095 = vmatmul.mubr.msk.bf16.vlgmr.msra.gmra.mrb[84].mxu0 %vm348_vm0, %v4491_v58  ;;  %3096 = vmatmul.mubr.msk.bf16.vlgmr.msra.gmra.mrb[84].mxu1 %vm348_vm0, %v4491_v58 }
 0x7f9   :  { %2725 = vmatpush1.bf16.msra.mxu0 %v4857_v24  ;;  %2766 = vmatpush1.bf16.msra.mxu1 %v4858_v30 }
 0x7fa   :  { %2726 = vmatprep.subr.bf16.mxu0 %v4859_v31  ;;  %2767 = vmatprep.subr.bf16.mxu1 %v4860_v26 }
 0x7fb   :  { %2756 = vmatprep.mubr.bf16.mxu0 %v4780_v49  ;;  %2797 = vmatprep.mubr.bf16.mxu1 %v4780_v49 }
 0x7fd   :  { %2727 = vmatpush1.bf16.msra.mxu0 %v4861_v28  ;;  %2768 = vmatpush1.bf16.msra.mxu1 %v4862_v45 }
 0x7fe   :  { %2728 = vmatprep.subr.bf16.mxu0 %v4863_v47  ;;  %2769 = vmatprep.subr.bf16.mxu1 %v4864_v19 }
 0x801   :  { %2729 = vmatpush1.bf16.msra.mxu0 %v4865_v39  ;;  %2770 = vmatpush1.bf16.msra.mxu1 %v4866_v43 }
 0x802   :  { %2730 = vmatprep.subr.bf16.mxu0 %v4867_v27  ;;  %2771 = vmatprep.subr.bf16.mxu1 %v4868_v0 }
 0x805   :  { %2731 = vmatpush1.bf16.msra.mxu0 %v4869_v56  ;;  %2772 = vmatpush1.bf16.msra.mxu1 %v4870_v18 }
 0x806   :  { %2809 = vmatprep.subr.bf16.mxu0 %v4871_v21  ;;  %2850 = vmatprep.subr.bf16.mxu1 %v4881_v50 }
 0x8ab   :  { %v2460_v35 = vpop.f32.mrb[76].mxu0  ;;  %v2501_v24 = vpop.f32.mrb[76].mxu1 }
 0x8ac   :  { %v2462_v30 = vpop.f32.mrb[77].mxu0  ;;  %v2503_v31 = vpop.f32.mrb[77].mxu1 }
 0x8ad   :  { %v2464_v26 = vpop.f32.mrb[78].mxu0  ;;  %v2505_v28 = vpop.f32.mrb[78].mxu1 }
 0x8ae   :  { %v2465_v45 = vpop.f32.mrb[79].mxu0  ;;  %v2506_v47 = vpop.f32.mrb[79].mxu1 }
 0x8af   :  { %v214_v47 = vmul.f32 %v4786_v29, %v160_v17 }
 0x8bb   :  { %v2545_v19 = vpop.f32.mrb[80].mxu0  ;;  %v2586_v39 = vpop.f32.mrb[80].mxu1 }
 0x8bc   :  { %v2546_v43 = vadd.f32 %v2545_v19, %v2460_v35  ;;  %v2587_v27 = vadd.f32 %v2586_v39, %v2501_v24  ;;  %v2547_v0 = vpop.f32.mrb[81].mxu0  ;;  %v2588_v56 = vpop.f32.mrb[81].mxu1 }
 0x8bd   :  { %v2548_v63 = vadd.f32 %v2547_v0, %v2462_v30  ;;  %v2589_v18 = vadd.f32 %v2588_v56, %v2503_v31  ;;  %v2549_v51 = vpop.f32.mrb[82].mxu0  ;;  %v2590_v21 = vpop.f32.mrb[82].mxu1 }
 0x8be   :  { %v2593_v58 = vadd.f32 %v2546_v43, %v4882_v13  ;;  %v2550_v40 = vpop.f32.mrb[83].mxu0  ;;  %v2591_v25 = vpop.f32.mrb[83].mxu1  ;;  %v2595_v11 = vadd.f32 %v2587_v27, %v4884_v15  ;;  %v266_v43 = vadd.f32 %v3789_v59, %v213_v2 }
 0x8bf   :  { %v2594_v54 = vadd.f32 %v2548_v63, %v4883_v41 }
 0x8c0   :  { %v2597_v22 = vmul.f32 0.5, %v2593_v58 }
 0x8c1   :  { %v2601_v5 = vmul.f32 0.5, %v2594_v54  ;;  %v267_v54 = vadd.f32 %v3795_v20, %v214_v47 }
 0x8c2   :  { %3355 = vtanh.f32 %v2597_v22 }
 0x8c3   :  { %3357 = vtanh.f32 %v2601_v5 }
 0x8c4   :  { %3359 = vtanh.f32 %v2595_v11 }
 0x8cb   :  { %v2650_v61 = vpop.f32.mrb[84].mxu0  ;;  %v2691_v32 = vpop.f32.mrb[84].mxu1 }
 0x8cc   :  { %v3356_v60 = vpop.eup %3355  ;;  %v2698_v50 = vadd.f32 %v2650_v61, %v264_v16  ;;  %v2652_v35 = vpop.f32.mrb[85].mxu0  ;;  %v2700_v58 = vadd.f32 %v2691_v32, %v266_v43 }
 0x8cd   :  { %v2693_v24 = vpop.f32.mrb[85].mxu1  ;;  %v3358_v30 = vpop.eup %3357  ;;  %v2599_v31 = vmul.f32 0.5, %v3356_v60  ;;  %v2699_v26 = vadd.f32 %v2652_v35, %v265_v7 }
 0x8ce   :  { %v2654_v28 = vpop.f32.mrb[86].mxu0  ;;  %v2695_v45 = vpop.f32.mrb[86].mxu1  ;;  %v2603_v19 = vmul.f32 0.5, %v3358_v30  ;;  %v2702_v39 = vmul.f32 0.5, %v2698_v50  ;;  %v2701_v29 = vadd.f32 %v2693_v24, %v267_v54  ;;  %v3504_v24 = vmov 0.0  }
 0x8cf   :  { %v2655_v27 = vpop.f32.mrb[87].mxu0  ;;  %v2696_v0 = vpop.f32.mrb[87].mxu1  ;;  %v2600_v56 = vadd.f32 0.5, %v2599_v31  ;;  %v2706_v63 = vmul.f32 0.5, %v2699_v26 }
 0x8d0   :  { %v3360_v51 = vpop.eup %3359  ;;  %v2604_v21 = vadd.f32 0.5, %v2603_v19  ;;  %3361 = vtanh.f32 %v2702_v39  ;;  %v2711_v5 = vmul.f32 0.5, %v2701_v29 }
 0x8d1   :  { %v2611_v40 = vmul.f32 %v3360_v51, %v2600_v56  ;;  %3363 = vtanh.f32 %v2706_v63 }
 0x8d2   :  { %v2610_v25 = vmul.f32 %v2604_v21, %v4483_v8  ;;  %3365 = vtanh.f32 %v2700_v58  ;;  %v2596_v8 = vadd.f32 %v2589_v18, %v3933_v46 }
 0x8d3   :  { %3367 = vtanh.f32 %v2711_v5 }
 0x8d4   :  { %v4601_v22 = vadd.f32 %v2611_v40, %v2610_v25  ;;  %v2606_v16 = vmul.f32 0.5, %v2596_v8 }
 0x8da   :  { %v3362_v59 = vpop.eup %3361 }
 0x8db   :  { %v3364_v11 = vpop.eup %3363  ;;  %v2704_v17 = vmul.f32 0.5, %v3362_v59 }
 0x8dc   :  { %v2708_v1 = vmul.f32 0.5, %v3364_v11  ;;  %v3366_v48 = vpop.eup %3365 }
 0x8dd   :  { %v2705_v4 = vadd.f32 0.5, %v2704_v17  ;;  %v3368_v20 = vpop.eup %3367 }
 0x8de   :  { %v2709_v42 = vadd.f32 0.5, %v2708_v1  ;;  %v2713_v61 = vmul.f32 0.5, %v3368_v20 }
 0x8df   :  { %v2716_v57 = vmul.f32 %v3366_v48, %v2705_v4 }
 0x8e0   :  { %v2715_v2 = vmul.f32 %v2709_v42, %v4487_v34  ;;  %v2714_v32 = vadd.f32 0.5, %v2713_v61 }
 0x8e2   :  { %v2717_v55 = vadd.f32 %v2716_v57, %v2715_v2 }
 0x8e4   :  { %3369 = vtanh.f32 %v2717_v55 }
 0x8e5   :  { %3371 = vtanh.f32 %v2606_v16 }
 0x8e6   :  { %3373 = vtanh.f32 %v4601_v22 }
 0x8ee   :  { %v3370_v38 = vpop.eup %3369 }
 0x8ef   :  { %v2719_v7 = vmul.f32 %v3370_v38, %v2714_v32  ;;  %v3372_v50 = vpop.eup %3371 }
 0x8f0   :  { %v2608_v34 = vmul.f32 0.5, %v3372_v50 }
 0x8f1   :  { %v2720_v60 = vpack.c.bf16 %v2719_v7, %v2719_v7 }
 0x8f2   :  { %v2609_v18 = vadd.f32 0.5, %v2608_v34 }
 0x8f3   :  { %3097 = vmatmul.mubr.msk.bf16.vlgmr.msra.gmra.mrb[88].mxu0 %vm348_vm0, %v2720_v60  ;;  %3098 = vmatmul.mubr.msk.bf16.vlgmr.msra.gmra.mrb[88].mxu1 %vm348_vm0, %v2720_v60 }
 0x8f4   :  { %2810 = vmatpush1.bf16.msra.mxu0 %v4305_v6  ;;  %2851 = vmatpush1.bf16.msra.mxu1 %v4308_v33  ;;  %v3374_v6 = vpop.eup %3373 }
 0x8f5   :  { %2811 = vmatprep.subr.bf16.mxu0 %v4311_v53  ;;  %2852 = vmatprep.subr.bf16.mxu1 %v4314_v37  ;;  %v2614_v33 = vmul.f32 %v3374_v6, %v2609_v18  ;;  %v2913_v53 = vld [vmem:[%s4666_s7] sm:$0xff]  ;;  %v2914_v37 = vld [vmem:[%s4666_s7 + $0x8] sm:$0xff] }
 0x8f6   :  { %2841 = vmatprep.mubr.bf16.mxu0 %v4780_v49  ;;  %2882 = vmatprep.mubr.bf16.mxu1 %v4780_v49 }
 0x8f7   :  { %v2615_v49 = vpack.c.bf16 %v2614_v33, %v2614_v33 }
 0x8f8   :  { %2812 = vmatpush1.bf16.msra.mxu0 %v4319_v52  ;;  %2853 = vmatpush1.bf16.msra.mxu1 %v4322_v14  ;;  %v3132_v52 = vpack.c.bf16 %v2914_v37, %v2913_v53  ;;  %v3502_v14 = vmov 0.0|0.0  }
 0x8f9   :  { %2813 = vmatprep.subr.bf16.mxu0 %v4325_v23  ;;  %2854 = vmatprep.subr.bf16.mxu1 %v4328_v9  ;;  %v2915_v23 = vld [vmem:[%s4666_s7 + $0x10] sm:$0xff]  ;;  %v2916_v9 = vld [vmem:[%s4666_s7 + $0x18] sm:$0xff] }
 0x8fc   :  { %2814 = vmatpush1.bf16.msra.mxu0 %v4331_v44  ;;  %2855 = vmatpush1.bf16.msra.mxu1 %v4334_v3  ;;  %v3135_v44 = vpack.c.bf16 %v2916_v9, %v2915_v23  ;;  %v2917_v3 = vld [vmem:[%s4666_s7 + $0x20] sm:$0xff] }
 0x8fd   :  { %2815 = vmatprep.subr.bf16.mxu0 %v4337_v36  ;;  %2856 = vmatprep.subr.bf16.mxu1 %v4340_v12  ;;  %v2918_v36 = vld [vmem:[%s4666_s7 + $0x28] sm:$0xff] }
 0x8fe   :  { %v3138_v12 = vpack.c.bf16 %v2918_v36, %v2917_v3 }
 0x900   :  { %2816 = vmatpush1.bf16.msra.mxu0 %v4343_v10  ;;  %2857 = vmatpush1.bf16.msra.mxu1 %v4346_v62  ;;  %v2919_v10 = vld [vmem:[%s4666_s7 + $0x30] sm:$0xff]  ;;  %v2920_v62 = vld [vmem:[%s4666_s7 + $0x38] sm:$0xff] }
 0x901   :  { %3131 = vmatprep.subr.bf16.mxu0 %v3502_v14  ;;  %v3141_v35 = vpack.c.bf16 %v2920_v62, %v2919_v10 }
 0x903   :  { %3099 = vmatmul.mubr.msk.bf16.vlgmr.msra.gmra.mrb[92].mxu0 %vm348_vm0, %v2615_v49  ;;  %3100 = vmatmul.mubr.msk.bf16.vlgmr.msra.gmra.mrb[92].mxu1 %vm348_vm0, %v2615_v49 }
 0x904   :  { %3133 = vmatpush3.bf16.msra.mxu0 %v3132_v52  ;;  %3128 = vmatprep.mubr.msk.f32.mxu0 %vm3503_vm1, %v3504_v24 }
 0x905   :  { %3134 = vmatprep.subr.bf16.mxu0 %v3502_v14 }
 0x908   :  { %3136 = vmatpush3.bf16.msra.mxu0 %v3135_v44 }
 0x909   :  { %3137 = vmatprep.subr.bf16.mxu0 %v3502_v14 }
 0x90c   :  { %3139 = vmatpush3.bf16.msra.mxu0 %v3138_v12 }
 0x90d   :  { %3140 = vmatprep.subr.bf16.mxu0 %v3502_v14 }
 0x910   :  { %3142 = vmatpush3.bf16.msra.mxu0 %v3141_v35 }
 0x9c6   :  { %v2758_v30 = vpop.f32.mrb[88].mxu0  ;;  %v2799_v31 = vpop.f32.mrb[88].mxu1 }
 0x9c7   :  { %v2760_v26 = vpop.f32.mrb[89].mxu0  ;;  %v2801_v28 = vpop.f32.mrb[89].mxu1 }
 0x9c8   :  { %v2762_v45 = vpop.f32.mrb[90].mxu0  ;;  %v2803_v47 = vpop.f32.mrb[90].mxu1 }
 0x9c9   :  { %v2763_v19 = vpop.f32.mrb[91].mxu0  ;;  %v2804_v39 = vpop.f32.mrb[91].mxu1 }
 0x9d6   :  { %v2843_v43 = vpop.f32.mrb[92].mxu0  ;;  %v2884_v27 = vpop.f32.mrb[92].mxu1 }
 0x9d7   :  { %v2844_v0 = vadd.f32 %v2843_v43, %v2758_v30  ;;  %v2885_v56 = vadd.f32 %v2884_v27, %v2799_v31  ;;  %v2845_v63 = vpop.f32.mrb[93].mxu0  ;;  %v2886_v51 = vpop.f32.mrb[93].mxu1 }
 0x9d8   :  { %v2846_v21 = vadd.f32 %v2845_v63, %v2760_v26  ;;  %v2887_v58 = vadd.f32 %v2886_v51, %v2801_v28  ;;  %v2847_v40 = vpop.f32.mrb[94].mxu0  ;;  %v2888_v25 = vpop.f32.mrb[94].mxu1 }
 0x9d9   :  { %v2891_v54 = vadd.f32 %v2844_v0, %v4882_v13  ;;  %v2848_v29 = vpop.f32.mrb[95].mxu0  ;;  %v2889_v5 = vpop.f32.mrb[95].mxu1  ;;  %v2893_v1 = vadd.f32 %v2885_v56, %v4884_v15 }
 0x9da   :  { %v2892_v59 = vadd.f32 %v2846_v21, %v4883_v41  ;;  %v2894_v4 = vadd.f32 %v2887_v58, %v3933_v46  ;;  %v3101_v46 = vld [vmem:[#allocation2] ss:$0 sm:$0xff] }
 0x9db   :  { %v2895_v11 = vmul.f32 0.5, %v2891_v54 }
 0x9dc   :  { %v2899_v17 = vmul.f32 0.5, %v2892_v59  ;;  %v2904_v48 = vmul.f32 0.5, %v2894_v4 }
 0x9dd   :  { %3375 = vtanh.f32 %v2895_v11 }
 0x9de   :  { %3377 = vtanh.f32 %v2899_v17 }
 0x9df   :  { %3379 = vtanh.f32 %v2893_v1 }
 0x9e0   :  { %3381 = vtanh.f32 %v2904_v48 }
 0x9e7   :  { %v3376_v42 = vpop.eup %3375 }
 0x9e8   :  { %v3378_v57 = vpop.eup %3377  ;;  %v2897_v2 = vmul.f32 0.5, %v3376_v42 }
 0x9e9   :  { %v2901_v8 = vmul.f32 0.5, %v3378_v57  ;;  %v3380_v55 = vpop.eup %3379 }
 0x9ea   :  { %v2898_v13 = vadd.f32 0.5, %v2897_v2  ;;  %v3382_v32 = vpop.eup %3381 }
 0x9eb   :  { %v2902_v20 = vadd.f32 0.5, %v2901_v8  ;;  %v2906_v15 = vmul.f32 0.5, %v3382_v32 }
 0x9ec   :  { %v2909_v16 = vmul.f32 %v3380_v55, %v2898_v13 }
 0x9ed   :  { %v2908_v41 = vmul.f32 %v2902_v20, %v4601_v22  ;;  %v2907_v38 = vadd.f32 0.5, %v2906_v15 }
 0x9ef   :  { %v2910_v61 = vadd.f32 %v2909_v16, %v2908_v41 }
 0x9f1   :  { %3383 = vtanh.f32 %v2910_v61 }
 0x9fb   :  { %v3384_v7 = vpop.eup %3383 }
 0x9fc   :  { %v2912_v60 = vmul.f32 %v3384_v7, %v2907_v38 }
 0x9fe   :  { %3129 = vmatmul.mubr.msk.f32.vlgmr.msra.gmra.mrb[96].mxu0 %vm348_vm0, %v2912_v60 }
 0xad1   :  { %v2997_v50 = vpop.f32.mrb[96].mxu0 }
 0xad2   :  { %v2998_v34 = vadd.f32 %v3101_v46, %v2997_v50  ;;  %v3130_v6 = vpop.f32.mrb[97].mxu0 }
 0xad4   :  { %3002 = vst.msk [vmem:[%s4668_s9] sm:$0xff] %vm3001_vm2, %v2998_v34 }
 0xad5   :  { %3007 = vsyncpa [#allocation4], 1 }
 0xad6   :  { %3008 = vsyncpa [#allocation6], 1 }

</bundles_post_ra>
